<compile_context>
chip_gen: v7x
topology: tpu7x:2x2x1
jax: 0.10.0
libtpu: 0.0.40
codegen_flags: <defaults>
</compile_context>

<pallas_src>
import functools
import numpy as np
import jax
import jax.numpy as jnp
from jax.experimental import pallas as pl
from jax.experimental.pallas import tpu as pltpu

VMEM_LIMIT_BYTES = 48 * 1024 * 1024   # above the 16/32 MiB scoped defaults, below v7x's 64 MiB physical


# --------------------------------------------------------------------------------------
# Kernel 1: DownModule (down_type='max')
#   Conv1d(Cin->Cout, k=1) -> BatchNorm1d(eval, affine) -> ReLU -> masked max over keys
# --------------------------------------------------------------------------------------
def _down_kernel(kfd_ref, mask_ref, wt_ref, b_ref, bns_ref, bnb_ref, out_ref):
    # kfd_ref : (tile_n*Kd, Cin) bf16  gathered source-voxel features (flat, voxel-major)
    # mask_ref: (tile_n, Kd)     f32   1.0 == empty key slot (index -1)
    maskf = mask_ref[...]
    tn, kd = maskf.shape

    x = kfd_ref[...].astype(jnp.float32)
    y = jnp.dot(x, wt_ref[...], preferred_element_type=jnp.float32) + b_ref[...]
    y = jnp.maximum(y * bns_ref[...] + bnb_ref[...], 0.0)          # eval-BN affine + ReLU
    cout = y.shape[1]
    y = y.reshape(tn, kd, cout)                                     # layout-preserving (Kd % 8 == 0)

    # TODO(synk): original VOTR lets the zero-filled (-1) keys take part in the max; they are
    # masked here (post-activation, pre-max) per review to drop the constant ReLU(bias) term.
    y = jnp.where(maskf[:, :, None] > 0.5, jnp.float32(-3e38), y)
    mx = jnp.max(y, axis=1)                                         # (tn, Cout)
    all_masked = jnp.min(maskf, axis=1, keepdims=True) > 0.5        # padded voxel rows -> 0
    out_ref[...] = jnp.where(all_masked, 0.0, mx).astype(out_ref.dtype)


def down_module_forward(key_feat_flat, maskf, w, b, bns, bnb, *, tile_n):
    n_pad, kd = maskf.shape
    cin = key_feat_flat.shape[1]
    cout = w.shape[1]
    return pl.pallas_call(
        _down_kernel,
        out_shape=jax.ShapeDtypeStruct((n_pad, cout), jnp.float32),
        grid_spec=pltpu.PrefetchScalarGridSpec(
            num_scalar_prefetch=0,
            grid=(n_pad // tile_n,),
            in_specs=[
                pl.BlockSpec((tile_n * kd, cin), lambda i: (i, 0)),
                pl.BlockSpec((tile_n, kd), lambda i: (i, 0)),
                pl.BlockSpec((cin, cout), lambda i: (0, 0)),
                pl.BlockSpec((1, cout), lambda i: (0, 0)),
                pl.BlockSpec((1, cout), lambda i: (0, 0)),
                pl.BlockSpec((1, cout), lambda i: (0, 0)),
            ],
            out_specs=pl.BlockSpec((tile_n, cout), lambda i: (i, 0)),
        ),
        compiler_params=pltpu.CompilerParams(
            dimension_semantics=("parallel",),
            vmem_limit_bytes=VMEM_LIMIT_BYTES,
        ),
    )(key_feat_flat, maskf, w, b, bns, bnb)


# --------------------------------------------------------------------------------------
# Kernel 2: SubMAttention3d block
#   key_pos_emb = ReLU(Conv1d(3->C, k=1)(rel_coords))
#   key = key_feat + key_pos_emb
#   MultiheadAttention(q=feat*scale, k=key*scale, v=key, key_padding_mask)   [scales folded]
#   x = BN1(feat + attn);  x = BN2(x + Linear2(ReLU(Linear1(x))))
# Per-head contraction/expansion uses a (C, H) block-indicator matrix (hmat); the MXU is
# otherwise idle at these shapes and this keeps all operands in the flat, minor-dim-C layout.
# --------------------------------------------------------------------------------------
def _subm_kernel(kf_ref, rel_ref, mask_ref, vf_ref,
                 hmat_ref, hmatT_ref,
                 wpos_ref, bpos_ref,
                 wq_ref, bq_ref, wk_ref, bk_ref, wv_ref, bv_ref,
                 wo_ref, bo_ref, n1s_ref, n1b_ref,
                 w1_ref, b1_ref, w2_ref, b2_ref, n2s_ref, n2b_ref,
                 out_ref, *, num_heads):
    # kf_ref : (tile_n*K, C) bf16   gathered key features (flat, voxel-major)
    # rel_ref: (tile_n*K, 3) f32    relative key coords
    # mask_ref: (tile_n, K)  f32    1.0 == padded key
    # vf_ref : (tile_n, C)   f32    query voxel features
    maskf = mask_ref[...]
    vf = vf_ref[...]
    tn, K = maskf.shape
    C = vf.shape[1]
    H = num_heads

    kf = kf_ref[...].astype(jnp.float32)                       # (tn*K, C)
    rel = rel_ref[...]                                         # (tn*K, 3)

    # positional embedding (Conv1d(3, C, 1) + ReLU) on the flat key rows
    pos = jnp.dot(rel, wpos_ref[...], preferred_element_type=jnp.float32) + bpos_ref[...]
    key = kf + jnp.maximum(pos, 0.0)                           # (tn*K, C)

    # q/k/v projections; scale and head_dim**-0.5 are already folded into wq/bq/wk
    q = jnp.dot(vf, wq_ref[...], preferred_element_type=jnp.float32) + bq_ref[...]     # (tn, C)
    k = jnp.dot(key, wk_ref[...], preferred_element_type=jnp.float32) + bk_ref[...]    # (tn*K, C)
    v = jnp.dot(key, wv_ref[...], preferred_element_type=jnp.float32) + bv_ref[...]    # (tn*K, C)

    # per-head logits: logits[n,k,h] = sum_{c in head h} q[n,c] * k[n,k,c]
    prod = k.reshape(tn, K, C) * q[:, None, :]                 # layout-preserving reshape (K%8==0)
    logits = jnp.dot(prod.reshape(tn * K, C), hmat_ref[...],
                     preferred_element_type=jnp.float32).reshape(tn, K, H)
    logits = jnp.where(maskf[:, :, None] > 0.5, jnp.float32(-1e30), logits)

    # softmax over the key axis; divide moved to the EUP slot
    m = jnp.max(logits, axis=1, keepdims=True)
    e = jnp.exp(logits - m)
    s = jnp.sum(e, axis=1, keepdims=True)
    attn = e * pl.reciprocal(s, approx=True)                   # (tn, K, H)

    # weighted value sum: ctx[n,c] = sum_k attn[n,k,head(c)] * v[n,k,c]
    attn_full = jnp.dot(attn.reshape(tn * K, H), hmatT_ref[...],
                        preferred_element_type=jnp.float32)     # (tn*K, C)
    ctx = jnp.sum((attn_full * v).reshape(tn, K, C), axis=1)    # (tn, C)
    attn_out = jnp.dot(ctx, wo_ref[...], preferred_element_type=jnp.float32) + bo_ref[...]

    # residual + norm1 (eval BatchNorm1d affine)
    x = (vf + attn_out) * n1s_ref[...] + n1b_ref[...]
    # feed-forward: linear1 -> ReLU -> linear2, residual, norm2
    h1 = jnp.maximum(jnp.dot(x, w1_ref[...], preferred_element_type=jnp.float32) + b1_ref[...], 0.0)
    x = x + jnp.dot(h1, w2_ref[...], preferred_element_type=jnp.float32) + b2_ref[...]
    x = x * n2s_ref[...] + n2b_ref[...]
    out_ref[...] = x.astype(out_ref.dtype)


_SUBM_PARAM_ORDER = ["hmat", "hmatT", "wpos", "bpos", "wq", "bq", "wk", "bk", "wv", "bv",
                     "wo", "bo", "n1s", "n1b", "w1", "b1", "w2", "b2", "n2s", "n2b"]


def subm_attention_forward(kf_flat, rel_flat, maskf, feat, params, *, num_heads, tile_n):
    N, C = feat.shape
    K = maskf.shape[1]
    param_arrays = [params[name] for name in _SUBM_PARAM_ORDER]

    def full_spec(a):
        nd = a.ndim
        return pl.BlockSpec(a.shape, lambda i, _nd=nd: (0,) * _nd)

    in_specs = [
        pl.BlockSpec((tile_n * K, C), lambda i: (i, 0)),
        pl.BlockSpec((tile_n * K, 3), lambda i: (i, 0)),
        pl.BlockSpec((tile_n, K), lambda i: (i, 0)),
        pl.BlockSpec((tile_n, C), lambda i: (i, 0)),
    ] + [full_spec(a) for a in param_arrays]

    kernel = functools.partial(_subm_kernel, num_heads=num_heads)
    return pl.pallas_call(
        kernel,
        out_shape=jax.ShapeDtypeStruct((N, C), jnp.float32),
        grid_spec=pltpu.PrefetchScalarGridSpec(
            num_scalar_prefetch=0,
            grid=(N // tile_n,),
            in_specs=in_specs,
            out_specs=pl.BlockSpec((tile_n, C), lambda i: (i, 0)),
        ),
        compiler_params=pltpu.CompilerParams(
            dimension_semantics=("parallel",),
            vmem_limit_bytes=VMEM_LIMIT_BYTES,
        ),
    )(kf_flat, rel_flat, maskf, feat, *param_arrays)


# --------------------------------------------------------------------------------------
# Parameter init (deterministic, synthetic)
# --------------------------------------------------------------------------------------
def _linear(key, fan_in, fan_out):
    kw, kb = jax.random.split(key)
    w = jax.random.normal(kw, (fan_in, fan_out), jnp.float32) / np.sqrt(fan_in)
    b = 0.01 * jax.random.normal(kb, (1, fan_out), jnp.float32)
    return w, b


def _bn_affine(key, c, eps=1e-5):
    k1, k2, k3, k4 = jax.random.split(key, 4)
    gamma = 1.0 + 0.1 * jax.random.normal(k1, (c,), jnp.float32)
    beta = 0.1 * jax.random.normal(k2, (c,), jnp.float32)
    mean = 0.1 * jax.random.normal(k3, (c,), jnp.float32)
    var = jnp.abs(1.0 + 0.1 * jax.random.normal(k4, (c,), jnp.float32))
    scale = gamma / jnp.sqrt(var + eps)
    shift = beta - mean * scale
    return scale.reshape(1, c), shift.reshape(1, c)


def init_subm_params(key, c, ff, num_heads, scale):
    keys = jax.random.split(key, 9)
    wpos, bpos = _linear(keys[0], 3, c)
    wq, bq = _linear(keys[1], c, c)
    wk, bk = _linear(keys[2], c, c)
    wv, bv = _linear(keys[3], c, c)
    wo, bo = _linear(keys[4], c, c)
    n1s, n1b = _bn_affine(keys[5], c)
    w1, b1 = _linear(keys[6], c, ff)
    w2, b2 = _linear(keys[7], ff, c)
    n2s, n2b = _bn_affine(keys[8], c)
    dh = c // num_heads
    inv_sqrt_dh = 1.0 / float(np.sqrt(dh))
    # Fold torch's `query * scale` + MHA-internal head_dim**-0.5 into the q projection and
    # `key * scale` into the k projection -> no per-tile VPU multiplies in the kernel.
    wq = wq * (scale * inv_sqrt_dh)
    bq = bq * inv_sqrt_dh
    wk = wk * scale
    hmat = jnp.asarray((np.arange(c)[:, None] // dh == np.arange(num_heads)[None, :]).astype(np.float32))
    return dict(hmat=hmat, hmatT=hmat.T, wpos=wpos, bpos=bpos, wq=wq, bq=bq, wk=wk, bk=bk,
                wv=wv, bv=bv, wo=wo, bo=bo, n1s=n1s, n1b=n1b, w1=w1, b1=b1, w2=w2, b2=b2,
                n2s=n2s, n2b=n2b)


# --------------------------------------------------------------------------------------
# Host-side sparse index building (replaces votr_utils CUDA hash-table ops)
# TODO(synk): hash_table_down_sample / *_attention_hash_indices are CUDA hash-table index
#             builders with no Pallas equivalent; synthesized deterministically in numpy.
# --------------------------------------------------------------------------------------
def build_sparse_example(seed, n_in, tile_n, k_down, k_subm):
    rng = np.random.default_rng(seed)
    X, Y, Z = 16, 16, 8                       # spatial shape (x, y, z)
    flat = rng.choice(X * Y * Z, size=n_in, replace=False)
    z = (flat // (X * Y)).astype(np.int32)
    y = ((flat % (X * Y)) // X).astype(np.int32)
    x = (flat % X).astype(np.int32)
    in_indices = np.stack([np.zeros(n_in, np.int32), z, y, x], axis=1)   # [b, z, y, x]

    # hash_table_down_sample equivalent (stride 2,2,2)
    ds = in_indices.copy()
    ds[:, 1] //= 2; ds[:, 2] //= 2; ds[:, 3] //= 2
    _, first = np.unique(ds, axis=0, return_index=True)
    new_indices = ds[np.sort(first)]
    n_ds = new_indices.shape[0]

    # DownModule LocalAttention gather: input voxels inside each stride window
    in_map = {tuple(c): i for i, c in enumerate(in_indices.tolist())}
    down_idx = -np.ones((n_ds, k_down), np.int32)
    for n in range(n_ds):
        b, dz, dy, dx = new_indices[n]
        cnt = 0
        for oz in range(2):
            for oy in range(2):
                for ox in range(2):
                    key = (b, 2 * dz + oz, 2 * dy + oy, 2 * dx + ox)
                    if key in in_map and cnt < k_down:
                        down_idx[n, cnt] = in_map[key]
                        cnt += 1

    # SubM LocalAttention gather: neighbors within range 1 on the downsampled grid
    ds_map = {tuple(c): i for i, c in enumerate(new_indices.tolist())}
    subm_idx = -np.ones((n_ds, k_subm), np.int32)
    for n in range(n_ds):
        b, dz, dy, dx = new_indices[n]
        subm_idx[n, 0] = n
        cnt = 1
        for oz in (-1, 0, 1):
            for oy in (-1, 0, 1):
                for ox in (-1, 0, 1):
                    if oz == oy == ox == 0:
                        continue
                    key = (b, dz + oz, dy + oy, dx + ox)
                    if key in ds_map and cnt < k_subm:
                        subm_idx[n, cnt] = ds_map[key]
                        cnt += 1

    # pad downsampled voxel count to a multiple of the kernel tile
    n_pad = ((n_ds + tile_n - 1) // tile_n) * tile_n
    pad = n_pad - n_ds
    new_indices_p = np.concatenate([new_indices, np.zeros((pad, 4), np.int32)], 0)
    down_idx_p = np.concatenate([down_idx, -np.ones((pad, k_down), np.int32)], 0)
    subm_pad = -np.ones((pad, k_subm), np.int32)
    subm_pad[:, 0] = np.arange(n_ds, n_pad)      # padded rows attend to themselves only
    subm_idx_p = np.concatenate([subm_idx, subm_pad], 0)
    return in_indices, new_indices_p, down_idx_p, subm_idx_p, n_ds


# --------------------------------------------------------------------------------------
# Full AttentionBlock forward
# --------------------------------------------------------------------------------------
def attention_block_forward(in_features, new_indices_p, down_idx_p, subm_idx_p,
                            down_params, subm_params_list, *, num_heads, tile_n,
                            new_voxel_size, pc_range_min):
    n_in = in_features.shape[0]
    n_pad, k_down = down_idx_p.shape
    k_subm = subm_idx_p.shape[1]

    # ---- DownModule: gather (XLA) + fused conv1x1/BN/ReLU/masked-max (Pallas) ----
    # TODO(synk): votr_utils.grouping_operation / hash index builders are CUDA ops with no clean
    # Pallas equivalent; the row gathers stay in XLA (fused with the bf16 downcast) rather than
    # being done in-kernel (data-dependent sublane gather lowering is not relied on here).
    down_mask = jnp.asarray((down_idx_p < 0).astype(np.float32))
    d_idx = jnp.asarray(np.clip(down_idx_p, 0, n_in - 1).reshape(-1))
    key_feat_down = in_features[d_idx].astype(jnp.bfloat16)            # (n_pad*k_down, Cin)
    feat = down_module_forward(key_feat_down, down_mask,
                               down_params["w"], down_params["b"],
                               down_params["bns"], down_params["bnb"], tile_n=tile_n)

    # voxel coords on the downsampled grid (with_coords): (idx[:, [3,2,1]] + 0.5) * vsize + min_range
    coords = (jnp.asarray(new_indices_p[:, [3, 2, 1]], jnp.float32) + 0.5) \
        * jnp.asarray(new_voxel_size, jnp.float32)[None, :] \
        + jnp.asarray(pc_range_min, jnp.float32)[None, :]

    subm_mask = jnp.asarray((subm_idx_p < 0).astype(np.float32))
    s_idx = jnp.asarray(np.clip(subm_idx_p, 0, n_pad - 1).reshape(-1))  # (n_pad*k_subm,)
    # relative key coords, flat voxel-major rows; masked slots carry finite garbage which the
    # attention mask removes, so no (1-mask) multiply / extra HBM temporary is needed.
    rel = (coords[s_idx].reshape(n_pad, k_subm, 3) - coords[:, None, :]).reshape(n_pad * k_subm, 3)

    # ---- stacked SubMAttention3d blocks ----
    for p in subm_params_list:
        kf_flat = feat[s_idx].astype(jnp.bfloat16)      # (n_pad*k_subm, C), bf16 halves HBM traffic
        feat = subm_attention_forward(kf_flat, rel, subm_mask, feat, p,
                                      num_heads=num_heads, tile_n=tile_n)
    return feat


if __name__ == "__main__":
    # config (small, consistent with the module)
    C_IN, C_OUT = 16, 32           # DOWN_CFGS.CHANNELS
    FF = 64                        # SUBM_CFGS.CHANNELS[1]
    NUM_HEADS = 4
    NUM_BLOCKS = 2
    K_DOWN, K_SUBM = 8, 16         # attention SIZE (multiples of 8 keep reshapes layout-preserving)
    TILE_N = 128                   # sweep 256-1024 (down) / 128-512 (subm) at production N;
                                   # 128 keeps grid >= 2 at this demo size so both v7x TCs are busy
    SCALE_CFG = 0                  # SUBM_CFGS.SCALE
    SCALE = float((C_OUT // NUM_HEADS) ** (SCALE_CFG * 0.5))
    N_IN_VOXELS = 400

    root = jax.random.PRNGKey(0)
    k_feat, k_down, k_subm = jax.random.split(root, 3)

    in_indices, new_indices_p, down_idx_p, subm_idx_p, n_ds = build_sparse_example(
        0, N_IN_VOXELS, TILE_N, K_DOWN, K_SUBM)

    in_features = jax.random.normal(k_feat, (N_IN_VOXELS, C_IN), jnp.float32)

    # DownModule params: Conv1d(C_IN, C_OUT, 1) + BatchNorm1d(C_OUT) in eval mode
    kd = jax.random.split(k_down, 2)
    dw, db = _linear(kd[0], C_IN, C_OUT)
    dbns, dbnb = _bn_affine(kd[1], C_OUT)
    down_params = dict(w=dw, b=db, bns=dbns, bnb=dbnb)

    subm_params_list = [init_subm_params(k, C_OUT, FF, NUM_HEADS, SCALE)
                        for k in jax.random.split(k_subm, NUM_BLOCKS)]

    voxel_size = np.array([0.05, 0.05, 0.1], np.float32)
    new_voxel_size = voxel_size * np.array([2, 2, 2], np.float32)
    pc_range_min = np.array([0.0, -2.0, -1.0], np.float32)

    out_padded = attention_block_forward(
        in_features, new_indices_p, down_idx_p, subm_idx_p,
        down_params, subm_params_list,
        num_heads=NUM_HEADS, tile_n=TILE_N,
        new_voxel_size=new_voxel_size, pc_range_min=pc_range_min)

    out = out_padded[:n_ds]                      # drop padded voxels
    out = jax.block_until_ready(out)
    assert out.shape == (n_ds, C_OUT) and bool(jnp.all(jnp.isfinite(out)))
    print("KERNEL_OK")
</pallas_src>

<mosaic_0001>
module attributes {stable_mosaic.version = 11 : i64} {
  func.func @_down_kernel(%arg0: i32, %arg1: memref<1024x16xbf16, #tpu.memory_space<vmem>>, %arg2: memref<128x8xf32, #tpu.memory_space<vmem>>, %arg3: memref<16x32xf32, #tpu.memory_space<vmem>>, %arg4: memref<1x32xf32, #tpu.memory_space<vmem>>, %arg5: memref<1x32xf32, #tpu.memory_space<vmem>>, %arg6: memref<1x32xf32, #tpu.memory_space<vmem>>, %arg7: memref<128x32xf32, #tpu.memory_space<vmem>>) attributes {dimension_semantics = [#tpu.dimension_semantics<parallel>], iteration_bounds = array<i64: 2>, scalar_prefetch = 0 : i64, scratch_operands = 0 : i64, tpu.core_type = #tpu.core_type<tc>, window_params = [{transform_indices = @transform_0, window_bounds = array<i64: 1024, 16>}, {transform_indices = @transform_1, window_bounds = array<i64: 128, 8>}, {pipeline_mode = #tpu.pipeline_mode<synchronous>, transform_indices = @transform_2, window_bounds = array<i64: 16, 32>}, {pipeline_mode = #tpu.pipeline_mode<synchronous>, transform_indices = @transform_3, window_bounds = array<i64: 1, 32>}, {pipeline_mode = #tpu.pipeline_mode<synchronous>, transform_indices = @transform_4, window_bounds = array<i64: 1, 32>}, {pipeline_mode = #tpu.pipeline_mode<synchronous>, transform_indices = @transform_5, window_bounds = array<i64: 1, 32>}, {transform_indices = @transform_6, window_bounds = array<i64: 128, 32>}]} {
    %c0 = arith.constant 0 : index
    %c0_0 = arith.constant 0 : index
    %0 = vector.load %arg2[%c0, %c0_0] : memref<128x8xf32, #tpu.memory_space<vmem>>, vector<128x8xf32>
    %c0_1 = arith.constant 0 : index
    %c0_2 = arith.constant 0 : index
    %1 = vector.load %arg1[%c0_1, %c0_2] : memref<1024x16xbf16, #tpu.memory_space<vmem>>, vector<1024x16xbf16>
    %2 = arith.extf %1 : vector<1024x16xbf16> to vector<1024x16xf32>
    %c0_3 = arith.constant 0 : index
    %c0_4 = arith.constant 0 : index
    %3 = vector.load %arg3[%c0_3, %c0_4] : memref<16x32xf32, #tpu.memory_space<vmem>>, vector<16x32xf32>
    %cst = arith.constant dense<0.000000e+00> : vector<1024x32xf32>
    %4 = tpu.matmul %2, %3, %cst {dimension_numbers = #tpu.dot_dimension_numbers<[1], [0], [0], [1], [0, 0, 1, 1], [], []>} : vector<1024x16xf32>, vector<16x32xf32>, vector<1024x32xf32> -> vector<1024x32xf32>
    %c0_5 = arith.constant 0 : index
    %c0_6 = arith.constant 0 : index
    %5 = vector.load %arg4[%c0_5, %c0_6] : memref<1x32xf32, #tpu.memory_space<vmem>>, vector<1x32xf32>
    %6 = vector.broadcast %5 : vector<1x32xf32> to vector<1024x32xf32>
    %7 = arith.addf %4, %6 : vector<1024x32xf32>
    %c0_7 = arith.constant 0 : index
    %c0_8 = arith.constant 0 : index
    %8 = vector.load %arg5[%c0_7, %c0_8] : memref<1x32xf32, #tpu.memory_space<vmem>>, vector<1x32xf32>
    %9 = vector.broadcast %8 : vector<1x32xf32> to vector<1024x32xf32>
    %10 = arith.mulf %7, %9 : vector<1024x32xf32>
    %c0_9 = arith.constant 0 : index
    %c0_10 = arith.constant 0 : index
    %11 = vector.load %arg6[%c0_9, %c0_10] : memref<1x32xf32, #tpu.memory_space<vmem>>, vector<1x32xf32>
    %12 = vector.broadcast %11 : vector<1x32xf32> to vector<1024x32xf32>
    %13 = arith.addf %10, %12 : vector<1024x32xf32>
    %cst_11 = arith.constant 0.000000e+00 : f32
    %14 = vector.broadcast %cst_11 : f32 to vector<1024x32xf32>
    %15 = arith.maximumf %13, %14 : vector<1024x32xf32>
    %16 = vector.shape_cast %15 : vector<1024x32xf32> to vector<128x8x32xf32>
    %17 = vector.shape_cast %0 : vector<128x8xf32> to vector<128x8x1xf32>
    %cst_12 = arith.constant 5.000000e-01 : f32
    %18 = vector.broadcast %cst_12 : f32 to vector<128x8x1xf32>
    %19 = arith.cmpf ogt, %17, %18 : vector<128x8x1xf32>
    %cst_13 = arith.constant -3.000000e+38 : f32
    %20 = vector.shape_cast %19 : vector<128x8x1xi1> to vector<128x8x1xi1>
    %21 = vector.broadcast %20 : vector<128x8x1xi1> to vector<128x8x32xi1>
    %22 = vector.broadcast %cst_13 : f32 to vector<128x8x32xf32>
    %23 = arith.select %21, %22, %16 : vector<128x8x32xi1>, vector<128x8x32xf32>
    %cst_14 = arith.constant dense<0xFF800000> : vector<128x32xf32>
    %24 = vector.multi_reduction <maximumf>, %23, %cst_14 [1] : vector<128x8x32xf32> to vector<128x32xf32>
    %cst_15 = arith.constant dense<0x7F800000> : vector<128xf32>
    %25 = vector.multi_reduction <minimumf>, %0, %cst_15 [1] : vector<128x8xf32> to vector<128xf32>
    %26 = vector.shape_cast %25 : vector<128xf32> to vector<128x1xf32>
    %cst_16 = arith.constant 5.000000e-01 : f32
    %27 = vector.broadcast %cst_16 : f32 to vector<128x1xf32>
    %28 = arith.cmpf ogt, %26, %27 : vector<128x1xf32>
    %cst_17 = arith.constant 0.000000e+00 : f32
    %29 = vector.shape_cast %28 : vector<128x1xi1> to vector<128x1xi1>
    %30 = vector.broadcast %29 : vector<128x1xi1> to vector<128x32xi1>
    %31 = vector.broadcast %cst_17 : f32 to vector<128x32xf32>
    %32 = arith.select %30, %31, %24 : vector<128x32xi1>, vector<128x32xf32>
    %c0_18 = arith.constant 0 : index
    %c0_19 = arith.constant 0 : index
    %33 = vector.load %arg7[%c0_18, %c0_19] : memref<128x32xf32, #tpu.memory_space<vmem>>, vector<128x32xf32>
    tpu.vector_store %arg7[%c0_18, %c0_19], %32 {strides = array<i32>} : memref<128x32xf32, #tpu.memory_space<vmem>>, vector<128x32xf32>,
    return
  }
  func.func @transform_0(%arg0: i32) -> (i32, i32) {
    %c0_i32 = arith.constant 0 : i32
    %c0_i32_0 = arith.constant 0 : i32
    return %arg0, %c0_i32 : i32, i32
  }
  func.func @transform_1(%arg0: i32) -> (i32, i32) {
    %c0_i32 = arith.constant 0 : i32
    %c0_i32_0 = arith.constant 0 : i32
    return %arg0, %c0_i32 : i32, i32
  }
  func.func @transform_2(%arg0: i32) -> (i32, i32) {
    %c0_i32 = arith.constant 0 : i32
    %c0_i32_0 = arith.constant 0 : i32
    %c0_i32_1 = arith.constant 0 : i32
    return %c0_i32, %c0_i32_0 : i32, i32
  }
  func.func @transform_3(%arg0: i32) -> (i32, i32) {
    %c0_i32 = arith.constant 0 : i32
    %c0_i32_0 = arith.constant 0 : i32
    %c0_i32_1 = arith.constant 0 : i32
    return %c0_i32, %c0_i32_0 : i32, i32
  }
  func.func @transform_4(%arg0: i32) -> (i32, i32) {
    %c0_i32 = arith.constant 0 : i32
    %c0_i32_0 = arith.constant 0 : i32
    %c0_i32_1 = arith.constant 0 : i32
    return %c0_i32, %c0_i32_0 : i32, i32
  }
  func.func @transform_5(%arg0: i32) -> (i32, i32) {
    %c0_i32 = arith.constant 0 : i32
    %c0_i32_0 = arith.constant 0 : i32
    %c0_i32_1 = arith.constant 0 : i32
    return %c0_i32, %c0_i32_0 : i32, i32
  }
  func.func @transform_6(%arg0: i32) -> (i32, i32) {
    %c0_i32 = arith.constant 0 : i32
    %c0_i32_0 = arith.constant 0 : i32
    return %arg0, %c0_i32 : i32, i32
  }
}

</mosaic_0001>

<bundles_post_ra>
// kernel: tpu_custom_call.1
= control target key start
LH: loop header
LB: loop body
LE: loop exit
PB: predicated region body
PF: predicated region fallthrough
CT: control target
= control target key end

     0   :  { %s5682_s21 = smov 0   ;;  %s8208_s0 = inlined_call_operand.vmem [shape: bf16[2048,16], index: 0, kind: input, shape index: {}]   ;;  %s8209_s1 = inlined_call_operand.vmem [shape: f32[256,8], index: 1, kind: input, shape index: {}]   ;;  %s8210_s2 = inlined_call_operand.vmem [shape: f32[16,32], index: 2, kind: input, shape index: {}]   ;;  %s8211_s3 = inlined_call_operand.vmem [shape: f32[1,32], index: 3, kind: input, shape index: {}]   ;;  %s8212_s4 = inlined_call_operand.vmem [shape: f32[1,32], index: 4, kind: input, shape index: {}]   ;;  %s8213_s5 = inlined_call_operand.vmem [shape: f32[1,32], index: 5, kind: input, shape index: {}]   ;;  %s8214_s6 = inlined_call_operand.vmem [shape: f32[256,32], index: 6, kind: output, shape index: {}]  }
   0x1 LB: > { %s4811_s22 = sadd.s32 4294967295, %s5645_s21   ;;  %p4815_p0 = scmp.ge.s32.totalorder %s5645_s21, 1  ;;  %s5645_s21 = sphi %s5682_s21, %s16_s21  }
   0x2   : > { %p224_p1 = scmp.lt.s32.totalorder %s5645_s21, 3 }
   0x4   : > { %p225_p2 = pnand %p4815_p0, %p224_p1 }
   0x6   : > { %228 = sbr.rel (%p225_p2) target bundleno = 701 (0x2bd), region = 44 }
   0xd   : > { %v549_v0 = vld [vmem:[%s8210_s2] sm:$0xff]  ;;  %v550_v1 = vld [vmem:[%s8210_s2 + $0x8] sm:$0xff]  ;;  %s4818_s27 = sshll.u32 %s4811_s22, 4  ;;  %v2046_v2 = vlaneseq  ;;  %s4816_s28 = sshll.u32 %s4811_s22, 7  ;;  %vm558_vm0 = vcmask 130048   ;;  %vm3454_vm1 = vcmask 261120  }
   0xe   : > { %v5600_v3 = vpack.c.bf16 %v550_v1, %v549_v0  ;;  %p266_p3 = scmp.lt.s32.totalorder %s4818_s27, 31  ;;  %p260_p4 = scmp.lt.s32.totalorder %s4816_s28, 255 }
   0xf   : > { %v2047_v4 = vshrl.u32 %v2046_v2, 7 }
  0x10   : > { %5601 = vmatprep.subr.bf16.mxu0 %v5600_v3  ;;  %s8612_s27 = smov (!%p266_p3, %s4818_s27), 31  ;;  %5604 = vmatprep.subr.bf16.mxu1 %v5600_v3  ;;  %s8614_s28 = smov (!%p260_p4, %s4816_s28), 255 }
  0x11   : > { %5603 = vmatpush3.bf16.msra.mxu0 %v5600_v3  ;;  %v5698_v5 = vsub.s32 2, %v2047_v4  ;;  %v5700_v6 = vsub.s32 0, %v2047_v4  ;;  %5605 = vmatpush3.bf16.msra.mxu1 %v5600_v3  ;;  %s4819_s29 = sshll.u32 %s8612_s27, 3  ;;  %s4817_s9 = sshll.u32 %s8614_s28, 2  ;;  %v5710_v7 = vsub.s32 3, %v2047_v4  ;;  %v5712_v8 = vsub.s32 1, %v2047_v4 }
  0x12   : > { %s5708_s8 = scalar_lea.vmem %s8209_s1, %s4819_s29  ;;  %s5720_s12 = scalar_lea.vmem %s8208_s0, %s4817_s9  ;;  %v5729_v15 = vsub.s32 5, %v2047_v4  ;;  %v5731_v19 = vsub.s32 4, %v2047_v4  ;;  %v5749_v33 = vsub.s32 7, %v2047_v4  ;;  %v5751_v34 = vsub.s32 6, %v2047_v4 }
  0x13   : > { %v5715_v9 = vld [vmem:[%s5708_s8] sm:$0xff]  ;;  %v5211_v13 = vld [vmem:[%s5720_s12 + $0x8] sm:$0xff]   ;;  %v5212_v25 = vld [vmem:[%s5720_s12 + $0x10] sm:$0xff]   ;;  %s7923_s18 = scalar_lea.vmem %s8214_s6, %s4819_s29 }
  0x14   : > { %v2063_v10 = vrot.slane %v5715_v9, %v5698_v5  ;;  %v2049_v11 = vrot.slane %v5715_v9, %v5700_v6  ;;  %v4956_v12 = vld [vmem:[%s5720_s12] sm:$0xff]   ;;  %v4961_v18 = vunpack.c.l.bf16 %v5211_v13  ;;  %v5243_v20 = vld [vmem:[%s5720_s12 + $0x108] sm:$0xff]   ;;  %v2070_v21 = vrot.slane %v5715_v9, %v5710_v7  ;;  %v5244_v28 = vld [vmem:[%s5720_s12 + $0x110] sm:$0xff]  }
  0x15   : > { %v5242_v14 = vld [vmem:[%s5720_s12 + $0x100] sm:$0xff]   ;;  %v4957_v16 = vunpack.c.l.bf16 %v4956_v12  ;;  %v4958_v17 = vunpack.c.h.bf16 %v4956_v12  ;;  %v2056_v22 = vrot.slane %v5715_v9, %v5712_v8  ;;  %v5089_v26 = vunpack.c.l.bf16 %v5243_v20  ;;  %v5213_v35 = vld [vmem:[%s5720_s12 + $0x18] sm:$0xff]   ;;  %v5766_v44 = vld [vmem:[%s5708_s8 + $0x8] sm:$0xff] }
  0x16   : > { %2065 = vbcast.lane.b32.xlu1 %v2063_v10, 256  ;;  %2051 = vbcast.lane.b32.xlu0 %v2049_v11, 256  ;;  %v5085_v23 = vunpack.c.l.bf16 %v5242_v14  ;;  %v5086_v24 = vunpack.c.h.bf16 %v5242_v14  ;;  %v4962_v27 = vunpack.c.h.bf16 %v5211_v13  ;;  %v4965_v29 = vunpack.c.l.bf16 %v5212_v25  ;;  %v5245_v38 = vld [vmem:[%s5720_s12 + $0x118] sm:$0xff]   ;;  %v5214_v43 = vld [vmem:[%s5720_s12 + $0x20] sm:$0xff]   ;;  %v5215_v52 = vld [vmem:[%s5720_s12 + $0x28] sm:$0xff]  }
  0x17   : > { %5408 = vmatprep.mubr.msk.f32.mxu0 %vm558_vm0, %v4957_v16  ;;  %v5090_v30 = vunpack.c.h.bf16 %v5243_v20  ;;  %v2084_v31 = vrot.slane %v5715_v9, %v5729_v15  ;;  %v2077_v32 = vrot.slane %v5715_v9, %v5731_v19  ;;  %v5093_v36 = vunpack.c.l.bf16 %v5244_v28  ;;  %v5246_v47 = vld [vmem:[%s5720_s12 + $0x120] sm:$0xff]   ;;  %v5247_v55 = vld [vmem:[%s5720_s12 + $0x128] sm:$0xff]   ;;  %v5216_v60 = vld [vmem:[%s5720_s12 + $0x30] sm:$0xff]  }
  0x18   : > { %5409 = vmatmul.mubr.msk.f32.vlgmr.msra.gmra.mrb[0].mxu0 %vm558_vm0, %v4958_v17  ;;  %5504 = vmatprep.mubr.msk.f32.mxu1 %vm558_vm0, %v5085_v23  ;;  %v4966_v37 = vunpack.c.h.bf16 %v5212_v25  ;;  %v4969_v39 = vunpack.c.l.bf16 %v5213_v35  ;;  %v5094_v40 = vunpack.c.h.bf16 %v5244_v28  ;;  %v2098_v41 = vrot.slane %v5715_v9, %v5749_v33  ;;  %v5248_v63 = vld [vmem:[%s5720_s12 + $0x130] sm:$0xff]   ;;  %v5217_v4 = vld [vmem:[%s5720_s12 + $0x38] sm:$0xff]   ;;  %v5218_v17 = vld [vmem:[%s5720_s12 + $0x40] sm:$0xff]  }
  0x19   : > { %5411 = vmatprep.mubr.msk.f32.mxu0 %vm558_vm0, %v4961_v18  ;;  %5505 = vmatmul.mubr.msk.f32.vlgmr.msra.gmra.mrb[0].mxu1 %vm558_vm0, %v5086_v24  ;;  %v2091_v42 = vrot.slane %v5715_v9, %v5751_v34  ;;  %v5097_v45 = vunpack.c.l.bf16 %v5245_v38  ;;  %v4970_v46 = vunpack.c.h.bf16 %v5213_v35  ;;  %v4973_v48 = vunpack.c.l.bf16 %v5214_v43  ;;  %v5249_v11 = vld [vmem:[%s5720_s12 + $0x138] sm:$0xff]   ;;  %v5809_v18 = vld [vmem:[%s5708_s8 + $0x10] sm:$0xff] }
  0x1a   : > { %2072 = vbcast.lane.b32.xlu1 %v2070_v21, 256  ;;  %2058 = vbcast.lane.b32.xlu0 %v2056_v22, 256  ;;  %v5098_v49 = vunpack.c.h.bf16 %v5245_v38  ;;  %v2112_v50 = vrot.slane %v5766_v44, %v5712_v8  ;;  %v2105_v51 = vrot.slane %v5766_v44, %v5700_v6  ;;  %v5101_v53 = vunpack.c.l.bf16 %v5246_v47  ;;  %v5250_v22 = vld [vmem:[%s5720_s12 + $0x140] sm:$0xff]  }
  0x1b   : > { %5507 = vmatprep.mubr.msk.f32.mxu1 %vm558_vm0, %v5089_v26  ;;  %v4974_v54 = vunpack.c.h.bf16 %v5214_v43  ;;  %v4977_v56 = vunpack.c.l.bf16 %v5215_v52  ;;  %v5102_v57 = vunpack.c.h.bf16 %v5246_v47  ;;  %v2126_v58 = vrot.slane %v5766_v44, %v5710_v7 }
  0x1c   : > { %5412 = vmatmul.mubr.msk.f32.gmra.mrb[2].mxu0 %vm558_vm0, %v4962_v27  ;;  %v2119_v59 = vrot.slane %v5766_v44, %v5698_v5  ;;  %v5105_v61 = vunpack.c.l.bf16 %v5247_v55  ;;  %v4978_v62 = vunpack.c.h.bf16 %v5215_v52  ;;  %v4981_v0 = vunpack.c.l.bf16 %v5216_v60  ;;  %v5219_v27 = vld [vmem:[%s5720_s12 + $0x48] sm:$0xff]  }
  0x1d   : > { %5414 = vmatprep.mubr.msk.f32.mxu0 %vm558_vm0, %v4965_v29  ;;  %5508 = vmatmul.mubr.msk.f32.gmra.mrb[2].mxu1 %vm558_vm0, %v5090_v30  ;;  %v5106_v1 = vunpack.c.h.bf16 %v5247_v55  ;;  %v2140_v2 = vrot.slane %v5766_v44, %v5729_v15  ;;  %v2133_v3 = vrot.slane %v5766_v44, %v5731_v19  ;;  %v5109_v9 = vunpack.c.l.bf16 %v5248_v63  ;;  %v5251_v30 = vld [vmem:[%s5720_s12 + $0x148] sm:$0xff]  }
  0x1e   : > { %2086 = vbcast.lane.b32.xlu1 %v2084_v31, 256  ;;  %2079 = vbcast.lane.b32.xlu0 %v2077_v32, 256  ;;  %v4982_v10 = vunpack.c.h.bf16 %v5216_v60  ;;  %v4985_v12 = vunpack.c.l.bf16 %v5217_v4  ;;  %v5110_v13 = vunpack.c.h.bf16 %v5248_v63  ;;  %v2154_v14 = vrot.slane %v5766_v44, %v5749_v33 }
  0x1f   : > { %5510 = vmatprep.mubr.msk.f32.mxu1 %vm558_vm0, %v5093_v36  ;;  %v2147_v16 = vrot.slane %v5766_v44, %v5751_v34  ;;  %v5113_v20 = vunpack.c.l.bf16 %v5249_v11  ;;  %v4986_v21 = vunpack.c.h.bf16 %v5217_v4  ;;  %v4989_v23 = vunpack.c.l.bf16 %v5218_v17 }
  0x20   : > { %5415 = vmatmul.mubr.msk.f32.gmra.mrb[4].mxu0 %vm558_vm0, %v4966_v37  ;;  %v5114_v24 = vunpack.c.h.bf16 %v5249_v11  ;;  %v2168_v25 = vrot.slane %v5809_v18, %v5712_v8  ;;  %v2161_v26 = vrot.slane %v5809_v18, %v5700_v6  ;;  %v5117_v28 = vunpack.c.l.bf16 %v5250_v22  ;;  %v5220_v37 = vld [vmem:[%s5720_s12 + $0x50] sm:$0xff]  }
  0x21   : > { %5417 = vmatprep.mubr.msk.f32.mxu0 %vm558_vm0, %v4969_v39  ;;  %5511 = vmatmul.mubr.msk.f32.gmra.mrb[4].mxu1 %vm558_vm0, %v5094_v40  ;;  %v4990_v29 = vunpack.c.h.bf16 %v5218_v17  ;;  %v4993_v31 = vunpack.c.l.bf16 %v5219_v27  ;;  %v5118_v32 = vunpack.c.h.bf16 %v5250_v22  ;;  %v2182_v35 = vrot.slane %v5809_v18, %v5710_v7  ;;  %v5252_v40 = vld [vmem:[%s5720_s12 + $0x150] sm:$0xff]  }
  0x22   : > { %2100 = vbcast.lane.b32.xlu1 %v2098_v41, 256  ;;  %2093 = vbcast.lane.b32.xlu0 %v2091_v42, 256  ;;  %v2175_v36 = vrot.slane %v5809_v18, %v5698_v5  ;;  %v5121_v38 = vunpack.c.l.bf16 %v5251_v30  ;;  %v4994_v39 = vunpack.c.h.bf16 %v5219_v27  ;;  %v4997_v41 = vunpack.c.l.bf16 %v5220_v37 }
  0x23   : > { %5513 = vmatprep.mubr.msk.f32.mxu1 %vm558_vm0, %v5097_v45  ;;  %v5122_v42 = vunpack.c.h.bf16 %v5251_v30  ;;  %v2196_v43 = vrot.slane %v5809_v18, %v5729_v15  ;;  %v2189_v44 = vrot.slane %v5809_v18, %v5731_v19  ;;  %v5221_v45 = vld [vmem:[%s5720_s12 + $0x58] sm:$0xff]   ;;  %v4998_v47 = vunpack.c.h.bf16 %v5220_v37 }
  0x24   : > { %5418 = vmatmul.mubr.msk.f32.gmra.mrb[6].mxu0 %vm558_vm0, %v4970_v46  ;;  %v5125_v46 = vunpack.c.l.bf16 %v5252_v40  ;;  %v2203_v52 = vrot.slane %v5809_v18, %v5751_v34 }
  0x25   : > { %5420 = vmatprep.mubr.msk.f32.mxu0 %vm558_vm0, %v4973_v48  ;;  %5514 = vmatmul.mubr.msk.f32.gmra.mrb[6].mxu1 %vm558_vm0, %v5098_v49  ;;  %v5253_v48 = vld [vmem:[%s5720_s12 + $0x158] sm:$0xff]   ;;  %v5001_v49 = vunpack.c.l.bf16 %v5221_v45 }
  0x26   : > { %2114 = vbcast.lane.b32.xlu1 %v2112_v50, 256  ;;  %2107 = vbcast.lane.b32.xlu0 %v2105_v51, 256  ;;  %v5126_v50 = vunpack.c.h.bf16 %v5252_v40  ;;  %v2210_v51 = vrot.slane %v5809_v18, %v5749_v33  ;;  %v5129_v55 = vunpack.c.l.bf16 %v5253_v48 }
  0x27   : > { %5516 = vmatprep.mubr.msk.f32.mxu1 %vm558_vm0, %v5101_v53  ;;  %v5222_v53 = vld [vmem:[%s5720_s12 + $0x60] sm:$0xff]  }
  0x28   : > { %5421 = vmatmul.mubr.msk.f32.gmra.mrb[8].mxu0 %vm558_vm0, %v4974_v54  ;;  %v5852_v54 = vld [vmem:[%s5708_s8 + $0x18] sm:$0xff] }
  0x29   : > { %5423 = vmatprep.mubr.msk.f32.mxu0 %vm558_vm0, %v4977_v56  ;;  %5517 = vmatmul.mubr.msk.f32.gmra.mrb[8].mxu1 %vm558_vm0, %v5102_v57  ;;  %v5002_v56 = vunpack.c.h.bf16 %v5221_v45  ;;  %v5254_v57 = vld [vmem:[%s5720_s12 + $0x160] sm:$0xff]   ;;  %v2224_v60 = vrot.slane %v5852_v54, %v5712_v8  ;;  %v2238_v4 = vrot.slane %v5852_v54, %v5710_v7  ;;  %v2252_v17 = vrot.slane %v5852_v54, %v5729_v15 }
  0x2a   : > { %2128 = vbcast.lane.b32.xlu1 %v2126_v58, 256  ;;  %2121 = vbcast.lane.b32.xlu0 %v2119_v59, 256  ;;  %v5005_v58 = vunpack.c.l.bf16 %v5222_v53  ;;  %v5130_v59 = vunpack.c.h.bf16 %v5253_v48  ;;  %v5133_v63 = vunpack.c.l.bf16 %v5254_v57  ;;  %v2245_v18 = vrot.slane %v5852_v54, %v5731_v19 }
  0x2b   : > { %5519 = vmatprep.mubr.msk.f32.mxu1 %vm558_vm0, %v5105_v61  ;;  %v2217_v61 = vrot.slane %v5852_v54, %v5700_v6  ;;  %v2259_v27 = vrot.slane %v5852_v54, %v5751_v34 }
  0x2c   : > { %5424 = vmatmul.mubr.msk.f32.gmra.mrb[10].mxu0 %vm558_vm0, %v4978_v62  ;;  %v5223_v62 = vld [vmem:[%s5720_s12 + $0x68] sm:$0xff]  }
  0x2d   : > { %5426 = vmatprep.mubr.msk.f32.mxu0 %vm558_vm0, %v4981_v0  ;;  %5520 = vmatmul.mubr.msk.f32.gmra.mrb[10].mxu1 %vm558_vm0, %v5106_v1  ;;  %v5006_v0 = vunpack.c.h.bf16 %v5222_v53  ;;  %v5255_v1 = vld [vmem:[%s5720_s12 + $0x168] sm:$0xff]  }
  0x2e   : > { %2142 = vbcast.lane.b32.xlu1 %v2140_v2, 256  ;;  %2135 = vbcast.lane.b32.xlu0 %v2133_v3, 256  ;;  %v5009_v2 = vunpack.c.l.bf16 %v5223_v62  ;;  %v5134_v3 = vunpack.c.h.bf16 %v5254_v57  ;;  %v5137_v11 = vunpack.c.l.bf16 %v5255_v1 }
  0x2f   : > { %5522 = vmatprep.mubr.msk.f32.mxu1 %vm558_vm0, %v5109_v9  ;;  %v2231_v9 = vrot.slane %v5852_v54, %v5698_v5 }
  0x30   : > { %5427 = vmatmul.mubr.msk.f32.gmra.mrb[12].mxu0 %vm558_vm0, %v4982_v10  ;;  %v5224_v10 = vld [vmem:[%s5720_s12 + $0x70] sm:$0xff]  }
  0x31   : > { %5429 = vmatprep.mubr.msk.f32.mxu0 %vm558_vm0, %v4985_v12  ;;  %5523 = vmatmul.mubr.msk.f32.gmra.mrb[12].mxu1 %vm558_vm0, %v5110_v13  ;;  %v5010_v12 = vunpack.c.h.bf16 %v5223_v62  ;;  %v5256_v13 = vld [vmem:[%s5720_s12 + $0x170] sm:$0xff]   ;;  %v5014_v22 = vunpack.c.h.bf16 %v5224_v10 }
  0x32   : > { %2156 = vbcast.lane.b32.xlu1 %v2154_v14, 256  ;;  %2149 = vbcast.lane.b32.xlu0 %v2147_v16, 256  ;;  %v5013_v14 = vunpack.c.l.bf16 %v5224_v10  ;;  %v5138_v16 = vunpack.c.h.bf16 %v5255_v1 }
  0x33   : > { %5525 = vmatprep.mubr.msk.f32.mxu1 %vm558_vm0, %v5113_v20  ;;  %v5225_v20 = vld [vmem:[%s5720_s12 + $0x78] sm:$0xff]  }
  0x34   : > { %5430 = vmatmul.mubr.msk.f32.gmra.mrb[14].mxu0 %vm558_vm0, %v4986_v21  ;;  %v5141_v21 = vunpack.c.l.bf16 %v5256_v13 }
  0x35   : > { %5432 = vmatprep.mubr.msk.f32.mxu0 %vm558_vm0, %v4989_v23  ;;  %5526 = vmatmul.mubr.msk.f32.gmra.mrb[14].mxu1 %vm558_vm0, %v5114_v24  ;;  %v5257_v23 = vld [vmem:[%s5720_s12 + $0x178] sm:$0xff]   ;;  %v5017_v24 = vunpack.c.l.bf16 %v5225_v20 }
  0x36   : > { %2170 = vbcast.lane.b32.xlu1 %v2168_v25, 256  ;;  %2163 = vbcast.lane.b32.xlu0 %v2161_v26, 256  ;;  %v5142_v25 = vunpack.c.h.bf16 %v5256_v13  ;;  %v2266_v26 = vrot.slane %v5852_v54, %v5749_v33  ;;  %v5145_v30 = vunpack.c.l.bf16 %v5257_v23 }
  0x37   : > { %5528 = vmatprep.mubr.msk.f32.mxu1 %vm558_vm0, %v5117_v28  ;;  %v5226_v28 = vld [vmem:[%s5720_s12 + $0x80] sm:$0xff]  }
  0x38   : > { %5433 = vmatmul.mubr.msk.f32.gmra.mrb[16].mxu0 %vm558_vm0, %v4990_v29  ;;  %v5895_v29 = vld [vmem:[%s5708_s8 + $0x20] sm:$0xff] }
  0x39   : > { %5435 = vmatprep.mubr.msk.f32.mxu0 %vm558_vm0, %v4993_v31  ;;  %5529 = vmatmul.mubr.msk.f32.gmra.mrb[16].mxu1 %vm558_vm0, %v5118_v32  ;;  %v5018_v31 = vunpack.c.h.bf16 %v5225_v20  ;;  %v5258_v32 = vld [vmem:[%s5720_s12 + $0x180] sm:$0xff]   ;;  %v2280_v37 = vrot.slane %v5895_v29, %v5712_v8  ;;  %v2294_v45 = vrot.slane %v5895_v29, %v5710_v7  ;;  %v2308_v53 = vrot.slane %v5895_v29, %v5729_v15 }
  0x3a   : > { %2184 = vbcast.lane.b32.xlu1 %v2182_v35, 256  ;;  %2177 = vbcast.lane.b32.xlu0 %v2175_v36, 256  ;;  %v5021_v35 = vunpack.c.l.bf16 %v5226_v28  ;;  %v5146_v36 = vunpack.c.h.bf16 %v5257_v23  ;;  %v5149_v40 = vunpack.c.l.bf16 %v5258_v32  ;;  %v2301_v54 = vrot.slane %v5895_v29, %v5731_v19 }
  0x3b   : > { %5531 = vmatprep.mubr.msk.f32.mxu1 %vm558_vm0, %v5121_v38  ;;  %v2273_v38 = vrot.slane %v5895_v29, %v5700_v6  ;;  %v2315_v62 = vrot.slane %v5895_v29, %v5751_v34 }
  0x3c   : > { %5436 = vmatmul.mubr.msk.f32.gmra.mrb[18].mxu0 %vm558_vm0, %v4994_v39  ;;  %v5227_v39 = vld [vmem:[%s5720_s12 + $0x88] sm:$0xff]  }
  0x3d   : > { %5438 = vmatprep.mubr.msk.f32.mxu0 %vm558_vm0, %v4997_v41  ;;  %5532 = vmatmul.mubr.msk.f32.gmra.mrb[18].mxu1 %vm558_vm0, %v5122_v42  ;;  %v5022_v41 = vunpack.c.h.bf16 %v5226_v28  ;;  %v5259_v42 = vld [vmem:[%s5720_s12 + $0x188] sm:$0xff]  }
  0x3e   : > { %2198 = vbcast.lane.b32.xlu1 %v2196_v43, 256  ;;  %2191 = vbcast.lane.b32.xlu0 %v2189_v44, 256  ;;  %v5025_v43 = vunpack.c.l.bf16 %v5227_v39  ;;  %v5150_v44 = vunpack.c.h.bf16 %v5258_v32  ;;  %v5153_v48 = vunpack.c.l.bf16 %v5259_v42 }
  0x3f   : > { %5534 = vmatprep.mubr.msk.f32.mxu1 %vm558_vm0, %v5125_v46  ;;  %v2287_v46 = vrot.slane %v5895_v29, %v5698_v5 }
  0x40   : > { %5439 = vmatmul.mubr.msk.f32.gmra.mrb[20].mxu0 %vm558_vm0, %v4998_v47  ;;  %v5228_v47 = vld [vmem:[%s5720_s12 + $0x90] sm:$0xff]  }
  0x41   : > { %5441 = vmatprep.mubr.msk.f32.mxu0 %vm558_vm0, %v5001_v49  ;;  %5535 = vmatmul.mubr.msk.f32.gmra.mrb[20].mxu1 %vm558_vm0, %v5126_v50  ;;  %v5026_v49 = vunpack.c.h.bf16 %v5227_v39  ;;  %v5260_v50 = vld [vmem:[%s5720_s12 + $0x190] sm:$0xff]   ;;  %v5030_v57 = vunpack.c.h.bf16 %v5228_v47 }
  0x42   : > { %2212 = vbcast.lane.b32.xlu1 %v2210_v51, 256  ;;  %2205 = vbcast.lane.b32.xlu0 %v2203_v52, 256  ;;  %v5029_v51 = vunpack.c.l.bf16 %v5228_v47  ;;  %v5154_v52 = vunpack.c.h.bf16 %v5259_v42 }
  0x43   : > { %5537 = vmatprep.mubr.msk.f32.mxu1 %vm558_vm0, %v5129_v55  ;;  %v5229_v55 = vld [vmem:[%s5720_s12 + $0x98] sm:$0xff]  }
  0x44   : > { %5442 = vmatmul.mubr.msk.f32.gmra.mrb[22].mxu0 %vm558_vm0, %v5002_v56  ;;  %v5157_v56 = vunpack.c.l.bf16 %v5260_v50 }
  0x45   : > { %5444 = vmatprep.mubr.msk.f32.mxu0 %vm558_vm0, %v5005_v58  ;;  %5538 = vmatmul.mubr.msk.f32.gmra.mrb[22].mxu1 %vm558_vm0, %v5130_v59  ;;  %v5261_v58 = vld [vmem:[%s5720_s12 + $0x198] sm:$0xff]   ;;  %v5033_v59 = vunpack.c.l.bf16 %v5229_v55 }
  0x46   : > { %2226 = vbcast.lane.b32.xlu1 %v2224_v60, 256  ;;  %2219 = vbcast.lane.b32.xlu0 %v2217_v61, 256  ;;  %v5158_v60 = vunpack.c.h.bf16 %v5260_v50  ;;  %v2322_v61 = vrot.slane %v5895_v29, %v5749_v33  ;;  %v5161_v1 = vunpack.c.l.bf16 %v5261_v58 }
  0x47   : > { %5540 = vmatprep.mubr.msk.f32.mxu1 %vm558_vm0, %v5133_v63  ;;  %v5230_v63 = vld [vmem:[%s5720_s12 + $0xa0] sm:$0xff]  }
  0x48   : > { %5445 = vmatmul.mubr.msk.f32.gmra.mrb[24].mxu0 %vm558_vm0, %v5006_v0  ;;  %v5938_v0 = vld [vmem:[%s5708_s8 + $0x28] sm:$0xff] }
  0x49   : > { %5447 = vmatprep.mubr.msk.f32.mxu0 %vm558_vm0, %v5009_v2  ;;  %5541 = vmatmul.mubr.msk.f32.gmra.mrb[24].mxu1 %vm558_vm0, %v5134_v3  ;;  %v5034_v2 = vunpack.c.h.bf16 %v5229_v55  ;;  %v5262_v3 = vld [vmem:[%s5720_s12 + $0x1a0] sm:$0xff]   ;;  %v2336_v10 = vrot.slane %v5938_v0, %v5712_v8  ;;  %v2350_v20 = vrot.slane %v5938_v0, %v5710_v7  ;;  %v2364_v28 = vrot.slane %v5938_v0, %v5729_v15 }
  0x4a   : > { %2240 = vbcast.lane.b32.xlu1 %v2238_v4, 256  ;;  %2233 = vbcast.lane.b32.xlu0 %v2231_v9, 256  ;;  %v5037_v4 = vunpack.c.l.bf16 %v5230_v63  ;;  %v5162_v9 = vunpack.c.h.bf16 %v5261_v58  ;;  %v5165_v13 = vunpack.c.l.bf16 %v5262_v3  ;;  %v2357_v29 = vrot.slane %v5938_v0, %v5731_v19 }
  0x4b   : > { %5543 = vmatprep.mubr.msk.f32.mxu1 %vm558_vm0, %v5137_v11  ;;  %v2329_v11 = vrot.slane %v5938_v0, %v5700_v6  ;;  %v2371_v39 = vrot.slane %v5938_v0, %v5751_v34 }
  0x4c   : > { %5448 = vmatmul.mubr.msk.f32.gmra.mrb[26].mxu0 %vm558_vm0, %v5010_v12  ;;  %v5231_v12 = vld [vmem:[%s5720_s12 + $0xa8] sm:$0xff]  }
  0x4d   : > { %5450 = vmatprep.mubr.msk.f32.mxu0 %vm558_vm0, %v5013_v14  ;;  %5544 = vmatmul.mubr.msk.f32.gmra.mrb[26].mxu1 %vm558_vm0, %v5138_v16  ;;  %v5038_v14 = vunpack.c.h.bf16 %v5230_v63  ;;  %v5263_v16 = vld [vmem:[%s5720_s12 + $0x1a8] sm:$0xff]  }
  0x4e   : > { %2254 = vbcast.lane.b32.xlu1 %v2252_v17, 256  ;;  %2247 = vbcast.lane.b32.xlu0 %v2245_v18, 256  ;;  %v5041_v17 = vunpack.c.l.bf16 %v5231_v12  ;;  %v5166_v18 = vunpack.c.h.bf16 %v5262_v3  ;;  %v5169_v23 = vunpack.c.l.bf16 %v5263_v16 }
  0x4f   : > { %5546 = vmatprep.mubr.msk.f32.mxu1 %vm558_vm0, %v5141_v21  ;;  %v2343_v21 = vrot.slane %v5938_v0, %v5698_v5 }
  0x50   : > { %5451 = vmatmul.mubr.msk.f32.gmra.mrb[28].mxu0 %vm558_vm0, %v5014_v22  ;;  %v5232_v22 = vld [vmem:[%s5720_s12 + $0xb0] sm:$0xff]  }
  0x51   : > { %5453 = vmatprep.mubr.msk.f32.mxu0 %vm558_vm0, %v5017_v24  ;;  %5547 = vmatmul.mubr.msk.f32.gmra.mrb[28].mxu1 %vm558_vm0, %v5142_v25  ;;  %v5042_v24 = vunpack.c.h.bf16 %v5231_v12  ;;  %v5264_v25 = vld [vmem:[%s5720_s12 + $0x1b0] sm:$0xff]   ;;  %v5046_v32 = vunpack.c.h.bf16 %v5232_v22 }
  0x52   : > { %2268 = vbcast.lane.b32.xlu1 %v2266_v26, 256  ;;  %2261 = vbcast.lane.b32.xlu0 %v2259_v27, 256  ;;  %v5045_v26 = vunpack.c.l.bf16 %v5232_v22  ;;  %v5170_v27 = vunpack.c.h.bf16 %v5263_v16 }
  0x53   : > { %5549 = vmatprep.mubr.msk.f32.mxu1 %vm558_vm0, %v5145_v30  ;;  %v5233_v30 = vld [vmem:[%s5720_s12 + $0xb8] sm:$0xff]  }
  0x54   : > { %5454 = vmatmul.mubr.msk.f32.gmra.mrb[30].mxu0 %vm558_vm0, %v5018_v31  ;;  %v5173_v31 = vunpack.c.l.bf16 %v5264_v25 }
  0x55   : > { %5456 = vmatprep.mubr.msk.f32.mxu0 %vm558_vm0, %v5021_v35  ;;  %5550 = vmatmul.mubr.msk.f32.gmra.mrb[30].mxu1 %vm558_vm0, %v5146_v36  ;;  %v5265_v35 = vld [vmem:[%s5720_s12 + $0x1b8] sm:$0xff]   ;;  %v5049_v36 = vunpack.c.l.bf16 %v5233_v30 }
  0x56   : > { %2282 = vbcast.lane.b32.xlu1 %v2280_v37, 256  ;;  %2275 = vbcast.lane.b32.xlu0 %v2273_v38, 256  ;;  %v5174_v37 = vunpack.c.h.bf16 %v5264_v25  ;;  %v2378_v38 = vrot.slane %v5938_v0, %v5749_v33  ;;  %v5177_v42 = vunpack.c.l.bf16 %v5265_v35 }
  0x57   : > { %5552 = vmatprep.mubr.msk.f32.mxu1 %vm558_vm0, %v5149_v40  ;;  %v5234_v40 = vld [vmem:[%s5720_s12 + $0xc0] sm:$0xff]  }
  0x58   : > { %5457 = vmatmul.mubr.msk.f32.gmra.mrb[32].mxu0 %vm558_vm0, %v5022_v41  ;;  %v5981_v41 = vld [vmem:[%s5708_s8 + $0x30] sm:$0xff] }
  0x59   : > { %5459 = vmatprep.mubr.msk.f32.mxu0 %vm558_vm0, %v5025_v43  ;;  %5553 = vmatmul.mubr.msk.f32.gmra.mrb[32].mxu1 %vm558_vm0, %v5150_v44  ;;  %v5050_v43 = vunpack.c.h.bf16 %v5233_v30  ;;  %v5266_v44 = vld [vmem:[%s5720_s12 + $0x1c0] sm:$0xff]   ;;  %v2392_v47 = vrot.slane %v5981_v41, %v5712_v8  ;;  %v2406_v55 = vrot.slane %v5981_v41, %v5710_v7  ;;  %v2420_v63 = vrot.slane %v5981_v41, %v5729_v15 }
  0x5a   : > { %2296 = vbcast.lane.b32.xlu1 %v2294_v45, 256  ;;  %2289 = vbcast.lane.b32.xlu0 %v2287_v46, 256  ;;  %v5053_v45 = vunpack.c.l.bf16 %v5234_v40  ;;  %v5178_v46 = vunpack.c.h.bf16 %v5265_v35  ;;  %v5181_v50 = vunpack.c.l.bf16 %v5266_v44  ;;  %v2413_v0 = vrot.slane %v5981_v41, %v5731_v19 }
  0x5b   : > { %5555 = vmatprep.mubr.msk.f32.mxu1 %vm558_vm0, %v5153_v48  ;;  %v2385_v48 = vrot.slane %v5981_v41, %v5700_v6  ;;  %v2427_v12 = vrot.slane %v5981_v41, %v5751_v34 }
  0x5c   : > { %5460 = vmatmul.mubr.msk.f32.gmra.mrb[34].mxu0 %vm558_vm0, %v5026_v49  ;;  %v5235_v49 = vld [vmem:[%s5720_s12 + $0xc8] sm:$0xff]  }
  0x5d   : > { %5462 = vmatprep.mubr.msk.f32.mxu0 %vm558_vm0, %v5029_v51  ;;  %5556 = vmatmul.mubr.msk.f32.gmra.mrb[34].mxu1 %vm558_vm0, %v5154_v52  ;;  %v5054_v51 = vunpack.c.h.bf16 %v5234_v40  ;;  %v5267_v52 = vld [vmem:[%s5720_s12 + $0x1c8] sm:$0xff]  }
  0x5e   : > { %2310 = vbcast.lane.b32.xlu1 %v2308_v53, 256  ;;  %2303 = vbcast.lane.b32.xlu0 %v2301_v54, 256  ;;  %v5057_v53 = vunpack.c.l.bf16 %v5235_v49  ;;  %v5182_v54 = vunpack.c.h.bf16 %v5266_v44  ;;  %v5185_v58 = vunpack.c.l.bf16 %v5267_v52  ;;  %v5241_v44 = vld [vmem:[%s5720_s12 + $0xf8] sm:$0xff]  }
  0x5f   : > { %5558 = vmatprep.mubr.msk.f32.mxu1 %vm558_vm0, %v5157_v56  ;;  %v2399_v56 = vrot.slane %v5981_v41, %v5698_v5 }
  0x60   : > { %5463 = vmatmul.mubr.msk.f32.gmra.mrb[36].mxu0 %vm558_vm0, %v5030_v57  ;;  %v5236_v57 = vld [vmem:[%s5720_s12 + $0xd0] sm:$0xff]  }
  0x61   : > { %5465 = vmatprep.mubr.msk.f32.mxu0 %vm558_vm0, %v5033_v59  ;;  %5559 = vmatmul.mubr.msk.f32.gmra.mrb[36].mxu1 %vm558_vm0, %v5158_v60  ;;  %v5058_v59 = vunpack.c.h.bf16 %v5235_v49  ;;  %v5268_v60 = vld [vmem:[%s5720_s12 + $0x1d0] sm:$0xff]   ;;  %v5062_v3 = vunpack.c.h.bf16 %v5236_v57  ;;  %v5273_v49 = vld [vmem:[%s5720_s12 + $0x1f8] sm:$0xff]  }
  0x62   : > { %2324 = vbcast.lane.b32.xlu1 %v2322_v61, 256  ;;  %2317 = vbcast.lane.b32.xlu0 %v2315_v62, 256  ;;  %v5061_v61 = vunpack.c.l.bf16 %v5236_v57  ;;  %v5186_v62 = vunpack.c.h.bf16 %v5267_v52 }
  0x63   : > { %5561 = vmatprep.mubr.msk.f32.mxu1 %vm558_vm0, %v5161_v1  ;;  %v5237_v1 = vld [vmem:[%s5720_s12 + $0xd8] sm:$0xff]  }
  0x64   : > { %5466 = vmatmul.mubr.msk.f32.gmra.mrb[38].mxu0 %vm558_vm0, %v5034_v2  ;;  %v5189_v2 = vunpack.c.l.bf16 %v5268_v60 }
  0x65   : > { %5468 = vmatprep.mubr.msk.f32.mxu0 %vm558_vm0, %v5037_v4  ;;  %5562 = vmatmul.mubr.msk.f32.gmra.mrb[38].mxu1 %vm558_vm0, %v5162_v9  ;;  %v5269_v4 = vld [vmem:[%s5720_s12 + $0x1d8] sm:$0xff]   ;;  %v5065_v9 = vunpack.c.l.bf16 %v5237_v1 }
  0x66   : > { %2338 = vbcast.lane.b32.xlu1 %v2336_v10, 256  ;;  %2331 = vbcast.lane.b32.xlu0 %v2329_v11, 256  ;;  %v5190_v10 = vunpack.c.h.bf16 %v5268_v60  ;;  %v2434_v11 = vrot.slane %v5981_v41, %v5749_v33  ;;  %v5193_v16 = vunpack.c.l.bf16 %v5269_v4 }
  0x67   : > { %5564 = vmatprep.mubr.msk.f32.mxu1 %vm558_vm0, %v5165_v13  ;;  %v5238_v13 = vld [vmem:[%s5720_s12 + $0xe0] sm:$0xff]  }
  0x68   : > { %5469 = vmatmul.mubr.msk.f32.gmra.mrb[40].mxu0 %vm558_vm0, %v5038_v14  ;;  %v6024_v14 = vld [vmem:[%s5708_s8 + $0x38] sm:$0xff] }
  0x69   : > { %5471 = vmatprep.mubr.msk.f32.mxu0 %vm558_vm0, %v5041_v17  ;;  %5565 = vmatmul.mubr.msk.f32.gmra.mrb[40].mxu1 %vm558_vm0, %v5166_v18  ;;  %v5066_v17 = vunpack.c.h.bf16 %v5237_v1  ;;  %v5270_v18 = vld [vmem:[%s5720_s12 + $0x1e0] sm:$0xff]   ;;  %v2448_v22 = vrot.slane %v6024_v14, %v5712_v8  ;;  %v2462_v30 = vrot.slane %v6024_v14, %v5710_v7  ;;  %v2490_v52 = vrot.slane %v6024_v14, %v5749_v33 }
  0x6a   : > { %2352 = vbcast.lane.b32.xlu1 %v2350_v20, 256  ;;  %2345 = vbcast.lane.b32.xlu0 %v2343_v21, 256  ;;  %v5069_v20 = vunpack.c.l.bf16 %v5238_v13  ;;  %v5194_v21 = vunpack.c.h.bf16 %v5269_v4  ;;  %v5197_v25 = vunpack.c.l.bf16 %v5270_v18 }
  0x6b   : > { %5567 = vmatprep.mubr.msk.f32.mxu1 %vm558_vm0, %v5169_v23  ;;  %v2441_v23 = vrot.slane %v6024_v14, %v5700_v6 }
  0x6c   : > { %5472 = vmatmul.mubr.msk.f32.gmra.mrb[42].mxu0 %vm558_vm0, %v5042_v24  ;;  %v5239_v24 = vld [vmem:[%s5720_s12 + $0xe8] sm:$0xff]  }
  0x6d   : > { %5474 = vmatprep.mubr.msk.f32.mxu0 %vm558_vm0, %v5045_v26  ;;  %5568 = vmatmul.mubr.msk.f32.gmra.mrb[42].mxu1 %vm558_vm0, %v5170_v27  ;;  %v5070_v26 = vunpack.c.h.bf16 %v5238_v13  ;;  %v5271_v27 = vld [vmem:[%s5720_s12 + $0x1e8] sm:$0xff]  }
  0x6e   : > { %2366 = vbcast.lane.b32.xlu1 %v2364_v28, 256  ;;  %2359 = vbcast.lane.b32.xlu0 %v2357_v29, 256  ;;  %v5073_v28 = vunpack.c.l.bf16 %v5239_v24  ;;  %v5198_v29 = vunpack.c.h.bf16 %v5270_v18  ;;  %v5201_v35 = vunpack.c.l.bf16 %v5271_v27  ;;  %v5202_v41 = vunpack.c.h.bf16 %v5271_v27 }
  0x6f   : > { %5570 = vmatprep.mubr.msk.f32.mxu1 %vm558_vm0, %v5173_v31  ;;  %v2455_v31 = vrot.slane %v6024_v14, %v5698_v5 }
  0x70   : > { %5475 = vmatmul.mubr.msk.f32.gmra.mrb[44].mxu0 %vm558_vm0, %v5046_v32  ;;  %v5240_v32 = vld [vmem:[%s5720_s12 + $0xf0] sm:$0xff]  }
  0x71   : > { %5477 = vmatprep.mubr.msk.f32.mxu0 %vm558_vm0, %v5049_v36  ;;  %5571 = vmatmul.mubr.msk.f32.gmra.mrb[44].mxu1 %vm558_vm0, %v5174_v37  ;;  %v5077_v40 = vunpack.c.l.bf16 %v5240_v32 }
  0x72   : > { %2380 = vbcast.lane.b32.xlu1 %v2378_v38, 256  ;;  %2373 = vbcast.lane.b32.xlu0 %v2371_v39, 256  ;;  %v5074_v38 = vunpack.c.h.bf16 %v5239_v24  ;;  %v5272_v39 = vld [vmem:[%s5720_s12 + $0x1f0] sm:$0xff]  }
  0x73   : > { %5573 = vmatprep.mubr.msk.f32.mxu1 %vm558_vm0, %v5177_v42  ;;  %v2476_v42 = vrot.slane %v6024_v14, %v5729_v15 }
  0x74   : > { %5478 = vmatmul.mubr.msk.f32.gmra.mrb[46].mxu0 %vm558_vm0, %v5050_v43  ;;  %v2469_v43 = vrot.slane %v6024_v14, %v5731_v19 }
  0x75   : > { %5480 = vmatprep.mubr.msk.f32.mxu0 %vm558_vm0, %v5053_v45  ;;  %5574 = vmatmul.mubr.msk.f32.gmra.mrb[46].mxu1 %vm558_vm0, %v5178_v46  ;;  %v5205_v45 = vunpack.c.l.bf16 %v5272_v39 }
  0x76   : > { %2394 = vbcast.lane.b32.xlu1 %v2392_v47, 256  ;;  %2387 = vbcast.lane.b32.xlu0 %v2385_v48, 256  ;;  %v5078_v48 = vunpack.c.h.bf16 %v5240_v32 }
  0x77   : > { %5576 = vmatprep.mubr.msk.f32.mxu1 %vm558_vm0, %v5181_v50  ;;  %v5081_v50 = vunpack.c.l.bf16 %v5241_v44 }
  0x78   : > { %5481 = vmatmul.mubr.msk.f32.gmra.mrb[48].mxu0 %vm558_vm0, %v5054_v51  ;;  %v5206_v51 = vunpack.c.h.bf16 %v5272_v39 }
  0x79   : > { %5483 = vmatprep.mubr.msk.f32.mxu0 %vm558_vm0, %v5057_v53  ;;  %5577 = vmatmul.mubr.msk.f32.gmra.mrb[48].mxu1 %vm558_vm0, %v5182_v54  ;;  %v2483_v53 = vrot.slane %v6024_v14, %v5751_v34  ;;  %v285_v54 = vld [vmem:[%s5708_s8 + $0x40] sm:$0xff]  ;;  %v286_v14 = vld [vmem:[%s5708_s8 + $0x48] sm:$0xff] }
  0x7a   : > { %2408 = vbcast.lane.b32.xlu1 %v2406_v55, 256  ;;  %2401 = vbcast.lane.b32.xlu0 %v2399_v56, 256  ;;  %v5209_v55 = vunpack.c.l.bf16 %v5273_v49  ;;  %v2504_v60 = vrot.slane %v285_v54, %v5712_v8  ;;  %v2511_v1 = vrot.slane %v285_v54, %v5698_v5  ;;  %v2532_v4 = vrot.slane %v285_v54, %v5729_v15 }
  0x7b   : > { %5579 = vmatprep.mubr.msk.f32.mxu1 %vm558_vm0, %v5185_v58  ;;  %v5082_v58 = vunpack.c.h.bf16 %v5241_v44  ;;  %v2539_v13 = vrot.slane %v285_v54, %v5751_v34  ;;  %v2560_v18 = vrot.slane %v286_v14, %v5712_v8  ;;  %v2567_v24 = vrot.slane %v286_v14, %v5698_v5 }
  0x7c   : > { %5484 = vmatmul.mubr.msk.f32.gmra.mrb[50].mxu0 %vm558_vm0, %v5058_v59  ;;  %v5210_v59 = vunpack.c.h.bf16 %v5273_v49  ;;  %v2588_v27 = vrot.slane %v286_v14, %v5729_v15  ;;  %v2595_v32 = vrot.slane %v286_v14, %v5751_v34 }
  0x7d   : > { %5486 = vmatprep.mubr.msk.f32.mxu0 %vm558_vm0, %v5061_v61  ;;  %5580 = vmatmul.mubr.msk.f32.gmra.mrb[50].mxu1 %vm558_vm0, %v5186_v62  ;;  %v2497_v61 = vrot.slane %v285_v54, %v5700_v6 }
  0x7e   : > { %2422 = vbcast.lane.b32.xlu1 %v2420_v63, 256  ;;  %2415 = vbcast.lane.b32.xlu0 %v2413_v0, 256  ;;  %v2518_v0 = vrot.slane %v285_v54, %v5710_v7 }
  0x7f   : > { %5582 = vmatprep.mubr.msk.f32.mxu1 %vm558_vm0, %v5189_v2 }
  0x80   : > { %5487 = vmatmul.mubr.msk.f32.gmra.mrb[52].mxu0 %vm558_vm0, %v5062_v3 }
  0x81   : > { %5489 = vmatprep.mubr.msk.f32.mxu0 %vm558_vm0, %v5065_v9  ;;  %5583 = vmatmul.mubr.msk.f32.gmra.mrb[52].mxu1 %vm558_vm0, %v5190_v10  ;;  %v2525_v9 = vrot.slane %v285_v54, %v5731_v19 }
  0x82   : > { %2436 = vbcast.lane.b32.xlu1 %v2434_v11, 256  ;;  %2429 = vbcast.lane.b32.xlu0 %v2427_v12, 256  ;;  %v2546_v12 = vrot.slane %v285_v54, %v5749_v33 }
  0x83   : > { %5585 = vmatprep.mubr.msk.f32.mxu1 %vm558_vm0, %v5193_v16 }
  0x84   : > { %5490 = vmatmul.mubr.msk.f32.gmra.mrb[54].mxu0 %vm558_vm0, %v5066_v17 }
  0x85   : > { %5492 = vmatprep.mubr.msk.f32.mxu0 %vm558_vm0, %v5069_v20  ;;  %5586 = vmatmul.mubr.msk.f32.gmra.mrb[54].mxu1 %vm558_vm0, %v5194_v21  ;;  %v2553_v20 = vrot.slane %v286_v14, %v5700_v6 }
  0x86   : > { %2450 = vbcast.lane.b32.xlu1 %v2448_v22, 256  ;;  %2443 = vbcast.lane.b32.xlu0 %v2441_v23, 256  ;;  %v2574_v23 = vrot.slane %v286_v14, %v5710_v7 }
  0x87   : > { %5588 = vmatprep.mubr.msk.f32.mxu1 %vm558_vm0, %v5197_v25 }
  0x88   : > { %5493 = vmatmul.mubr.msk.f32.gmra.mrb[56].mxu0 %vm558_vm0, %v5070_v26  ;;  %v6047_v36 = vpop.permute.xlu1 %2065  ;;  %v6049_v37 = vpop.permute.xlu0 %2051 }
  0x89   : > { %5495 = vmatprep.mubr.msk.f32.mxu0 %vm558_vm0, %v5073_v28  ;;  %5589 = vmatmul.mubr.msk.f32.gmra.mrb[56].mxu1 %vm558_vm0, %v5198_v29  ;;  %v2581_v28 = vrot.slane %v286_v14, %v5731_v19  ;;  %vm2942_vm2 = vcmp.gt.f32.partialorder %v6049_v37, 0.5  ;;  %vm2944_vm3 = vcmp.gt.f32.partialorder %v6047_v36, 0.5 }
  0x8a   : > { %2464 = vbcast.lane.b32.xlu1 %v2462_v30, 256  ;;  %2457 = vbcast.lane.b32.xlu0 %v2455_v31, 256  ;;  %v2602_v31 = vrot.slane %v286_v14, %v5749_v33 }
  0x8b   : > { %5591 = vmatprep.mubr.msk.f32.mxu1 %vm558_vm0, %v5201_v35  ;;  %v287_v35 = vld [vmem:[%s5708_s8 + $0x50] sm:$0xff] }
  0x8c   : > { %5496 = vmatmul.mubr.msk.f32.gmra.mrb[58].mxu0 %vm558_vm0, %v5074_v38  ;;  %v6061_v46 = vpop.permute.xlu1 %2072  ;;  %v6063_v47 = vpop.permute.xlu0 %2058  ;;  %v2630_v44 = vrot.slane %v287_v35, %v5710_v7  ;;  %v2658_v54 = vrot.slane %v287_v35, %v5749_v33 }
  0x8d   : > { %5498 = vmatprep.mubr.msk.f32.mxu0 %vm558_vm0, %v5077_v40  ;;  %5592 = vmatmul.mubr.msk.f32.gmra.mrb[58].mxu1 %vm558_vm0, %v5202_v41  ;;  %v2616_v40 = vrot.slane %v287_v35, %v5712_v8  ;;  %v2609_v41 = vrot.slane %v287_v35, %v5700_v6  ;;  %vm2945_vm4 = vcmp.gt.f32.partialorder %v6061_v46, 0.5  ;;  %vm2943_vm5 = vcmp.gt.f32.partialorder %v6063_v47, 0.5 }
  0x8e   : > { %2478 = vbcast.lane.b32.xlu1 %v2476_v42, 256  ;;  %2471 = vbcast.lane.b32.xlu0 %v2469_v43, 256 }
  0x8f   : > { %5594 = vmatprep.mubr.msk.f32.mxu1 %vm558_vm0, %v5205_v45  ;;  %v2623_v45 = vrot.slane %v287_v35, %v5698_v5 }
  0x90   : > { %5499 = vmatmul.mubr.msk.f32.gmra.mrb[60].mxu0 %vm558_vm0, %v5078_v48  ;;  %v6075_v56 = vpop.permute.xlu1 %2086  ;;  %v6077_v57 = vpop.permute.xlu0 %2079 }
  0x91   : > { %5501 = vmatprep.mubr.msk.f32.mxu0 %vm558_vm0, %v5081_v50  ;;  %5595 = vmatmul.mubr.msk.f32.gmra.mrb[60].mxu1 %vm558_vm0, %v5206_v51  ;;  %v2644_v50 = vrot.slane %v287_v35, %v5729_v15  ;;  %v2637_v51 = vrot.slane %v287_v35, %v5731_v19  ;;  %vm2947_vm6 = vcmp.gt.f32.partialorder %v6075_v56, 0.5  ;;  %vm2946_vm7 = vcmp.gt.f32.partialorder %v6077_v57, 0.5 }
  0x92   : > { %2492 = vbcast.lane.b32.xlu1 %v2490_v52, 256  ;;  %2485 = vbcast.lane.b32.xlu0 %v2483_v53, 256 }
  0x93   : > { %5597 = vmatprep.mubr.msk.f32.mxu1 %vm558_vm0, %v5209_v55  ;;  %v2651_v55 = vrot.slane %v287_v35, %v5751_v34 }
  0x94   : > { %5502 = vmatmul.mubr.msk.f32.gmra.mrb[62].mxu0 %vm558_vm0, %v5082_v58  ;;  %v6085_v62 = vpop.permute.xlu1 %2100  ;;  %v6087_v63 = vpop.permute.xlu0 %2093  ;;  %v288_v58 = vld [vmem:[%s5708_s8 + $0x58] sm:$0xff] }
  0x95   : > { %5598 = vmatmul.mubr.msk.f32.gmra.mrb[62].mxu1 %vm558_vm0, %v5210_v59  ;;  %vm2949_vm8 = vcmp.gt.f32.partialorder %v6085_v62, 0.5  ;;  %vm2948_vm9 = vcmp.gt.f32.partialorder %v6087_v63, 0.5 }
  0x96   : > { %2506 = vbcast.lane.b32.xlu1 %v2504_v60, 256  ;;  %2499 = vbcast.lane.b32.xlu0 %v2497_v61, 256  ;;  %v2672_v61 = vrot.slane %v288_v58, %v5712_v8 }
  0x98   : > { %v6092_v2 = vpop.permute.xlu1 %2114  ;;  %v6094_v3 = vpop.permute.xlu0 %2107 }
  0x99   : > { %vm2951_vm10 = vcmp.gt.f32.partialorder %v6092_v2, 0.5  ;;  %vm2950_vm11 = vcmp.gt.f32.partialorder %v6094_v3, 0.5 }
  0x9a   : > { %2520 = vbcast.lane.b32.xlu1 %v2518_v0, 256  ;;  %2513 = vbcast.lane.b32.xlu0 %v2511_v1, 256  ;;  %v2665_v0 = vrot.slane %v288_v58, %v5700_v6 }
  0x9c   : > { %v6098_v10 = vpop.permute.xlu1 %2128  ;;  %v6100_v11 = vpop.permute.xlu0 %2121 }
  0x9d   : > { %vm2953_vm12 = vcmp.gt.f32.partialorder %v6098_v10, 0.5  ;;  %vm2952_vm13 = vcmp.gt.f32.partialorder %v6100_v11, 0.5 }
  0x9e   : > { %2534 = vbcast.lane.b32.xlu1 %v2532_v4, 256  ;;  %2527 = vbcast.lane.b32.xlu0 %v2525_v9, 256  ;;  %v2686_v9 = vrot.slane %v288_v58, %v5710_v7 }
  0xa0   : > { %v6105_v16 = vpop.permute.xlu1 %2142  ;;  %v6107_v17 = vpop.permute.xlu0 %2135 }
  0xa1   : > { %vm2955_vm14 = vcmp.gt.f32.partialorder %v6105_v16, 0.5  ;;  %vm2954_vm15 = vcmp.gt.f32.partialorder %v6107_v17, 0.5 }
  0xa2   : > { %2548 = vbcast.lane.b32.xlu1 %v2546_v12, 256  ;;  %2541 = vbcast.lane.b32.xlu0 %v2539_v13, 256  ;;  %v2679_v12 = vrot.slane %v288_v58, %v5698_v5 }
  0xa4   : > { %v6111_v21 = vpop.permute.xlu1 %2156  ;;  %v6113_v22 = vpop.permute.xlu0 %2149 }
  0xa5   : > { %vm2957_vm0 = vcmp.gt.f32.partialorder %v6111_v21, 0.5 }
  0xa6   : > { %2562 = vbcast.lane.b32.xlu1 %v2560_v18, 256  ;;  %2555 = vbcast.lane.b32.xlu0 %v2553_v20, 256  ;;  %v2700_v18 = vrot.slane %v288_v58, %v5729_v15  ;;  %v2693_v20 = vrot.slane %v288_v58, %v5731_v19 }
  0xa8   : > { %v6117_v25 = vpop.permute.xlu1 %2170  ;;  %v6119_v26 = vpop.permute.xlu0 %2163 }
  0xaa   : > { %2576 = vbcast.lane.b32.xlu1 %v2574_v23, 256  ;;  %2569 = vbcast.lane.b32.xlu0 %v2567_v24, 256 }
  0xac   : > { %v6123_v29 = vpop.permute.xlu1 %2184  ;;  %v6125_v30 = vpop.permute.xlu0 %2177 }
  0xae   : > { %2590 = vbcast.lane.b32.xlu1 %v2588_v27, 256  ;;  %2583 = vbcast.lane.b32.xlu0 %v2581_v28, 256  ;;  %v2714_v27 = vrot.slane %v288_v58, %v5749_v33  ;;  %v2707_v28 = vrot.slane %v288_v58, %v5751_v34 }
  0xb0   : > { %v6130_v38 = vpop.permute.xlu1 %2198  ;;  %v6132_v39 = vpop.permute.xlu0 %2191 }
  0xb1   : > { %8288 = vst [vmem:[#allocation2_spill] sm:$0xff] %v6132_v39 }
  0xb2   : > { %2604 = vbcast.lane.b32.xlu1 %v2602_v31, 256  ;;  %2597 = vbcast.lane.b32.xlu0 %v2595_v32, 256  ;;  %v289_v31 = vld [vmem:[%s5708_s8 + $0x60] sm:$0xff] }
  0xb3   : > { %v2756_v58 = vrot.slane %v289_v31, %v5729_v15 }
  0xb4   : > { %v6136_v42 = vpop.permute.xlu1 %2212  ;;  %v6138_v43 = vpop.permute.xlu0 %2205 }
  0xb5   : > { %8289 = vst [vmem:[#allocation3_spill] sm:$0xff] %v6136_v42  ;;  %8290 = vst [vmem:[#allocation4_spill] sm:$0xff] %v6138_v43 }
  0xb6   : > { %2618 = vbcast.lane.b32.xlu1 %v2616_v40, 256  ;;  %2611 = vbcast.lane.b32.xlu0 %v2609_v41, 256  ;;  %v2728_v40 = vrot.slane %v289_v31, %v5712_v8  ;;  %v2721_v41 = vrot.slane %v289_v31, %v5700_v6 }
  0xb8   : > { %v6142_v48 = vpop.permute.xlu1 %2226  ;;  %v6144_v49 = vpop.permute.xlu0 %2219 }
  0xb9   : > { %8291 = vst [vmem:[#allocation5_spill] sm:$0xff] %v6142_v48  ;;  %8292 = vst [vmem:[#allocation6_spill] sm:$0xff] %v6144_v49 }
  0xba   : > { %2632 = vbcast.lane.b32.xlu1 %v2630_v44, 256  ;;  %2625 = vbcast.lane.b32.xlu0 %v2623_v45, 256 }
  0xbc   : > { %v6148_v52 = vpop.permute.xlu1 %2240  ;;  %v6150_v53 = vpop.permute.xlu0 %2233 }
  0xbd   : > { %8293 = vst [vmem:[#allocation7_spill] sm:$0xff] %v6148_v52  ;;  %8294 = vst [vmem:[#allocation8_spill] sm:$0xff] %v6150_v53 }
  0xbe   : > { %2646 = vbcast.lane.b32.xlu1 %v2644_v50, 256  ;;  %2639 = vbcast.lane.b32.xlu0 %v2637_v51, 256  ;;  %v2742_v50 = vrot.slane %v289_v31, %v5710_v7  ;;  %v2735_v51 = vrot.slane %v289_v31, %v5698_v5 }
  0xc0   : > { %v6155_v59 = vpop.permute.xlu1 %2254  ;;  %v6157_v60 = vpop.permute.xlu0 %2247 }
  0xc1   : > { %8295 = vst [vmem:[#allocation9_spill] sm:$0xff] %v6155_v59  ;;  %8296 = vst [vmem:[#allocation10_spill] sm:$0xff] %v6157_v60 }
  0xc2   : > { %2660 = vbcast.lane.b32.xlu1 %v2658_v54, 256  ;;  %2653 = vbcast.lane.b32.xlu0 %v2651_v55, 256 }
  0xc4   : > { %v6161_v1 = vpop.permute.xlu1 %2268  ;;  %v6163_v4 = vpop.permute.xlu0 %2261 }
  0xc5   : > { %8297 = vst [vmem:[#allocation11_spill] sm:$0xff] %v6161_v1  ;;  %8298 = vst [vmem:[#allocation12_spill] sm:$0xff] %v6163_v4 }
  0xc6   : > { %2674 = vbcast.lane.b32.xlu1 %v2672_v61, 256  ;;  %2667 = vbcast.lane.b32.xlu0 %v2665_v0, 256  ;;  %v2749_v61 = vrot.slane %v289_v31, %v5731_v19 }
  0xc8   : > { %v6167_v13 = vpop.permute.xlu1 %2282  ;;  %v6169_v14 = vpop.permute.xlu0 %2275 }
  0xc9   : > { %8299 = vst [vmem:[#allocation13_spill] sm:$0xff] %v6167_v13  ;;  %8300 = vst [vmem:[#allocation14_spill] sm:$0xff] %v6169_v14 }
  0xca   : > { %2688 = vbcast.lane.b32.xlu1 %v2686_v9, 256  ;;  %2681 = vbcast.lane.b32.xlu0 %v2679_v12, 256  ;;  %v2770_v12 = vrot.slane %v289_v31, %v5749_v33 }
  0xcc   : > { %v6173_v23 = vpop.permute.xlu1 %2296  ;;  %v6175_v24 = vpop.permute.xlu0 %2289 }
  0xcd   : > { %8301 = vst [vmem:[#allocation15_spill] sm:$0xff] %v6173_v23  ;;  %8302 = vst [vmem:[#allocation16_spill] sm:$0xff] %v6175_v24 }
  0xce   : > { %2702 = vbcast.lane.b32.xlu1 %v2700_v18, 256  ;;  %2695 = vbcast.lane.b32.xlu0 %v2693_v20, 256  ;;  %v2763_v18 = vrot.slane %v289_v31, %v5751_v34  ;;  %v6205_v20 = vld [vmem:[%s5708_s8 + $0x68] sm:$0xff] }
  0xcf   : > { %v2798_v31 = vrot.slane %v6205_v20, %v5710_v7 }
  0xd0   : > { %v6180_v32 = vpop.permute.xlu1 %2310  ;;  %v6182_v35 = vpop.permute.xlu0 %2303 }
  0xd1   : > { %8303 = vst [vmem:[#allocation17_spill] sm:$0xff] %v6180_v32  ;;  %8304 = vst [vmem:[#allocation18_spill] sm:$0xff] %v6182_v35 }
  0xd2   : > { %2716 = vbcast.lane.b32.xlu1 %v2714_v27, 256  ;;  %2709 = vbcast.lane.b32.xlu0 %v2707_v28, 256 }
  0xd4   : > { %v6186_v44 = vpop.permute.xlu1 %2324  ;;  %v6188_v45 = vpop.permute.xlu0 %2317 }
  0xd5   : > { %8305 = vst [vmem:[#allocation19_spill] sm:$0xff] %v6186_v44  ;;  %8306 = vst [vmem:[#allocation20_spill] sm:$0xff] %v6188_v45 }
  0xd6   : > { %2730 = vbcast.lane.b32.xlu1 %v2728_v40, 256  ;;  %2723 = vbcast.lane.b32.xlu0 %v2721_v41, 256  ;;  %v2784_v40 = vrot.slane %v6205_v20, %v5712_v8  ;;  %v2777_v41 = vrot.slane %v6205_v20, %v5700_v6 }
  0xd8   : > { %v6192_v54 = vpop.permute.xlu1 %2338  ;;  %v6194_v55 = vpop.permute.xlu0 %2331 }
  0xd9   : > { %8307 = vst [vmem:[#allocation21_spill] sm:$0xff] %v6192_v54  ;;  %8308 = vst [vmem:[#allocation22_spill] sm:$0xff] %v6194_v55  ;;  %v2819_v55 = vrot.slane %v6205_v20, %v5751_v34 }
  0xda   : > { %2744 = vbcast.lane.b32.xlu1 %v2742_v50, 256  ;;  %2737 = vbcast.lane.b32.xlu0 %v2735_v51, 256 }
  0xdc   : > { %v6198_v0 = vpop.permute.xlu1 %2352  ;;  %v6200_v9 = vpop.permute.xlu0 %2345 }
  0xdd   : > { %8309 = vst [vmem:[#allocation23_spill] sm:$0xff] %v6198_v0  ;;  %8310 = vst [vmem:[#allocation24_spill] sm:$0xff] %v6200_v9  ;;  %v6253_v9 = vld [vmem:[%s8213_s5] ss:$0 sm:$0xff] }
  0xde   : > { %2758 = vbcast.lane.b32.xlu1 %v2756_v58, 256  ;;  %2751 = vbcast.lane.b32.xlu0 %v2749_v61, 256  ;;  %v2791_v58 = vrot.slane %v6205_v20, %v5698_v5 }
  0xe0   : > { %v6207_v27 = vpop.permute.xlu1 %2366  ;;  %v6209_v28 = vpop.permute.xlu0 %2359 }
  0xe1   : > { %8311 = vst [vmem:[#allocation25_spill] sm:$0xff] %v6207_v27  ;;  %8312 = vst [vmem:[#allocation26_spill] sm:$0xff] %v6209_v28 }
  0xe2   : > { %2772 = vbcast.lane.b32.xlu1 %v2770_v12, 256  ;;  %2765 = vbcast.lane.b32.xlu0 %v2763_v18, 256  ;;  %v6228_v12 = vld [vmem:[%s8211_s3] ss:$0 sm:$0xff]  ;;  %v6231_v18 = vld [vmem:[%s5708_s8 + $0x70] sm:$0xff] }
  0xe3   : > { %v8325_v52 = vrot.slane %v6231_v18, %v5710_v7  ;;  %v8353_v10 = vrot.slane %v6231_v18, %v5749_v33 }
  0xe4   : > { %v6215_v50 = vpop.permute.xlu1 %2380  ;;  %v6217_v51 = vpop.permute.xlu0 %2373 }
  0xe5   : > { %8313 = vst [vmem:[#allocation27_spill] sm:$0xff] %v6215_v50  ;;  %8314 = vst [vmem:[#allocation28_spill] sm:$0xff] %v6217_v51  ;;  %v6238_v51 = vld [vmem:[%s5708_s8 + $0x78] sm:$0xff] }
  0xe6   : > { %2786 = vbcast.lane.b32.xlu1 %v2784_v40, 256  ;;  %2779 = vbcast.lane.b32.xlu0 %v2777_v41, 256  ;;  %v2812_v40 = vrot.slane %v6205_v20, %v5729_v15  ;;  %v2805_v41 = vrot.slane %v6205_v20, %v5731_v19  ;;  %v2889_v54 = vrot.slane %v6238_v51, %v5700_v6 }
  0xe7   : > { %v8346_v3 = vrot.slane %v6238_v51, %v5751_v34 }
  0xe8   : > { %v6223_v61 = vpop.permute.xlu1 %2394  ;;  %v6245_v28 = vpop.permute.xlu0 %2387 }
  0xe9   : > { %8315 = vst [vmem:[#allocation29_spill] sm:$0xff] %v6223_v61  ;;  %v6243_v61 = vld [vmem:[%s8212_s4] ss:$0 sm:$0xff]  ;;  %8316 = vst [vmem:[#allocation30_spill] sm:$0xff] %v6245_v28 }
  0xea   : > { %2800 = vbcast.lane.b32.xlu1 %v2798_v31, 256  ;;  %2793 = vbcast.lane.b32.xlu0 %v2791_v58, 256  ;;  %v2833_v58 = vrot.slane %v6231_v18, %v5700_v6 }
  0xeb   : > { %v5410_v50 = vpop.f32.mrb[0].mxu0 }
  0xec   : > { %v1015_v27 = vadd.f32 %v5410_v50, %v6228_v12  ;;  %v1009_v31 = vpop.f32.mrb[1].mxu0  ;;  %v2840_v50 = vrot.slane %v6231_v18, %v5712_v8  ;;  %v6262_v28 = vpop.f32.mrb[0].mxu1 }
  0xed   : > { %v1010_v0 = vadd.f32 %v6228_v12, %v1009_v31  ;;  %v6265_v44 = vpop.permute.xlu1 %2408  ;;  %v6271_v32 = vpop.f32.mrb[1].mxu1  ;;  %v1335_v36 = vadd.f32 %v6262_v28, %v6228_v12 }
  0xee   : > { %v1656_v45 = vmul.f32 %v6243_v61, %v1015_v27  ;;  %8317 = vst [vmem:[#allocation31_spill] sm:$0xff] %v6265_v44  ;;  %2814 = vbcast.lane.b32.xlu1 %v2812_v40, 256  ;;  %2807 = vbcast.lane.b32.xlu0 %v2805_v41, 256  ;;  %v6292_v14 = vpop.permute.xlu0 %2401 }
  0xef   : > { %v1655_v6 = vmul.f32 %v6243_v61, %v1010_v0  ;;  %v5413_v24 = vpop.f32.mrb[2].mxu0  ;;  %8318 = vst [vmem:[#allocation32_spill] sm:$0xff] %v6292_v14  ;;  %v1720_v57 = vmul.f32 %v6243_v61, %v1335_v36 }
  0xf0   : > { %v1791_v41 = vadd.f32 %v6253_v9, %v1656_v45  ;;  %v1025_v31 = vadd.f32 %v5413_v24, %v6228_v12  ;;  %v1019_v35 = vpop.f32.mrb[3].mxu0  ;;  %v6290_v23 = vpop.f32.mrb[2].mxu1 }
  0xf1   : > { %v1790_v27 = vadd.f32 %v6253_v9, %v1655_v6  ;;  %v1020_v40 = vadd.f32 %v6228_v12, %v1019_v35  ;;  %v6295_v44 = vpop.f32.mrb[3].mxu1  ;;  %v6311_v13 = vpop.permute.xlu1 %2422 }
  0xf2   : > { %v1919_v45 = vmax.f32 %v1791_v41, 0.0  ;;  %v1658_v24 = vmul.f32 %v6243_v61, %v1025_v31  ;;  %2835 = vbcast.lane.b32.xlu1 %v2833_v58, 256  ;;  %2821 = vbcast.lane.b32.xlu0 %v2819_v55, 256  ;;  %8319 = vst [vmem:[#allocation33_spill] sm:$0xff] %v6311_v13 }
  0xf3   : > { %v1918_v35 = vmax.f32 %v1790_v27, 0.0  ;;  %v1657_v6 = vmul.f32 %v6243_v61, %v1020_v40  ;;  %v5416_v41 = vpop.f32.mrb[4].mxu0 }
  0xf4   : > { %v3327_v58 = vsel %vm2943_vm5, -3e+38, %v1919_v45  ;;  %v1793_v31 = vadd.f32 %v6253_v9, %v1658_v24  ;;  %v1035_v27 = vadd.f32 %v5416_v41, %v6228_v12  ;;  %v1029_v0 = vpop.f32.mrb[5].mxu0  ;;  %v6321_v45 = vpop.f32.mrb[4].mxu1  ;;  %vm2959_vm5 = vcmp.gt.f32.partialorder %v6117_v25, 0.5 }
  0xf5   : > { %v3462_v14 = vsel %vm3454_vm1, %v3327_v58, -inf  ;;  %v3326_v55 = vsel %vm2942_vm2, -3e+38, %v1918_v35  ;;  %v1792_v4 = vadd.f32 %v6253_v9, %v1657_v6  ;;  %v1030_v47 = vadd.f32 %v6228_v12, %v1029_v0  ;;  %v6325_v40 = vpop.f32.mrb[5].mxu1 }
  0xf6   : > { %v3463_v24 = vrot.slane %v3462_v14, 4  ;;  %v3455_v13 = vsel %vm3454_vm1, %v3326_v55, -inf  ;;  %v1921_v1 = vmax.f32 %v1793_v31, 0.0  ;;  %v1660_v41 = vmul.f32 %v6243_v61, %v1035_v27  ;;  %2891 = vbcast.lane.b32.xlu1 %v2889_v54, 256  ;;  %2842 = vbcast.lane.b32.xlu0 %v2840_v50, 256  ;;  %v6332_v55 = vpop.permute.xlu0 %2415 }
  0xf7   : > { %v3456_v58 = vrot.slane %v3455_v13, 4  ;;  %v1920_v60 = vmax.f32 %v1792_v4, 0.0  ;;  %v1659_v37 = vmul.f32 %v6243_v61, %v1030_v47  ;;  %v5419_v35 = vpop.f32.mrb[6].mxu0  ;;  %8320 = vst [vmem:[#allocation34_spill] sm:$0xff] %v6332_v55  ;;  %v6344_v55 = vpop.permute.xlu1 %2436  ;;  %vm2956_vm2 = vcmp.gt.f32.partialorder %v6113_v22, 0.5 }
  0xf8   : > { %v3464_v6 = vmax.f32 %v3462_v14, %v3463_v24  ;;  %v3329_v59 = vsel %vm2945_vm4, -3e+38, %v1921_v1  ;;  %v1795_v31 = vadd.f32 %v6253_v9, %v1660_v41  ;;  %v1039_v54 = vpop.f32.mrb[7].mxu0  ;;  %v6341_v14 = vpop.f32.mrb[6].mxu1  ;;  %8321 = vst [vmem:[#allocation35_spill] sm:$0xff] %v6344_v55  ;;  %v8322_v41 = vrot.slane %v6231_v18, %v5698_v5 }
  0xf9   : > { %v3457_v27 = vmax.f32 %v3455_v13, %v3456_v58  ;;  %v3476_v4 = vsel %vm3454_vm1, %v3329_v59, -inf  ;;  %v3328_v47 = vsel %vm2944_vm3, -3e+38, %v1920_v60  ;;  %v1794_v0 = vadd.f32 %v6253_v9, %v1659_v37 }
  0xfa   : > { %v3477_v46 = vrot.slane %v3476_v4, 4  ;;  %v3469_v1 = vsel %vm3454_vm1, %v3328_v47, -inf  ;;  %v1923_v24 = vmax.f32 %v1795_v31, 0.0  ;;  %2849 = vbcast.lane.b32.xlu1 %v8322_v41, 256  ;;  %v8323_v59 = vrot.slane %v6238_v51, %v5712_v8  ;;  %v6355_v31 = vpop.f32.mrb[7].mxu1 }
  0xfb   : > { %v3465_v60 = vrot.slane %v3464_v6, 2  ;;  %v3470_v13 = vrot.slane %v3469_v1, 4  ;;  %v1922_v58 = vmax.f32 %v1794_v0, 0.0  ;;  %v1045_v37 = vadd.f32 %v5419_v35, %v6228_v12  ;;  %v5422_v47 = vpop.f32.mrb[8].mxu0 }
  0xfc   : > { %2898 = vbcast.lane.b32.xlu0 %v8323_v59, 256  ;;  %v3458_v50 = vrot.slane %v3457_v27, 2  ;;  %v3478_v55 = vmax.f32 %v3476_v4, %v3477_v46  ;;  %v3331_v41 = vsel %vm2947_vm6, -3e+38, %v1923_v24  ;;  %v1040_v53 = vadd.f32 %v6228_v12, %v1039_v54  ;;  %v1049_v8 = vpop.f32.mrb[9].mxu0  ;;  %v6367_v4 = vpop.f32.mrb[8].mxu1 }
  0xfd   : > { %v3471_v28 = vmax.f32 %v3469_v1, %v3470_v13  ;;  %v3490_v0 = vsel %vm3454_vm1, %v3331_v41, -inf  ;;  %v3330_v35 = vsel %vm2946_vm7, -3e+38, %v1922_v58  ;;  %v1330_v59 = vadd.f32 %v6228_v12, %v6271_v32  ;;  %v6370_v24 = vpop.permute.xlu0 %2429  ;;  %v6380_v48 = vpop.f32.mrb[9].mxu1 }
  0xfe   : > { %v3479_v56 = vrot.slane %v3478_v55, 2  ;;  %v3491_v46 = vrot.slane %v3490_v0, 4  ;;  %v3483_v54 = vsel %vm3454_vm1, %v3330_v35, -inf  ;;  %8324 = vst [vmem:[#allocation36_spill] sm:$0xff] %v6370_v24  ;;  %2856 = vbcast.lane.b32.xlu1 %v8325_v52, 256  ;;  %v8326_v1 = vrot.slane %v6238_v51, %v5698_v5  ;;  %8327 = vst [vmem:[#allocation37_spill] sm:$0xff] %v6380_v48  ;;  %v6383_v52 = vpop.permute.xlu1 %2450 }
  0xff   : > { %v3466_v13 = vmax.f32 %v3464_v6, %v3465_v60  ;;  %v3472_v32 = vrot.slane %v3471_v28, 2  ;;  %v3484_v58 = vrot.slane %v3483_v54, 4  ;;  %v1662_v41 = vmul.f32 %v6243_v61, %v1045_v37  ;;  %v5425_v49 = vpop.f32.mrb[10].mxu0  ;;  %8328 = vst [vmem:[#allocation38_spill] sm:$0xff] %v6383_v52 }
 0x100   : > { %2905 = vbcast.lane.b32.xlu0 %v8326_v1, 256  ;;  %v3459_v35 = vmax.f32 %v3457_v27, %v3458_v50  ;;  %v3480_v24 = vmax.f32 %v3478_v55, %v3479_v56  ;;  %v3492_v43 = vmax.f32 %v3490_v0, %v3491_v46  ;;  %v1661_v42 = vmul.f32 %v6243_v61, %v1040_v53  ;;  %v1059_v39 = vpop.f32.mrb[11].mxu0  ;;  %v6388_v60 = vpop.f32.mrb[10].mxu1 }
 0x101   : > { %v3473_v5 = vmax.f32 %v3471_v28, %v3472_v32  ;;  %v3485_v1 = vmax.f32 %v3483_v54, %v3484_v58  ;;  %v1797_v36 = vadd.f32 %v6253_v9, %v1662_v41  ;;  %v1345_v6 = vadd.f32 %v6290_v23, %v6228_v12  ;;  %v6402_v23 = vpop.f32.mrb[11].mxu1  ;;  %v6410_v32 = vpop.permute.xlu0 %2443 }
 0x102   : > { %v3493_v37 = vrot.slane %v3492_v43, 2  ;;  %v1796_v48 = vadd.f32 %v6253_v9, %v1661_v42  ;;  %v6392_v55 = vmul.f32 %v6243_v61, %v1330_v59  ;;  %v8329_v53 = vrot.slane %v6231_v18, %v5731_v19  ;;  %8331 = vst [vmem:[#allocation39_spill] sm:$0xff] %v6402_v23  ;;  %8332 = vst [vmem:[#allocation40_spill] sm:$0xff] %v6410_v32  ;;  %v6429_v23 = vpop.permute.xlu1 %2464 }
 0x103   : > { %v8330_v50 = vrot.slane %v6238_v51, %v5710_v7  ;;  %v3467_v28 = vrot.slane %v3466_v13, 1  ;;  %v3486_v42 = vrot.slane %v3485_v1, 2  ;;  %v1925_v0 = vmax.f32 %v1797_v36, 0.0  ;;  %v5428_v59 = vpop.f32.mrb[12].mxu0  ;;  %8334 = vst [vmem:[#allocation42_spill] sm:$0xff] %v6429_v23 }
 0x104   : > { %2863 = vbcast.lane.b32.xlu1 %v8329_v53, 256  ;;  %v6407_v56 = vadd.f32 %v6228_v12, %v6295_v44  ;;  %v3460_v46 = vrot.slane %v3459_v35, 1  ;;  %v3481_v7 = vrot.slane %v3480_v24, 1  ;;  %v1924_v54 = vmax.f32 %v1796_v48, 0.0  ;;  %v1069_v41 = vpop.f32.mrb[13].mxu0  ;;  %v6420_v44 = vpop.f32.mrb[12].mxu1 }
 0x105   : > { %2912 = vbcast.lane.b32.xlu0 %v8330_v50, 256  ;;  %v1055_v58 = vadd.f32 %v5422_v47, %v6228_v12  ;;  %v3474_v53 = vrot.slane %v3473_v5, 1  ;;  %v1050_v50 = vadd.f32 %v6228_v12, %v1049_v8  ;;  %v6415_v36 = vmul.f32 %v6243_v61, %v1345_v6 }
 0x106   : > { %v6418_v27 = vadd.f32 %v6253_v9, %v1720_v57  ;;  %v6422_v52 = vmax.f32 %v3492_v43, %v3493_v37  ;;  %v3333_v48 = vsel %vm2949_vm8, -3e+38, %v1925_v0  ;;  %v3332_v47 = vsel %vm2948_vm9, -3e+38, %v1924_v54  ;;  %v6443_v0 = vpop.f32.mrb[13].mxu1 }
 0x107   : > { %v1664_v32 = vmul.f32 %v6243_v61, %v1055_v58  ;;  %v8335_v8 = vrot.slane %v6231_v18, %v5729_v15  ;;  %v8336_v57 = vrot.slane %v6238_v51, %v5731_v19  ;;  %v6437_v43 = vmax.f32 %v3466_v13, %v3467_v28  ;;  %v6441_v37 = vpop.f32.mrb[14].mxu0 }
 0x108   : > { %8333 = vst [vmem:[#allocation41_spill] sm:$0xff] %v6422_v52  ;;  %v3487_v6 = vmax.f32 %v3485_v1, %v3486_v42  ;;  %v3497_v62 = vsel %vm3454_vm1, %v3332_v47, -inf  ;;  %v1663_v63 = vmul.f32 %v6243_v61, %v1050_v50  ;;  %v6446_v54 = vmax.f32 %v3459_v35, %v3460_v46  ;;  %v6451_v13 = vpop.f32.mrb[15].mxu0  ;;  %v6459_v47 = vpop.f32.mrb[14].mxu1 }
 0x109   : > { %2870 = vbcast.lane.b32.xlu1 %v8335_v8, 256  ;;  %2919 = vbcast.lane.b32.xlu0 %v8336_v57, 256  ;;  %8337 = vst [vmem:[#allocation43_spill] sm:$0xff] %v6437_v43  ;;  %v6448_v58 = vmax.f32 %v3480_v24, %v3481_v7  ;;  %v3498_v8 = vrot.slane %v3497_v62, 4  ;;  %v1799_v19 = vadd.f32 %v6253_v9, %v1664_v32  ;;  %v3504_v28 = vsel %vm3454_vm1, %v3333_v48, -inf  ;;  %v6463_v7 = vpop.permute.xlu0 %2457  ;;  %v6481_v24 = vpop.permute.xlu1 %2478 }
 0x10a   : > { %8338 = vst [vmem:[#allocation44_spill] sm:$0xff] %v6446_v54  ;;  %v6454_v1 = vmax.f32 %v3473_v5, %v3474_v53  ;;  %v1798_v42 = vadd.f32 %v6253_v9, %v1663_v63  ;;  %v1065_v50 = vadd.f32 %v5425_v49, %v6228_v12  ;;  %8341 = vst [vmem:[#allocation47_spill] sm:$0xff] %v6463_v7  ;;  %v6472_v49 = vpop.f32.mrb[15].mxu1  ;;  %v3488_v48 = vrot.slane %v3487_v6, 1 }
 0x10b   : > { %8339 = vst [vmem:[#allocation45_spill] sm:$0xff] %v6448_v58  ;;  %v3499_v35 = vmax.f32 %v3497_v62, %v3498_v8  ;;  %v1927_v46 = vmax.f32 %v1799_v19, 0.0  ;;  %v1060_v32 = vadd.f32 %v6228_v12, %v1059_v39  ;;  %v8342_v5 = vrot.slane %v6231_v18, %v5751_v34  ;;  %v6476_v8 = vpop.f32.mrb[16].mxu0  ;;  %8344 = vst [vmem:[#allocation48_spill] sm:$0xff] %v6481_v24 }
 0x10c   : > { %8340 = vst [vmem:[#allocation46_spill] sm:$0xff] %v6454_v1  ;;  %v8343_v53 = vrot.slane %v6238_v51, %v5729_v15  ;;  %v1926_v57 = vmax.f32 %v1798_v42, 0.0  ;;  %v1666_v63 = vmul.f32 %v6243_v61, %v1065_v50  ;;  %v1075_v62 = vadd.f32 %v5428_v59, %v6228_v12 }
 0x10d   : > { %2877 = vbcast.lane.b32.xlu1 %v8342_v5, 256  ;;  %v3505_v19 = vrot.slane %v3504_v28, 4  ;;  %v3335_v39 = vsel %vm2951_vm10, -3e+38, %v1927_v46  ;;  %v1665_v5 = vmul.f32 %v6243_v61, %v1060_v32  ;;  %v1070_v15 = vadd.f32 %v6228_v12, %v1069_v41  ;;  %v6492_v46 = vpop.f32.mrb[16].mxu1  ;;  %v6512_v24 = vpop.permute.xlu0 %2471 }
 0x10e   : > { %2926 = vbcast.lane.b32.xlu0 %v8343_v53, 256  ;;  %v6484_v53 = vpop.f32.mrb[17].mxu0  ;;  %v3518_v42 = vsel %vm3454_vm1, %v3335_v39, -inf  ;;  %v3334_v59 = vsel %vm2950_vm11, -3e+38, %v1926_v57  ;;  %v1801_v50 = vadd.f32 %v6253_v9, %v1666_v63  ;;  %v1668_v2 = vmul.f32 %v6243_v61, %v1075_v62  ;;  %v6502_v57 = vpop.f32.mrb[17].mxu1 }
 0x10f   : > { %v3500_v32 = vrot.slane %v3499_v35, 2  ;;  %v3519_v58 = vrot.slane %v3518_v42, 4  ;;  %v3511_v1 = vsel %vm3454_vm1, %v3334_v59, -inf  ;;  %v1800_v41 = vadd.f32 %v6253_v9, %v1665_v5  ;;  %v6506_v52 = vpop.f32.mrb[18].mxu0  ;;  %8349 = vst [vmem:[#allocation51_spill] sm:$0xff] %v6512_v24 }
 0x110   : > { %v8345_v43 = vrot.slane %v6205_v20, %v5749_v33  ;;  %v3512_v63 = vrot.slane %v3511_v1, 4  ;;  %v1929_v62 = vmax.f32 %v1801_v50, 0.0  ;;  %v1803_v39 = vadd.f32 %v6253_v9, %v1668_v2  ;;  %v6514_v34 = vpop.f32.mrb[19].mxu0 }
 0x111   : > { %v1667_v54 = vmul.f32 %v6243_v61, %v1070_v15  ;;  %v6508_v59 = vmax.f32 %v3487_v6, %v3488_v48  ;;  %v6510_v5 = vmax.f32 %v3504_v28, %v3505_v19  ;;  %v3520_v20 = vmax.f32 %v3518_v42, %v3519_v58  ;;  %v6519_v15 = vpop.f32.mrb[18].mxu1  ;;  %v6526_v48 = vpop.permute.xlu1 %2492 }
 0x112   : > { %2828 = vbcast.lane.b32.xlu1 %v8345_v43, 256  ;;  %2933 = vbcast.lane.b32.xlu0 %v8346_v3, 256  ;;  %v1928_v43 = vmax.f32 %v1800_v41, 0.0  ;;  %v3513_v3 = vmax.f32 %v3511_v1, %v3512_v63  ;;  %v3337_v50 = vsel %vm2953_vm12, -3e+38, %v1929_v62  ;;  %v1931_v7 = vmax.f32 %v1803_v39, 0.0 }
 0x113   : > { %8347 = vst [vmem:[#allocation49_spill] sm:$0xff] %v6508_v59  ;;  %8348 = vst [vmem:[#allocation50_spill] sm:$0xff] %v6510_v5  ;;  %v1802_v2 = vadd.f32 %v6253_v9, %v1667_v54  ;;  %v6521_v23 = vmax.f32 %v3499_v35, %v3500_v32  ;;  %v3521_v6 = vrot.slane %v3520_v20, 2  ;;  %v3532_v28 = vsel %vm3454_vm1, %v3337_v50, -inf  ;;  %v6537_v32 = vpop.f32.mrb[20].mxu0  ;;  %v6545_v50 = vpop.f32.mrb[19].mxu1 }
 0x114   : > { %v3336_v58 = vsel %vm2952_vm13, -3e+38, %v1928_v43  ;;  %8351 = vst [vmem:[#allocation53_spill] sm:$0xff] %v6526_v48  ;;  %v8352_v1 = vrot.slane %v6238_v51, %v5749_v33  ;;  %v3514_v54 = vrot.slane %v3513_v3, 2  ;;  %v3533_v19 = vrot.slane %v3532_v28, 4  ;;  %v6540_v51 = vpop.f32.mrb[21].mxu0 }
 0x115   : > { %8350 = vst [vmem:[#allocation52_spill] sm:$0xff] %v6521_v23  ;;  %v3525_v35 = vsel %vm3454_vm1, %v3336_v58, -inf  ;;  %v3339_v42 = vsel %vm2955_vm14, -3e+38, %v1931_v7  ;;  %v3522_v11 = vmax.f32 %v3520_v20, %v3521_v6  ;;  %v1930_v62 = vmax.f32 %v1802_v2, 0.0  ;;  %v6550_v2 = vpop.permute.xlu0 %2485 }
 0x116   : > { %2940 = vbcast.lane.b32.xlu1 %v8352_v1, 256  ;;  %2884 = vbcast.lane.b32.xlu0 %v8353_v10, 256  ;;  %v3526_v41 = vrot.slane %v3525_v35, 4  ;;  %v3546_v63 = vsel %vm3454_vm1, %v3339_v42, -inf  ;;  %v3515_v33 = vmax.f32 %v3513_v3, %v3514_v54  ;;  %v3534_v18 = vmax.f32 %v3532_v28, %v3533_v19  ;;  %8354 = vst [vmem:[#allocation54_spill] sm:$0xff] %v6550_v2  ;;  %v6554_v3 = vpop.f32.mrb[20].mxu1 }
 0x117   : > { %v3547_v39 = vrot.slane %v3546_v63, 4  ;;  %v1085_v43 = vadd.f32 %v6441_v37, %v6228_v12  ;;  %v3523_v16 = vrot.slane %v3522_v11, 1  ;;  %v3338_v20 = vsel %vm2954_vm15, -3e+38, %v1930_v62  ;;  %v6561_v10 = vpop.f32.mrb[22].mxu0  ;;  %v6563_v54 = vpop.f32.mrb[21].mxu1 }
 0x118   : > { %v3527_v7 = vmax.f32 %v3525_v35, %v3526_v41  ;;  %v1080_v6 = vadd.f32 %v6228_v12, %v6451_v13  ;;  %v3535_v28 = vrot.slane %v3534_v18, 2  ;;  %v3539_v37 = vsel %vm3454_vm1, %v3338_v20, -inf  ;;  %v2507_v13 = vpop.permute.xlu1 %2506  ;;  %v6566_v41 = vpop.f32.mrb[23].mxu0 }
 0x119   : > { %v3548_v58 = vmax.f32 %v3546_v63, %v3547_v39  ;;  %v6559_v1 = vmul.f32 %v6243_v61, %v6407_v56  ;;  %v3516_v17 = vrot.slane %v3515_v33, 1  ;;  %v3540_v35 = vrot.slane %v3539_v37, 4  ;;  %v6571_v56 = vpop.f32.mrb[22].mxu1 }
 0x11a   : > { %v3528_v19 = vrot.slane %v3527_v7, 2  ;;  %v1670_v42 = vmul.f32 %v6243_v61, %v1085_v43  ;;  %v6568_v62 = vmax.f32 %v3522_v11, %v3523_v16  ;;  %v3536_v63 = vmax.f32 %v3534_v18, %v3535_v28  ;;  %v6575_v48 = vpop.f32.mrb[23].mxu1 }
 0x11b   : > { %v3549_v39 = vrot.slane %v3548_v58, 2  ;;  %v1669_v20 = vmul.f32 %v6243_v61, %v1080_v6  ;;  %v3541_v5 = vmax.f32 %v3539_v37, %v3540_v35  ;;  %v1983_v2 = vmax.f32 %v6418_v27, 0.0  ;;  %v6580_v18 = vpop.f32.mrb[24].mxu0  ;;  %v2500_v37 = vpop.permute.xlu0 %2499 }
 0x11c   : > { %8355 = vst [vmem:[#allocation55_spill] sm:$0xff] %v6568_v62  ;;  %v3529_v59 = vmax.f32 %v3527_v7, %v3528_v19  ;;  %v1805_v23 = vadd.f32 %v6253_v9, %v1670_v42  ;;  %v3537_v43 = vrot.slane %v3536_v63, 1  ;;  %vm3007_vm3 = vcmp.gt.f32.partialorder %v2507_v13, 0.5  ;;  %v6584_v19 = vpop.f32.mrb[25].mxu0 }
 0x11d   : > { %v6577_v24 = vmax.f32 %v3548_v58, %v3549_v39  ;;  %v1804_v11 = vadd.f32 %v6253_v9, %v1669_v20  ;;  %v6582_v16 = vmax.f32 %v3515_v33, %v3516_v17  ;;  %v3542_v6 = vrot.slane %v3541_v5, 2  ;;  %v6589_v39 = vpop.f32.mrb[24].mxu1 }
 0x11e   : > { %v1933_v28 = vmax.f32 %v1805_v23, 0.0  ;;  %v3391_v7 = vsel %vm3007_vm3, -3e+38, %v1983_v2  ;;  %v6586_v35 = vmax.f32 %v3536_v63, %v3537_v43  ;;  %v3530_v27 = vrot.slane %v3529_v59, 1  ;;  %8359 = vst [vmem:[#allocation59_spill] sm:$0xff] %v6589_v39  ;;  %v6594_v23 = vpop.f32.mrb[25].mxu1 }
 0x11f   : > { %8356 = vst [vmem:[#allocation56_spill] sm:$0xff] %v6577_v24  ;;  %8357 = vst [vmem:[#allocation57_spill] sm:$0xff] %v6582_v16  ;;  %v1932_v42 = vmax.f32 %v1804_v11, 0.0  ;;  %v3910_v58 = vsel %vm3454_vm1, %v3391_v7, -inf  ;;  %v3543_v20 = vmax.f32 %v3541_v5, %v3542_v6  ;;  %v1854_v43 = vadd.f32 %v6253_v9, %v6392_v55  ;;  %v6601_v11 = vpop.f32.mrb[26].mxu0 }
 0x120   : > { %8358 = vst [vmem:[#allocation58_spill] sm:$0xff] %v6586_v35  ;;  %v3341_v33 = vsel %vm2957_vm0, -3e+38, %v1933_v28  ;;  %v3911_v17 = vrot.slane %v3910_v58, 4  ;;  %8360 = vst [vmem:[#allocation60_spill] sm:$0xff] %v6594_v23  ;;  %vm3006_vm4 = vcmp.gt.f32.partialorder %v2500_v37, 0.5  ;;  %v6607_v28 = vmax.f32 %v3529_v59, %v3530_v27 }
 0x121   : > { %v3560_v2 = vsel %vm3454_vm1, %v3341_v33, -inf  ;;  %v3340_v63 = vsel %vm2956_vm2, -3e+38, %v1932_v42  ;;  %v3544_v7 = vrot.slane %v3543_v20, 1  ;;  %v6604_v6 = vpop.f32.mrb[27].mxu0  ;;  %v1982_v22 = vmax.f32 %v1854_v43, 0.0 }
 0x122   : > { %v3561_v13 = vrot.slane %v3560_v2, 4  ;;  %v3553_v5 = vsel %vm3454_vm1, %v3340_v63, -inf  ;;  %v3912_v21 = vmax.f32 %v3910_v58, %v3911_v17  ;;  %8361 = vst [vmem:[#allocation61_spill] sm:$0xff] %v6607_v28  ;;  %v1355_v42 = vadd.f32 %v6321_v45, %v6228_v12  ;;  %v2521_v17 = vpop.permute.xlu1 %2520  ;;  %v2514_v28 = vpop.permute.xlu0 %2513 }
 0x123   : > { %v3554_v33 = vrot.slane %v3553_v5, 4  ;;  %v6611_v55 = vmax.f32 %v3543_v20, %v3544_v7  ;;  %v1350_v62 = vadd.f32 %v6228_v12, %v6325_v40  ;;  %v1095_v58 = vadd.f32 %v6476_v8, %v6228_v12  ;;  %v6622_v45 = vpop.f32.mrb[28].mxu0  ;;  %v6624_v20 = vpop.f32.mrb[26].mxu1 }
 0x124   : > { %v3913_v35 = vrot.slane %v3912_v21, 2  ;;  %vm2958_vm6 = vcmp.gt.f32.partialorder %v6119_v26, 0.5  ;;  %v6618_v63 = vmax.f32 %v3560_v2, %v3561_v13  ;;  %v3390_v27 = vsel %vm3006_vm4, -3e+38, %v1982_v22  ;;  %8364 = vst [vmem:[#allocation64_spill] sm:$0xff] %v6624_v20  ;;  %v6630_v13 = vpop.f32.mrb[29].mxu0 }
 0x125   : > { %8362 = vst [vmem:[#allocation62_spill] sm:$0xff] %v6611_v55  ;;  %v3555_v59 = vmax.f32 %v3553_v5, %v3554_v33  ;;  %v1724_v43 = vmul.f32 %v6243_v61, %v1355_v42  ;;  %v3903_v40 = vsel %vm3454_vm1, %v3390_v27, -inf  ;;  %v1672_v55 = vmul.f32 %v6243_v61, %v1095_v58 }
 0x126   : > { %8363 = vst [vmem:[#allocation63_spill] sm:$0xff] %v6618_v63  ;;  %v3914_v7 = vmax.f32 %v3912_v21, %v3913_v35  ;;  %v1090_v8 = vadd.f32 %v6228_v12, %v6484_v53  ;;  %v3904_v37 = vrot.slane %v3903_v40, 4  ;;  %v1857_v5 = vadd.f32 %v6253_v9, %v6415_v36 }
 0x127   : > { %v3556_v2 = vrot.slane %v3555_v59, 2  ;;  %vm3009_vm7 = vcmp.gt.f32.partialorder %v2521_v17, 0.5  ;;  %v1807_v22 = vadd.f32 %v6253_v9, %v1672_v55  ;;  %v1856_v21 = vadd.f32 %v6253_v9, %v6559_v1  ;;  %v6641_v27 = vpop.f32.mrb[30].mxu0 }
 0x128   : > { %v3915_v33 = vrot.slane %v3914_v7, 1  ;;  %v1671_v35 = vmul.f32 %v6243_v61, %v1090_v8  ;;  %v3905_v42 = vmax.f32 %v3903_v40, %v3904_v37  ;;  %v6639_v53 = vmul.f32 %v6243_v61, %v1350_v62  ;;  %v6646_v63 = vpop.f32.mrb[31].mxu0  ;;  %v6651_v40 = vpop.f32.mrb[27].mxu1 }
 0x129   : > { %v1985_v58 = vmax.f32 %v1857_v5, 0.0  ;;  %vm3008_vm8 = vcmp.gt.f32.partialorder %v2514_v28, 0.5  ;;  %v6643_v16 = vmax.f32 %v3555_v59, %v3556_v2  ;;  %vm4576_vm9 = vcmask 1041409   ;;  %8366 = vst [vmem:[#allocation66_spill] sm:$0xff] %v6651_v40  ;;  %v6685_v40 = vpop.f32.mrb[28].mxu1 }
 0x12a   : > { %v1935_v36 = vmax.f32 %v1807_v22, 0.0  ;;  %v1806_v24 = vadd.f32 %v6253_v9, %v1671_v35  ;;  %v1984_v55 = vmax.f32 %v1856_v21, 0.0  ;;  %v3916_v8 = vmax.f32 %v3914_v7, %v3915_v33  ;;  %8368 = vst [vmem:[#allocation68_spill] sm:$0xff] %v6685_v40  ;;  %v6700_v40 = vpop.f32.mrb[29].mxu1 }
 0x12b   : > { %8365 = vst [vmem:[#allocation65_spill] sm:$0xff] %v6643_v16  ;;  %v3906_v20 = vrot.slane %v3905_v42, 2  ;;  %v3393_v1 = vsel %vm3009_vm7, -3e+38, %v1985_v58  ;;  %v1365_v62 = vadd.f32 %v6341_v14, %v6228_v12  ;;  %v6659_v33 = vpop.f32.mrb[32].mxu0  ;;  %v1360_v25 = vadd.f32 %v6228_v12, %v6355_v31 }
 0x12c   : > { %v3343_v59 = vsel %vm2959_vm5, -3e+38, %v1935_v36  ;;  %v1934_v2 = vmax.f32 %v1806_v24, 0.0  ;;  %v3924_v37 = vsel %vm3454_vm1, %v3393_v1, -inf  ;;  %v3392_v5 = vsel %vm3008_vm8, -3e+38, %v1984_v55 }
 0x12d   : > { %v3907_v22 = vmax.f32 %v3905_v42, %v3906_v20  ;;  %v3574_v35 = vsel %vm3454_vm1, %v3343_v59, -inf  ;;  %v3925_v7 = vrot.slane %v3924_v37, 4  ;;  %v3917_v17 = vsel %vm3454_vm1, %v3392_v5, -inf  ;;  %v6665_v24 = vpop.f32.mrb[33].mxu0 }
 0x12e   : > { %v3575_v21 = vrot.slane %v3574_v35, 4  ;;  %v3342_v14 = vsel %vm2958_vm6, -3e+38, %v1934_v2  ;;  %v3918_v58 = vrot.slane %v3917_v17, 4  ;;  %vm2961_vm10 = vcmp.gt.f32.partialorder %v6123_v29, 0.5 }
 0x12f   : > { %v3908_v28 = vrot.slane %v3907_v22, 1  ;;  %v3567_v20 = vsel %vm3454_vm1, %v3342_v14, -inf  ;;  %v3926_v42 = vmax.f32 %v3924_v37, %v3925_v7  ;;  %v6670_v36 = vmul.f32 %v6243_v61, %v1365_v62  ;;  %v6678_v37 = vpop.f32.mrb[34].mxu0 }
 0x130   : > { %vm2960_vm11 = vcmp.gt.f32.partialorder %v6125_v30, 0.5  ;;  %v3576_v55 = vmax.f32 %v3574_v35, %v3575_v21  ;;  %v3568_v26 = vrot.slane %v3567_v20, 4  ;;  %v3919_v1 = vmax.f32 %v3917_v17, %v3918_v58  ;;  %v2535_v21 = vpop.permute.xlu1 %2534  ;;  %v6681_v17 = vpop.f32.mrb[35].mxu0 }
 0x131   : > { %v1105_v59 = vadd.f32 %v6506_v52, %v6228_v12  ;;  %v3909_v31 = vmax.f32 %v3907_v22, %v3908_v28  ;;  %v3927_v2 = vrot.slane %v3926_v42, 2  ;;  %vm4578_vm12 = vcmask 1042434   ;;  %8367 = vst [vmem:[#allocation67_spill] sm:$0xff] %v6681_v17 }
 0x132   : > { %v1100_v5 = vadd.f32 %v6228_v12, %v6514_v34  ;;  %v1859_v14 = vadd.f32 %v6253_v9, %v1724_v43  ;;  %v3577_v62 = vrot.slane %v3576_v55, 2  ;;  %v3569_v7 = vmax.f32 %v3567_v20, %v3568_v26 }
 0x133   : > { %v3920_v16 = vrot.slane %v3919_v1, 2  ;;  %v1674_v35 = vmul.f32 %v6243_v61, %v1105_v59  ;;  %v4639_v52 = vsel %vm4576_vm9, %v3916_v8, %v3909_v31  ;;  %v3928_v22 = vmax.f32 %v3926_v42, %v3927_v2  ;;  %v6691_v17 = vpop.f32.mrb[36].mxu0 }
 0x134   : > { %v1673_v58 = vmul.f32 %v6243_v61, %v1100_v5  ;;  %v1987_v28 = vmax.f32 %v1859_v14, 0.0  ;;  %v3578_v34 = vmax.f32 %v3576_v55, %v3577_v62  ;;  %v3570_v43 = vrot.slane %v3569_v7, 2  ;;  %v2528_v5 = vpop.permute.xlu0 %2527  ;;  %v6693_v14 = vpop.f32.mrb[37].mxu0 }
 0x135   : > { %v3921_v23 = vmax.f32 %v3919_v1, %v3920_v16  ;;  %v1809_v39 = vadd.f32 %v6253_v9, %v1674_v35  ;;  %v3929_v20 = vrot.slane %v3928_v22, 1  ;;  %vm3011_vm13 = vcmp.gt.f32.partialorder %v2535_v21, 0.5 }
 0x136   : > { %v1808_v26 = vadd.f32 %v6253_v9, %v1673_v58  ;;  %v1858_v59 = vadd.f32 %v6253_v9, %v6639_v53  ;;  %v3579_v8 = vrot.slane %v3578_v34, 1  ;;  %v3571_v42 = vmax.f32 %v3569_v7, %v3570_v43 }
 0x137   : > { %v3922_v31 = vrot.slane %v3921_v23, 1  ;;  %v1937_v2 = vmax.f32 %v1809_v39, 0.0  ;;  %v1725_v16 = vmul.f32 %v6243_v61, %v1360_v25  ;;  %v3395_v1 = vsel %vm3011_vm13, -3e+38, %v1987_v28  ;;  %v6706_v25 = vpop.f32.mrb[38].mxu0 }
 0x138   : > { %v1936_v55 = vmax.f32 %v1808_v26, 0.0  ;;  %v1986_v62 = vmax.f32 %v1858_v59, 0.0  ;;  %v3572_v35 = vrot.slane %v3571_v42, 1  ;;  %v6696_v58 = vmax.f32 %v3928_v22, %v3929_v20  ;;  %v6714_v20 = vpop.f32.mrb[39].mxu0 }
 0x139   : > { %v3923_v21 = vmax.f32 %v3921_v23, %v3922_v31  ;;  %v3345_v53 = vsel %vm2961_vm10, -3e+38, %v1937_v2  ;;  %v3938_v43 = vsel %vm3454_vm1, %v3395_v1, -inf  ;;  %vm3010_vm14 = vcmp.gt.f32.partialorder %v2528_v5, 0.5  ;;  %v8373_v5 = vld [vmem:[#allocation2_spill] sm:$0xff] }
 0x13a   : > { %8369 = vst [vmem:[#allocation69_spill] sm:$0xff] %v6696_v58  ;;  %v3588_v7 = vsel %vm3454_vm1, %v3345_v53, -inf  ;;  %v3344_v39 = vsel %vm2960_vm11, -3e+38, %v1936_v55  ;;  %v6708_v28 = vmax.f32 %v3578_v34, %v3579_v8  ;;  %vm2963_vm15 = vcmp.gt.f32.partialorder %v6130_v38, 0.5  ;;  %v8374_v53 = vld [vmem:[#allocation37_spill] sm:$0xff] }
 0x13b   : > { %v6711_v22 = vsel %vm4578_vm12, %v3923_v21, %v4639_v52  ;;  %v3589_v23 = vrot.slane %v3588_v7, 4  ;;  %v3581_v29 = vsel %vm3454_vm1, %v3344_v39, -inf  ;;  %v3939_v30 = vrot.slane %v3938_v43, 4  ;;  %v6727_v58 = vpop.f32.mrb[40].mxu0 }
 0x13c   : > { %8370 = vst [vmem:[#allocation70_spill] sm:$0xff] %v6708_v28  ;;  %8371 = vst [vmem:[#allocation71_spill] sm:$0xff] %v6711_v22  ;;  %v3582_v26 = vrot.slane %v3581_v29, 4  ;;  %v3394_v59 = vsel %vm3010_vm14, -3e+38, %v1986_v62  ;;  %v1375_v31 = vadd.f32 %v6367_v4, %v6228_v12  ;;  %v6719_v2 = vmax.f32 %v3571_v42, %v3572_v35  ;;  %v2549_v62 = vpop.permute.xlu1 %2548 }
 0x13d   : > { %v3590_v34 = vmax.f32 %v3588_v7, %v3589_v23  ;;  %v3931_v8 = vsel %vm3454_vm1, %v3394_v59, -inf  ;;  %v1115_v52 = vadd.f32 %v6537_v32, %v6228_v12  ;;  %vm2962_vm0 = vcmp.gt.f32.partialorder %v8373_v5, 0.5  ;;  %8375 = vst [vmem:[#allocation2_spill] sm:$0xff] %v6727_v58  ;;  %v6735_v7 = vpop.f32.mrb[41].mxu0 }
 0x13e   : > { %8372 = vst [vmem:[#allocation72_spill] sm:$0xff] %v6719_v2  ;;  %v3583_v55 = vmax.f32 %v3581_v29, %v3582_v26  ;;  %v3940_v1 = vmax.f32 %v3938_v43, %v3939_v30  ;;  %v3932_v21 = vrot.slane %v3931_v8, 4  ;;  %v1370_v39 = vadd.f32 %v6228_v12, %v8374_v53  ;;  %8376 = vst [vmem:[#allocation37_spill] sm:$0xff] %v6735_v7  ;;  %v6739_v30 = vpop.f32.mrb[30].mxu1 }
 0x13f   : > { %v3591_v4 = vrot.slane %v3590_v34, 2  ;;  %v6730_v42 = vmul.f32 %v6243_v61, %v1375_v31  ;;  %v1676_v35 = vmul.f32 %v6243_v61, %v1115_v52  ;;  %v1110_v32 = vadd.f32 %v6228_v12, %v6540_v51  ;;  %8377 = vst [vmem:[#allocation73_spill] sm:$0xff] %v6739_v30  ;;  %v6743_v52 = vpop.f32.mrb[31].mxu1 }
 0x140   : > { %v3584_v23 = vrot.slane %v3583_v55, 2  ;;  %v3941_v43 = vrot.slane %v3940_v1, 2  ;;  %v3933_v29 = vmax.f32 %v3931_v8, %v3932_v21  ;;  %v1861_v26 = vadd.f32 %v6253_v9, %v6670_v36 }
 0x141   : > { %v3592_v59 = vmax.f32 %v3590_v34, %v3591_v4  ;;  %v1811_v53 = vadd.f32 %v6253_v9, %v1676_v35  ;;  %v1675_v31 = vmul.f32 %v6243_v61, %v1110_v32  ;;  %vm3013_vm2 = vcmp.gt.f32.partialorder %v2549_v62, 0.5 }
 0x142   : > { %v3585_v22 = vmax.f32 %v3583_v55, %v3584_v23  ;;  %v3942_v51 = vmax.f32 %v3940_v1, %v3941_v43  ;;  %v3934_v28 = vrot.slane %v3933_v29, 2  ;;  %v1989_v2 = vmax.f32 %v1861_v26, 0.0  ;;  %v2542_v1 = vpop.permute.xlu0 %2541 }
 0x143   : > { %v3593_v7 = vrot.slane %v3592_v59, 1  ;;  %v1939_v58 = vmax.f32 %v1811_v53, 0.0  ;;  %v1810_v8 = vadd.f32 %v6253_v9, %v1675_v31  ;;  %v1860_v36 = vadd.f32 %v6253_v9, %v1725_v16  ;;  %v6756_v16 = vpop.f32.mrb[42].mxu0 }
 0x144   : > { %v3586_v21 = vrot.slane %v3585_v22, 1  ;;  %v3943_v30 = vrot.slane %v3942_v51, 1  ;;  %v3935_v34 = vmax.f32 %v3933_v29, %v3934_v28  ;;  %v3397_v4 = vsel %vm3013_vm2, -3e+38, %v1989_v2  ;;  %v8381_v29 = vld [vmem:[#allocation3_spill] sm:$0xff] }
 0x145   : > { %v1727_v35 = vmul.f32 %v6243_v61, %v1370_v39  ;;  %v3347_v62 = vsel %vm2963_vm15, -3e+38, %v1939_v58  ;;  %v1938_v32 = vmax.f32 %v1810_v8, 0.0  ;;  %v3952_v55 = vsel %vm3454_vm1, %v3397_v4, -inf  ;;  %v6760_v58 = vpop.f32.mrb[43].mxu0 }
 0x146   : > { %v6751_v23 = vmax.f32 %v3592_v59, %v3593_v7  ;;  %v6753_v43 = vmax.f32 %v3585_v22, %v3586_v21  ;;  %v3936_v26 = vrot.slane %v3935_v34, 1  ;;  %v3602_v9 = vsel %vm3454_vm1, %v3347_v62, -inf }
 0x147   : > { %v3603_v28 = vrot.slane %v3602_v9, 4  ;;  %v3346_v61 = vsel %vm2962_vm0, -3e+38, %v1938_v32  ;;  %v3953_v2 = vrot.slane %v3952_v55, 4  ;;  %v1988_v38 = vmax.f32 %v1860_v36, 0.0 }
 0x148   : > { %8378 = vst [vmem:[#allocation74_spill] sm:$0xff] %v6751_v23  ;;  %8379 = vst [vmem:[#allocation75_spill] sm:$0xff] %v6753_v43  ;;  %v6762_v39 = vmax.f32 %v3942_v51, %v3943_v30  ;;  %v3595_v7 = vsel %vm3454_vm1, %v3346_v61, -inf  ;;  %vm3012_vm3 = vcmp.gt.f32.partialorder %v2542_v1, 0.5  ;;  %v1385_v22 = vadd.f32 %v6388_v60, %v6228_v12  ;;  %v6774_v30 = vld [vmem:[%s8211_s3] ss:$0 sm:$0xff] }
 0x149   : > { %vm2965_vm4 = vcmp.gt.f32.partialorder %v8381_v29, 0.5  ;;  %v3604_v59 = vmax.f32 %v3602_v9, %v3603_v28  ;;  %v3596_v53 = vrot.slane %v3595_v7, 4  ;;  %v3954_v31 = vmax.f32 %v3952_v55, %v3953_v2  ;;  %v8383_v51 = vld [vmem:[#allocation39_spill] sm:$0xff]  ;;  %v8384_v60 = vld [vmem:[#allocation4_spill] sm:$0xff]  ;;  %v2563_v55 = vpop.permute.xlu1 %2562  ;;  %v6784_v1 = vld [vmem:[%s8212_s4] ss:$0 sm:$0xff] }
 0x14a   : > { %8380 = vst [vmem:[#allocation76_spill] sm:$0xff] %v6762_v39  ;;  %v3396_v8 = vsel %vm3012_vm3, -3e+38, %v1988_v38  ;;  %v6768_v5 = vmax.f32 %v3935_v34, %v3936_v26  ;;  %v1380_v21 = vadd.f32 %v6774_v30, %v8383_v51  ;;  %v1125_v12 = vadd.f32 %v6774_v30, %v6561_v10  ;;  %v6793_v10 = vld [vmem:[%s8213_s5] ss:$0 sm:$0xff] }
 0x14b   : > { %v3945_v36 = vsel %vm3454_vm1, %v3396_v8, -inf  ;;  %vm2964_vm5 = vcmp.gt.f32.partialorder %v8384_v60, 0.5  ;;  %v3605_v4 = vrot.slane %v3604_v59, 2  ;;  %v3597_v62 = vmax.f32 %v3595_v7, %v3596_v53  ;;  %v8391_v39 = vld [vmem:[#allocation6_spill] sm:$0xff] }
 0x14c   : > { %8382 = vst [vmem:[#allocation3_spill] sm:$0xff] %v6768_v5  ;;  %v3955_v32 = vrot.slane %v3954_v31, 2  ;;  %v3946_v34 = vrot.slane %v3945_v36, 4  ;;  %v1730_v26 = vmul.f32 %v6784_v1, %v1385_v22  ;;  %v1678_v9 = vmul.f32 %v6784_v1, %v1125_v12  ;;  %v6802_v12 = vpop.f32.mrb[32].mxu1 }
 0x14d   : > { %v1120_v28 = vadd.f32 %v6774_v30, %v6566_v41  ;;  %v1863_v61 = vadd.f32 %v6793_v10, %v6730_v42  ;;  %v6797_v2 = vmax.f32 %v3604_v59, %v3605_v4  ;;  %v3598_v38 = vrot.slane %v3597_v62, 2  ;;  %v2556_v41 = vpop.permute.xlu0 %2555 }
 0x14e   : > { %v3947_v7 = vmax.f32 %v3945_v36, %v3946_v34  ;;  %v1729_v53 = vmul.f32 %v6784_v1, %v1380_v21  ;;  %v1813_v22 = vadd.f32 %v6793_v10, %v1678_v9  ;;  %vm3015_vm6 = vcmp.gt.f32.partialorder %v2563_v55, 0.5  ;;  %v6810_v55 = vpop.f32.mrb[33].mxu1 }
 0x14f   : > { %8385 = vst [vmem:[#allocation39_spill] sm:$0xff] %v6797_v2  ;;  %v1677_v8 = vmul.f32 %v6784_v1, %v1120_v28  ;;  %v1991_v51 = vmax.f32 %v1863_v61, 0.0  ;;  %v3599_v5 = vmax.f32 %v3597_v62, %v3598_v38  ;;  %v6805_v23 = vmax.f32 %v3954_v31, %v3955_v32  ;;  %v2577_v38 = vpop.permute.xlu1 %2576 }
 0x150   : > { %v3948_v42 = vrot.slane %v3947_v7, 2  ;;  %v1941_v59 = vmax.f32 %v1813_v22, 0.0  ;;  %v1862_v21 = vadd.f32 %v6793_v10, %v1727_v35  ;;  %vm3014_vm7 = vcmp.gt.f32.partialorder %v2556_v41, 0.5 }
 0x151   : > { %8386 = vst [vmem:[#allocation4_spill] sm:$0xff] %v6805_v23  ;;  %v1812_v36 = vadd.f32 %v6793_v10, %v1677_v8  ;;  %v3399_v4 = vsel %vm3015_vm6, -3e+38, %v1991_v51  ;;  %v3600_v34 = vrot.slane %v3599_v5, 1  ;;  %v1395_v35 = vadd.f32 %v6774_v30, %v6420_v44  ;;  %v8390_v44 = vld [vmem:[#allocation5_spill] sm:$0xff] }
 0x152   : > { %v3949_v9 = vmax.f32 %v3947_v7, %v3948_v42  ;;  %v3966_v28 = vsel %vm3454_vm1, %v3399_v4, -inf  ;;  %v3349_v61 = vsel %vm2965_vm4, -3e+38, %v1941_v59  ;;  %v1990_v32 = vmax.f32 %v1862_v21, 0.0  ;;  %v6818_v7 = vpop.f32.mrb[44].mxu0 }
 0x153   : > { %v1940_v62 = vmax.f32 %v1812_v36, 0.0  ;;  %v3967_v31 = vrot.slane %v3966_v28, 4  ;;  %v3616_v8 = vsel %vm3454_vm1, %v3349_v61, -inf  ;;  %v6820_v51 = vmax.f32 %v3599_v5, %v3600_v34  ;;  %v6824_v59 = vpop.f32.mrb[45].mxu0 }
 0x154   : > { %v3950_v22 = vrot.slane %v3949_v9, 1  ;;  %v3398_v42 = vsel %vm3014_vm7, -3e+38, %v1990_v32  ;;  %8388 = vst [vmem:[#allocation78_spill] sm:$0xff] %v6824_v59  ;;  %v3617_v4 = vrot.slane %v3616_v8, 4  ;;  %vm2967_vm8 = vcmp.gt.f32.partialorder %v8390_v44, 0.5 }
 0x155   : > { %8387 = vst [vmem:[#allocation77_spill] sm:$0xff] %v6820_v51  ;;  %v3348_v41 = vsel %vm2964_vm5, -3e+38, %v1940_v62  ;;  %v3968_v29 = vmax.f32 %v3966_v28, %v3967_v31  ;;  %v3959_v61 = vsel %vm3454_vm1, %v3398_v42, -inf  ;;  %vm2966_vm10 = vcmp.gt.f32.partialorder %v8391_v39, 0.5 }
 0x156   : > { %v6826_v36 = vmax.f32 %v3949_v9, %v3950_v22  ;;  %v3609_v21 = vsel %vm3454_vm1, %v3348_v41, -inf  ;;  %v3960_v60 = vrot.slane %v3959_v61, 4  ;;  %v6833_v28 = vmul.f32 %v6784_v1, %v1395_v35 }
 0x157   : > { %v3610_v5 = vrot.slane %v3609_v21, 4  ;;  %v3969_v34 = vrot.slane %v3968_v29, 2  ;;  %v1390_v9 = vadd.f32 %v6774_v30, %v6443_v0  ;;  %v1135_v62 = vadd.f32 %v6774_v30, %v6580_v18  ;;  %v2570_v0 = vpop.permute.xlu0 %2569 }
 0x158   : > { %8389 = vst [vmem:[#allocation79_spill] sm:$0xff] %v6826_v36  ;;  %v1130_v31 = vadd.f32 %v6774_v30, %v6584_v19  ;;  %v1865_v32 = vadd.f32 %v6793_v10, %v1730_v26  ;;  %v3961_v42 = vmax.f32 %v3959_v61, %v3960_v60  ;;  %vm3017_vm11 = vcmp.gt.f32.partialorder %v2577_v38, 0.5 }
 0x159   : > { %v3611_v22 = vmax.f32 %v3609_v21, %v3610_v5  ;;  %v3970_v41 = vmax.f32 %v3968_v29, %v3969_v34  ;;  %v6842_v36 = vmax.f32 %v3616_v8, %v3617_v4  ;;  %v1680_v35 = vmul.f32 %v6784_v1, %v1135_v62  ;;  %v6850_v8 = vpop.f32.mrb[34].mxu1 }
 0x15a   : > { %v1679_v23 = vmul.f32 %v6784_v1, %v1130_v31  ;;  %v1993_v51 = vmax.f32 %v1865_v32, 0.0  ;;  %v3962_v2 = vrot.slane %v3961_v42, 2  ;;  %v1731_v18 = vmul.f32 %v6784_v1, %v1390_v9  ;;  %v6853_v5 = vpop.f32.mrb[35].mxu1 }
 0x15b   : > { %8392 = vst [vmem:[#allocation5_spill] sm:$0xff] %v6842_v36  ;;  %v3971_v43 = vrot.slane %v3970_v41, 1  ;;  %v1864_v19 = vadd.f32 %v6793_v10, %v1729_v53  ;;  %v3612_v59 = vrot.slane %v3611_v22, 2  ;;  %v1815_v26 = vadd.f32 %v6793_v10, %v1680_v35 }
 0x15c   : > { %v1814_v29 = vadd.f32 %v6793_v10, %v1679_v23  ;;  %v3401_v38 = vsel %vm3017_vm11, -3e+38, %v1993_v51  ;;  %v3963_v21 = vmax.f32 %v3961_v42, %v3962_v2  ;;  %vm3016_vm13 = vcmp.gt.f32.partialorder %v2570_v0, 0.5  ;;  %v8393_v2 = vld [vmem:[#allocation7_spill] sm:$0xff] }
 0x15d   : > { %v3972_v4 = vmax.f32 %v3970_v41, %v3971_v43  ;;  %v3980_v61 = vsel %vm3454_vm1, %v3401_v38, -inf  ;;  %v1943_v34 = vmax.f32 %v1815_v26, 0.0  ;;  %v1992_v62 = vmax.f32 %v1864_v19, 0.0  ;;  %v6869_v19 = vpop.f32.mrb[46].mxu0 }
 0x15e   : > { %v1942_v60 = vmax.f32 %v1814_v29, 0.0  ;;  %v3981_v9 = vrot.slane %v3980_v61, 4  ;;  %v3964_v53 = vrot.slane %v3963_v21, 1  ;;  %v1405_v31 = vadd.f32 %v6774_v30, %v6459_v47  ;;  %v6871_v44 = vpop.f32.mrb[47].mxu0 }
 0x15f   : > { %v1400_v23 = vadd.f32 %v6774_v30, %v6472_v49  ;;  %v1145_v43 = vadd.f32 %v6774_v30, %v6601_v11  ;;  %vm2969_vm14 = vcmp.gt.f32.partialorder %v8393_v2, 0.5  ;;  %v3351_v51 = vsel %vm2967_vm8, -3e+38, %v1943_v34 }
 0x160   : > { %v3350_v32 = vsel %vm2966_vm10, -3e+38, %v1942_v60  ;;  %v3982_v41 = vmax.f32 %v3980_v61, %v3981_v9  ;;  %v3400_v42 = vsel %vm3016_vm13, -3e+38, %v1992_v62  ;;  %v3965_v35 = vmax.f32 %v3963_v21, %v3964_v53  ;;  %v2591_v60 = vpop.permute.xlu1 %2590  ;;  %v8395_v9 = vld [vmem:[#allocation8_spill] sm:$0xff] }
 0x161   : > { %v3630_v0 = vsel %vm3454_vm1, %v3351_v51, -inf  ;;  %v3623_v47 = vsel %vm3454_vm1, %v3350_v32, -inf  ;;  %v3973_v49 = vsel %vm3454_vm1, %v3400_v42, -inf  ;;  %v6873_v34 = vmax.f32 %v3611_v22, %v3612_v59 }
 0x162   : > { %v3631_v11 = vrot.slane %v3630_v0, 4  ;;  %v3624_v26 = vrot.slane %v3623_v47, 4  ;;  %v3983_v29 = vrot.slane %v3982_v41, 2  ;;  %v3974_v38 = vrot.slane %v3973_v49, 4 }
 0x163   : > { %8394 = vst [vmem:[#allocation6_spill] sm:$0xff] %v6873_v34  ;;  %v4646_v39 = vsel %vm4576_vm9, %v3972_v4, %v3965_v35  ;;  %v6877_v21 = vmul.f32 %v6784_v1, %v1405_v31  ;;  %v1682_v61 = vmul.f32 %v6784_v1, %v1145_v43  ;;  %vm2968_vm15 = vcmp.gt.f32.partialorder %v8395_v9, 0.5 }
 0x164   : > { %v3632_v62 = vmax.f32 %v3630_v0, %v3631_v11  ;;  %v3625_v53 = vmax.f32 %v3623_v47, %v3624_v26  ;;  %v3984_v51 = vmax.f32 %v3982_v41, %v3983_v29  ;;  %v3975_v32 = vmax.f32 %v3973_v49, %v3974_v38  ;;  %v2584_v29 = vpop.permute.xlu0 %2583  ;;  %v6891_v38 = vpop.f32.mrb[36].mxu1 }
 0x165   : > { %v6882_v42 = vmul.f32 %v6784_v1, %v1400_v23  ;;  %v1817_v59 = vadd.f32 %v6793_v10, %v1682_v61  ;;  %v1140_v22 = vadd.f32 %v6774_v30, %v6604_v6  ;;  %v1867_v4 = vadd.f32 %v6793_v10, %v6833_v28 }
 0x166   : > { %v3633_v31 = vrot.slane %v3632_v62, 2  ;;  %v3626_v43 = vrot.slane %v3625_v53, 2  ;;  %v3976_v35 = vrot.slane %v3975_v32, 2  ;;  %vm3019_vm0 = vcmp.gt.f32.partialorder %v2591_v60, 0.5 }
 0x167   : > { %v1945_v36 = vmax.f32 %v1817_v59, 0.0  ;;  %v1681_v0 = vmul.f32 %v6784_v1, %v1140_v22  ;;  %v1995_v41 = vmax.f32 %v1867_v4, 0.0  ;;  %v1866_v47 = vadd.f32 %v6793_v10, %v1731_v18 }
 0x168   : > { %v3634_v23 = vmax.f32 %v3632_v62, %v3633_v31  ;;  %v3627_v49 = vmax.f32 %v3625_v53, %v3626_v43  ;;  %v3985_v11 = vrot.slane %v3984_v51, 1  ;;  %v3977_v26 = vmax.f32 %v3975_v32, %v3976_v35  ;;  %v6902_v43 = vpop.f32.mrb[37].mxu1 }
 0x169   : > { %v3353_v6 = vsel %vm2969_vm14, -3e+38, %v1945_v36  ;;  %v1816_v28 = vadd.f32 %v6793_v10, %v1681_v0  ;;  %v3403_v61 = vsel %vm3019_vm0, -3e+38, %v1995_v41  ;;  %v1994_v60 = vmax.f32 %v1866_v47, 0.0 }
 0x16a   : > { %v3635_v59 = vrot.slane %v3634_v23, 1  ;;  %v3628_v34 = vrot.slane %v3627_v49, 1  ;;  %v3978_v22 = vrot.slane %v3977_v26, 1  ;;  %v3644_v4 = vsel %vm3454_vm1, %v3353_v6, -inf }
 0x16b   : > { %v3645_v18 = vrot.slane %v3644_v4, 4  ;;  %v1944_v62 = vmax.f32 %v1816_v28, 0.0  ;;  %v3994_v53 = vsel %vm3454_vm1, %v3403_v61, -inf  ;;  %vm3018_vm2 = vcmp.gt.f32.partialorder %v2584_v29, 0.5  ;;  %v8400_v28 = vld [vmem:[#allocation10_spill] sm:$0xff] }
 0x16c   : > { %v6898_v32 = vmax.f32 %v3634_v23, %v3635_v59  ;;  %v6900_v31 = vmax.f32 %v3984_v51, %v3985_v11  ;;  %v3979_v2 = vmax.f32 %v3977_v26, %v3978_v22  ;;  %v3995_v36 = vrot.slane %v3994_v53, 4  ;;  %v6913_v11 = vpop.f32.mrb[48].mxu0  ;;  %v8399_v26 = vld [vmem:[#allocation9_spill] sm:$0xff] }
 0x16d   : > { %v3646_v35 = vmax.f32 %v3644_v4, %v3645_v18  ;;  %v3352_v0 = vsel %vm2968_vm15, -3e+38, %v1944_v62  ;;  %v3402_v41 = vsel %vm3018_vm2, -3e+38, %v1994_v60  ;;  %v1415_v47 = vadd.f32 %v6774_v30, %v6492_v46  ;;  %v6919_v46 = vpop.f32.mrb[49].mxu0 }
 0x16e   : > { %8396 = vst [vmem:[#allocation7_spill] sm:$0xff] %v6898_v32  ;;  %8397 = vst [vmem:[#allocation8_spill] sm:$0xff] %v6900_v31  ;;  %v6909_v6 = vsel %vm4578_vm12, %v3979_v2, %v4646_v39  ;;  %v3637_v23 = vsel %vm3454_vm1, %v3352_v0, -inf  ;;  %v3996_v29 = vmax.f32 %v3994_v53, %v3995_v36  ;;  %v3987_v51 = vsel %vm3454_vm1, %v3402_v41, -inf }
 0x16f   : > { %8398 = vst [vmem:[#allocation80_spill] sm:$0xff] %v6909_v6  ;;  %vm2971_vm3 = vcmp.gt.f32.partialorder %v8399_v26, 0.5  ;;  %vm2970_vm4 = vcmp.gt.f32.partialorder %v8400_v28, 0.5  ;;  %v6917_v9 = vmax.f32 %v3627_v49, %v3628_v34  ;;  %v3647_v61 = vrot.slane %v3646_v35, 2  ;;  %v2605_v34 = vpop.permute.xlu1 %2604 }
 0x170   : > { %v3638_v60 = vrot.slane %v3637_v23, 4  ;;  %v3988_v59 = vrot.slane %v3987_v51, 4  ;;  %v3997_v39 = vrot.slane %v3996_v29, 2  ;;  %v1410_v22 = vadd.f32 %v6774_v30, %v6502_v57 }
 0x171   : > { %8401 = vst [vmem:[#allocation9_spill] sm:$0xff] %v6917_v9  ;;  %v1155_v4 = vadd.f32 %v6774_v30, %v6622_v45  ;;  %v1150_v18 = vadd.f32 %v6774_v30, %v6630_v13  ;;  %v3648_v62 = vmax.f32 %v3646_v35, %v3647_v61  ;;  %v1869_v49 = vadd.f32 %v6793_v10, %v6877_v21  ;;  %v6932_v9 = vpop.f32.mrb[38].mxu1  ;;  %v2598_v61 = vpop.permute.xlu0 %2597 }
 0x172   : > { %v3639_v53 = vmax.f32 %v3637_v23, %v3638_v60  ;;  %v3989_v2 = vmax.f32 %v3987_v51, %v3988_v59  ;;  %v3998_v36 = vmax.f32 %v3996_v29, %v3997_v39  ;;  %v1736_v0 = vmul.f32 %v6784_v1, %v1415_v47  ;;  %8402 = vst [vmem:[#allocation10_spill] sm:$0xff] %v6932_v9  ;;  %v6937_v60 = vpop.f32.mrb[39].mxu1 }
 0x173   : > { %v1684_v41 = vmul.f32 %v6784_v1, %v1155_v4  ;;  %v1683_v57 = vmul.f32 %v6784_v1, %v1150_v18  ;;  %v3649_v31 = vrot.slane %v3648_v62, 1  ;;  %v1997_v32 = vmax.f32 %v1869_v49, 0.0 }
 0x174   : > { %v3640_v6 = vrot.slane %v3639_v53, 2  ;;  %v3990_v45 = vrot.slane %v3989_v2, 2  ;;  %v3999_v13 = vrot.slane %v3998_v36, 1  ;;  %vm3021_vm5 = vcmp.gt.f32.partialorder %v2605_v34, 0.5 }
 0x175   : > { %v1819_v35 = vadd.f32 %v6793_v10, %v1684_v41  ;;  %v1818_v23 = vadd.f32 %v6793_v10, %v1683_v57  ;;  %v1735_v47 = vmul.f32 %v6784_v1, %v1410_v22  ;;  %v3405_v51 = vsel %vm3021_vm5, -3e+38, %v1997_v32  ;;  %v6956_v57 = vpop.f32.mrb[50].mxu0 }
 0x176   : > { %v3641_v21 = vmax.f32 %v3639_v53, %v3640_v6  ;;  %v3991_v29 = vmax.f32 %v3989_v2, %v3990_v45  ;;  %v6939_v59 = vmax.f32 %v3648_v62, %v3649_v31  ;;  %v4008_v18 = vsel %vm3454_vm1, %v3405_v51, -inf }
 0x177   : > { %v1947_v39 = vmax.f32 %v1819_v35, 0.0  ;;  %v1946_v4 = vmax.f32 %v1818_v23, 0.0  ;;  %v4009_v41 = vrot.slane %v4008_v18, 4  ;;  %v1868_v34 = vadd.f32 %v6793_v10, %v6882_v42  ;;  %v8406_v42 = vld [vmem:[#allocation11_spill] sm:$0xff]  ;;  %v6960_v35 = vpop.f32.mrb[51].mxu0 }
 0x178   : > { %8403 = vst [vmem:[#allocation81_spill] sm:$0xff] %v6939_v59  ;;  %v3642_v49 = vrot.slane %v3641_v21, 1  ;;  %v3992_v9 = vrot.slane %v3991_v29, 1  ;;  %v6944_v6 = vmax.f32 %v3998_v36, %v3999_v13  ;;  %vm3020_vm6 = vcmp.gt.f32.partialorder %v2598_v61, 0.5  ;;  %v8407_v36 = vld [vmem:[#allocation12_spill] sm:$0xff] }
 0x179   : > { %v3355_v32 = vsel %vm2971_vm3, -3e+38, %v1947_v39  ;;  %v3354_v22 = vsel %vm2970_vm4, -3e+38, %v1946_v4  ;;  %v1425_v2 = vadd.f32 %v6774_v30, %v6519_v15  ;;  %vm2973_vm7 = vcmp.gt.f32.partialorder %v8406_v42, 0.5  ;;  %v8411_v42 = vld [vmem:[#allocation13_spill] sm:$0xff] }
 0x17a   : > { %8404 = vst [vmem:[#allocation82_spill] sm:$0xff] %v6944_v6  ;;  %v6950_v31 = vmax.f32 %v3641_v21, %v3642_v49  ;;  %v3658_v62 = vsel %vm3454_vm1, %v3355_v32, -inf  ;;  %v3651_v53 = vsel %vm3454_vm1, %v3354_v22, -inf  ;;  %vm2972_vm8 = vcmp.gt.f32.partialorder %v8407_v36, 0.5  ;;  %v2612_v6 = vpop.permute.xlu0 %2611 }
 0x17b   : > { %v3659_v26 = vrot.slane %v3658_v62, 4  ;;  %v3652_v45 = vrot.slane %v3651_v53, 4  ;;  %v4010_v28 = vmax.f32 %v4008_v18, %v4009_v41  ;;  %v1996_v13 = vmax.f32 %v1868_v34, 0.0 }
 0x17c   : > { %8405 = vst [vmem:[#allocation83_spill] sm:$0xff] %v6950_v31  ;;  %v6962_v23 = vmax.f32 %v3991_v29, %v3992_v9  ;;  %v1420_v21 = vadd.f32 %v6774_v30, %v6545_v50  ;;  %v1165_v15 = vadd.f32 %v6774_v30, %v6641_v27  ;;  %v1160_v51 = vadd.f32 %v6774_v30, %v6646_v63  ;;  %v2619_v29 = vpop.permute.xlu1 %2618 }
 0x17d   : > { %v3660_v39 = vmax.f32 %v3658_v62, %v3659_v26  ;;  %v3653_v4 = vmax.f32 %v3651_v53, %v3652_v45  ;;  %v4011_v49 = vrot.slane %v4010_v28, 2  ;;  %v3404_v32 = vsel %vm3020_vm6, -3e+38, %v1996_v13 }
 0x17e   : > { %8408 = vst [vmem:[#allocation11_spill] sm:$0xff] %v6962_v23  ;;  %v4001_v18 = vsel %vm3454_vm1, %v3404_v32, -inf  ;;  %v6973_v41 = vmul.f32 %v6784_v1, %v1425_v2  ;;  %v1686_v9 = vmul.f32 %v6784_v1, %v1165_v15  ;;  %v1685_v50 = vmul.f32 %v6784_v1, %v1160_v51 }
 0x17f   : > { %v3661_v34 = vrot.slane %v3660_v39, 2  ;;  %v3654_v27 = vrot.slane %v3653_v4, 2  ;;  %v6977_v22 = vmax.f32 %v4010_v28, %v4011_v49  ;;  %v4002_v63 = vrot.slane %v4001_v18, 4  ;;  %v6986_v49 = vpop.f32.mrb[40].mxu1 }
 0x180   : > { %v1737_v62 = vmul.f32 %v6784_v1, %v1420_v21  ;;  %v1821_v61 = vadd.f32 %v6793_v10, %v1686_v9  ;;  %v1820_v53 = vadd.f32 %v6793_v10, %v1685_v50  ;;  %v1871_v26 = vadd.f32 %v6793_v10, %v1736_v0 }
 0x181   : > { %8409 = vst [vmem:[#allocation12_spill] sm:$0xff] %v6977_v22  ;;  %v6983_v2 = vmax.f32 %v3660_v39, %v3661_v34  ;;  %v3655_v45 = vmax.f32 %v3653_v4, %v3654_v27  ;;  %v4003_v13 = vmax.f32 %v4001_v18, %v4002_v63  ;;  %vm3023_vm10 = vcmp.gt.f32.partialorder %v2619_v29, 0.5  ;;  %v2626_v22 = vpop.permute.xlu0 %2625 }
 0x182   : > { %v1949_v15 = vmax.f32 %v1821_v61, 0.0  ;;  %v1948_v51 = vmax.f32 %v1820_v53, 0.0  ;;  %v1999_v32 = vmax.f32 %v1871_v26, 0.0  ;;  %v1870_v28 = vadd.f32 %v6793_v10, %v1735_v47 }
 0x183   : > { %8410 = vst [vmem:[#allocation84_spill] sm:$0xff] %v6983_v2  ;;  %v3656_v9 = vrot.slane %v3655_v45, 1  ;;  %v4004_v23 = vrot.slane %v4003_v13, 2  ;;  %v1435_v18 = vadd.f32 %v6774_v30, %v6554_v3  ;;  %vm3022_vm11 = vcmp.gt.f32.partialorder %v2612_v6, 0.5 }
 0x184   : > { %v3357_v0 = vsel %vm2973_vm7, -3e+38, %v1949_v15  ;;  %v3356_v39 = vsel %vm2972_vm8, -3e+38, %v1948_v51  ;;  %v3407_v4 = vsel %vm3023_vm10, -3e+38, %v1999_v32  ;;  %v1430_v3 = vadd.f32 %v6774_v30, %v6563_v54 }
 0x185   : > { %v4005_v29 = vmax.f32 %v4003_v13, %v4004_v23  ;;  %v3672_v47 = vsel %vm3454_vm1, %v3357_v0, -inf  ;;  %v3665_v34 = vsel %vm3454_vm1, %v3356_v39, -inf  ;;  %v4022_v61 = vsel %vm3454_vm1, %v3407_v4, -inf  ;;  %v2633_v23 = vpop.permute.xlu1 %2632  ;;  %v7004_v13 = vpop.f32.mrb[41].mxu1 }
 0x186   : > { %v3673_v27 = vrot.slane %v3672_v47, 4  ;;  %v3666_v63 = vrot.slane %v3665_v34, 4  ;;  %v1998_v53 = vmax.f32 %v1870_v28, 0.0  ;;  %vm2975_vm13 = vcmp.gt.f32.partialorder %v8411_v42, 0.5  ;;  %v7011_v0 = vpop.f32.mrb[52].mxu0 }
 0x187   : > { %v7000_v26 = vmax.f32 %v3655_v45, %v3656_v9  ;;  %v4006_v36 = vrot.slane %v4005_v29, 1  ;;  %v4023_v15 = vrot.slane %v4022_v61, 4  ;;  %v7007_v6 = vmul.f32 %v6784_v1, %v1435_v18  ;;  %v7013_v45 = vpop.f32.mrb[42].mxu1  ;;  %v8413_v9 = vld [vmem:[#allocation14_spill] sm:$0xff] }
 0x188   : > { %v3667_v51 = vmax.f32 %v3665_v34, %v3666_v63  ;;  %v3406_v32 = vsel %vm3022_vm11, -3e+38, %v1998_v53  ;;  %v1175_v28 = vadd.f32 %v6774_v30, %v6659_v33  ;;  %vm2974_vm14 = vcmp.gt.f32.partialorder %v8413_v9, 0.5  ;;  %v7021_v63 = vpop.f32.mrb[53].mxu0  ;;  %v7023_v18 = vpop.f32.mrb[43].mxu1  ;;  %v8421_v9 = vld [vmem:[#allocation16_spill] sm:$0xff] }
 0x189   : > { %8412 = vst [vmem:[#allocation13_spill] sm:$0xff] %v7000_v26  ;;  %v7016_v39 = vmax.f32 %v4005_v29, %v4006_v36  ;;  %v7018_v54 = vmax.f32 %v3672_v47, %v3673_v27  ;;  %v4024_v4 = vmax.f32 %v4022_v61, %v4023_v15  ;;  %v4015_v34 = vsel %vm3454_vm1, %v3406_v32, -inf }
 0x18a   : > { %v3668_v53 = vrot.slane %v3667_v51, 2  ;;  %v4016_v50 = vrot.slane %v4015_v34, 4  ;;  %v1688_v33 = vmul.f32 %v6784_v1, %v1175_v28  ;;  %v1170_v21 = vadd.f32 %v6774_v30, %v6665_v24 }
 0x18b   : > { %8414 = vst [vmem:[#allocation14_spill] sm:$0xff] %v7016_v39  ;;  %8415 = vst [vmem:[#allocation85_spill] sm:$0xff] %v7018_v54  ;;  %v4025_v26 = vrot.slane %v4024_v4, 2  ;;  %v7029_v29 = vmul.f32 %v6784_v1, %v1430_v3  ;;  %v1873_v47 = vadd.f32 %v6793_v10, %v6973_v41  ;;  %v1872_v27 = vadd.f32 %v6793_v10, %v1737_v62 }
 0x18c   : > { %v4017_v61 = vmax.f32 %v4015_v34, %v4016_v50  ;;  %v1823_v36 = vadd.f32 %v6793_v10, %v1688_v33  ;;  %v1687_v15 = vmul.f32 %v6784_v1, %v1170_v21  ;;  %vm3025_vm15 = vcmp.gt.f32.partialorder %v2633_v23, 0.5 }
 0x18d   : > { %v4026_v32 = vmax.f32 %v4024_v4, %v4025_v26  ;;  %v2001_v28 = vmax.f32 %v1873_v47, 0.0  ;;  %v2000_v39 = vmax.f32 %v1872_v27, 0.0  ;;  %vm3024_vm0 = vcmp.gt.f32.partialorder %v2626_v22, 0.5 }
 0x18e   : > { %v7036_v24 = vmax.f32 %v3667_v51, %v3668_v53  ;;  %v4018_v59 = vrot.slane %v4017_v61, 2  ;;  %v1951_v3 = vmax.f32 %v1823_v36, 0.0  ;;  %v1822_v31 = vadd.f32 %v6793_v10, %v1687_v15  ;;  %v7046_v53 = vpop.f32.mrb[44].mxu1  ;;  %v8420_v36 = vld [vmem:[#allocation15_spill] sm:$0xff] }
 0x18f   : > { %v4027_v2 = vrot.slane %v4026_v32, 1  ;;  %v3409_v41 = vsel %vm3025_vm15, -3e+38, %v2001_v28  ;;  %v3408_v54 = vsel %vm3024_vm0, -3e+38, %v2000_v39  ;;  %v1445_v62 = vadd.f32 %v6774_v30, %v6571_v56  ;;  %v7050_v47 = vpop.f32.mrb[45].mxu1 }
 0x190   : > { %8416 = vst [vmem:[#allocation86_spill] sm:$0xff] %v7036_v24  ;;  %v4019_v50 = vmax.f32 %v4017_v61, %v4018_v59  ;;  %v3359_v21 = vsel %vm2975_vm13, -3e+38, %v1951_v3  ;;  %v1950_v26 = vmax.f32 %v1822_v31, 0.0  ;;  %v4036_v23 = vsel %vm3454_vm1, %v3409_v41, -inf  ;;  %8417 = vst [vmem:[#allocation87_spill] sm:$0xff] %v7050_v47 }
 0x191   : > { %v4028_v22 = vmax.f32 %v4026_v32, %v4027_v2  ;;  %v3686_v51 = vsel %vm3454_vm1, %v3359_v21, -inf  ;;  %v4037_v4 = vrot.slane %v4036_v23, 4  ;;  %v4029_v34 = vsel %vm3454_vm1, %v3408_v54, -inf  ;;  %v7058_v54 = vpop.f32.mrb[54].mxu0  ;;  %v7060_v61 = vpop.f32.mrb[46].mxu1 }
 0x192   : > { %v4020_v33 = vrot.slane %v4019_v50, 1  ;;  %v3687_v39 = vrot.slane %v3686_v51, 4  ;;  %v3358_v56 = vsel %vm2974_vm14, -3e+38, %v1950_v26  ;;  %v4030_v59 = vrot.slane %v4029_v34, 4  ;;  %8418 = vst [vmem:[#allocation88_spill] sm:$0xff] %v7058_v54 }
 0x193   : > { %v3679_v31 = vsel %vm3454_vm1, %v3358_v56, -inf  ;;  %v4038_v42 = vmax.f32 %v4036_v23, %v4037_v4  ;;  %v7054_v2 = vmul.f32 %v6784_v1, %v1445_v62  ;;  %v1440_v27 = vadd.f32 %v6774_v30, %v6575_v48  ;;  %8419 = vst [vmem:[#allocation89_spill] sm:$0xff] %v7060_v61  ;;  %v7064_v41 = vpop.f32.mrb[55].mxu0  ;;  %v8423_v26 = vld [vmem:[#allocation67_spill] sm:$0xff]  ;;  %v2647_v23 = vpop.permute.xlu1 %2646 }
 0x194   : > { %vm2977_vm2 = vcmp.gt.f32.partialorder %v8420_v36, 0.5  ;;  %vm2976_vm3 = vcmp.gt.f32.partialorder %v8421_v9, 0.5  ;;  %v4021_v15 = vmax.f32 %v4019_v50, %v4020_v33  ;;  %v3688_v32 = vmax.f32 %v3686_v51, %v3687_v39  ;;  %8422 = vst [vmem:[#allocation15_spill] sm:$0xff] %v7064_v41  ;;  %v7072_v56 = vpop.f32.mrb[47].mxu1 }
 0x195   : > { %v3680_v28 = vrot.slane %v3679_v31, 4  ;;  %v4031_v3 = vmax.f32 %v4029_v34, %v4030_v59  ;;  %v4039_v21 = vrot.slane %v4038_v42, 2  ;;  %v1185_v62 = vadd.f32 %v6774_v30, %v6678_v37  ;;  %8424 = vst [vmem:[#allocation16_spill] sm:$0xff] %v7072_v56 }
 0x196   : > { %v1180_v48 = vadd.f32 %v6774_v30, %v8423_v26  ;;  %v1875_v4 = vadd.f32 %v6793_v10, %v7007_v6  ;;  %v4653_v50 = vsel %vm4576_vm9, %v4028_v22, %v4021_v15  ;;  %v3689_v51 = vrot.slane %v3688_v32, 2 }
 0x197   : > { %v3681_v33 = vmax.f32 %v3679_v31, %v3680_v28  ;;  %v4032_v34 = vrot.slane %v4031_v3, 2  ;;  %v4040_v39 = vmax.f32 %v4038_v42, %v4039_v21  ;;  %v1690_v59 = vmul.f32 %v6784_v1, %v1185_v62 }
 0x198   : > { %v1689_v24 = vmul.f32 %v6784_v1, %v1180_v48  ;;  %v2003_v37 = vmax.f32 %v1875_v4, 0.0  ;;  %v3690_v41 = vmax.f32 %v3688_v32, %v3689_v51  ;;  %vm3027_vm4 = vcmp.gt.f32.partialorder %v2647_v23, 0.5  ;;  %v2640_v32 = vpop.permute.xlu0 %2639 }
 0x199   : > { %v3682_v61 = vrot.slane %v3681_v33, 2  ;;  %v4033_v26 = vmax.f32 %v4031_v3, %v4032_v34  ;;  %v4041_v54 = vrot.slane %v4040_v39, 1  ;;  %v1825_v6 = vadd.f32 %v6793_v10, %v1690_v59 }
 0x19a   : > { %v1824_v56 = vadd.f32 %v6793_v10, %v1689_v24  ;;  %v3411_v47 = vsel %vm3027_vm4, -3e+38, %v2003_v37  ;;  %v3691_v22 = vrot.slane %v3690_v41, 1  ;;  %v1741_v28 = vmul.f32 %v6784_v1, %v1440_v27  ;;  %v8428_v37 = vld [vmem:[#allocation59_spill] sm:$0xff] }
 0x19b   : > { %v3683_v15 = vmax.f32 %v3681_v33, %v3682_v61  ;;  %v4034_v31 = vrot.slane %v4033_v26, 1  ;;  %v4050_v42 = vsel %vm3454_vm1, %v3411_v47, -inf  ;;  %v1953_v21 = vmax.f32 %v1825_v6, 0.0  ;;  %v7096_v33 = vpop.f32.mrb[48].mxu1 }
 0x19c   : > { %v1952_v62 = vmax.f32 %v1824_v56, 0.0  ;;  %v4051_v48 = vrot.slane %v4050_v42, 4  ;;  %v7081_v4 = vmax.f32 %v3690_v41, %v3691_v22  ;;  %v7083_v3 = vmax.f32 %v4040_v39, %v4041_v54  ;;  %v7098_v36 = vpop.f32.mrb[49].mxu1  ;;  %v7106_v22 = vpop.f32.mrb[56].mxu0 }
 0x19d   : > { %v4035_v23 = vmax.f32 %v4033_v26, %v4034_v31  ;;  %v1874_v24 = vadd.f32 %v6793_v10, %v7029_v29  ;;  %v3684_v51 = vrot.slane %v3683_v15, 1  ;;  %v3361_v61 = vsel %vm2977_vm2, -3e+38, %v1953_v21  ;;  %8430 = vst [vmem:[#allocation59_spill] sm:$0xff] %v7106_v22  ;;  %v7108_v31 = vpop.f32.mrb[50].mxu1 }
 0x19e   : > { %8425 = vst [vmem:[#allocation67_spill] sm:$0xff] %v7081_v4  ;;  %8426 = vst [vmem:[#allocation90_spill] sm:$0xff] %v7083_v3  ;;  %v3360_v47 = vsel %vm2976_vm3, -3e+38, %v1952_v62  ;;  %v4052_v27 = vmax.f32 %v4050_v42, %v4051_v48  ;;  %v3700_v41 = vsel %vm3454_vm1, %v3361_v61, -inf  ;;  %vm3026_vm5 = vcmp.gt.f32.partialorder %v2640_v32, 0.5 }
 0x19f   : > { %v7092_v56 = vsel %vm4578_vm12, %v4035_v23, %v4653_v50  ;;  %v3693_v54 = vsel %vm3454_vm1, %v3360_v47, -inf  ;;  %v3701_v34 = vrot.slane %v3700_v41, 4  ;;  %v2002_v59 = vmax.f32 %v1874_v24, 0.0  ;;  %v8429_v50 = vld [vmem:[#allocation60_spill] sm:$0xff]  ;;  %v8432_v42 = vld [vmem:[#allocation17_spill] sm:$0xff]  ;;  %v7112_v24 = vpop.f32.mrb[57].mxu0 }
 0x1a0   : > { %8427 = vst [vmem:[#allocation91_spill] sm:$0xff] %v7092_v56  ;;  %v3694_v29 = vrot.slane %v3693_v54, 4  ;;  %v4053_v39 = vrot.slane %v4052_v27, 2  ;;  %v1455_v9 = vadd.f32 %v6774_v30, %v8428_v37  ;;  %vm4351_vm6 = vcmask 64512   ;;  %8431 = vst [vmem:[#allocation60_spill] sm:$0xff] %v7108_v31  ;;  %v7114_v61 = vpop.f32.mrb[51].mxu1  ;;  %v2661_v56 = vpop.permute.xlu1 %2660 }
 0x1a1   : > { %v1450_v26 = vadd.f32 %v6774_v30, %v8429_v50  ;;  %v1195_v6 = vadd.f32 %v6774_v30, %v6691_v17  ;;  %vm2979_vm7 = vcmp.gt.f32.partialorder %v8432_v42, 0.5  ;;  %v3702_v21 = vmax.f32 %v3700_v41, %v3701_v34  ;;  %8433 = vst [vmem:[#allocation17_spill] sm:$0xff] %v7112_v24  ;;  %8434 = vst [vmem:[#allocation92_spill] sm:$0xff] %v7114_v61  ;;  %v5617_v50 = vld [vmem:[%s5708_s8] sm:$0xff] }
 0x1a2   : > { %v3695_v62 = vmax.f32 %v3693_v54, %v3694_v29  ;;  %v4054_v48 = vmax.f32 %v4052_v27, %v4053_v39  ;;  %v3410_v23 = vsel %vm3026_vm5, -3e+38, %v2002_v59  ;;  %v7116_v47 = vmax.f32 %v3683_v15, %v3684_v51  ;;  %v8436_v41 = vld [vmem:[#allocation18_spill] sm:$0xff]  ;;  %v2654_v59 = vpop.permute.xlu0 %2653 }
 0x1a3   : > { %v4043_v37 = vsel %vm3454_vm1, %v3410_v23, -inf  ;;  %v7120_v17 = vmul.f32 %v6784_v1, %v1455_v9  ;;  %v4352_v3 = vsel %vm4351_vm6, %v5617_v50, inf  ;;  %vm2978_vm8 = vcmp.gt.f32.partialorder %v8436_v41, 0.5  ;;  %v8443_v41 = vld [vmem:[#allocation20_spill] sm:$0xff] }
 0x1a4   : > { %8435 = vst [vmem:[#allocation93_spill] sm:$0xff] %v7116_v47  ;;  %v3703_v27 = vrot.slane %v3702_v21, 2  ;;  %v3696_v32 = vrot.slane %v3695_v62, 2  ;;  %v4044_v54 = vrot.slane %v4043_v37, 4  ;;  %4353 = vmin.xlane.f32.xlu0 %v4352_v3  ;;  %v7126_v34 = vmul.f32 %v6784_v1, %v1450_v26 }
 0x1a5   : > { %v4055_v15 = vrot.slane %v4054_v48, 1  ;;  %v1692_v51 = vmul.f32 %v6784_v1, %v1195_v6  ;;  %v1190_v29 = vadd.f32 %v6774_v30, %v6693_v14  ;;  %v1877_v39 = vadd.f32 %v6793_v10, %v7054_v2 }
 0x1a6   : > { %v3704_v9 = vmax.f32 %v3702_v21, %v3703_v27  ;;  %v3697_v23 = vmax.f32 %v3695_v62, %v3696_v32  ;;  %v4045_v50 = vmax.f32 %v4043_v37, %v4044_v54  ;;  %vm3029_vm10 = vcmp.gt.f32.partialorder %v2661_v56, 0.5  ;;  %v7137_v21 = vpop.f32.mrb[52].mxu1 }
 0x1a7   : > { %v1827_v4 = vadd.f32 %v6793_v10, %v1692_v51  ;;  %v1691_v3 = vmul.f32 %v6784_v1, %v1190_v29  ;;  %v2005_v26 = vmax.f32 %v1877_v39, 0.0  ;;  %v1876_v47 = vadd.f32 %v6793_v10, %v1741_v28  ;;  %v7144_v32 = vpop.f32.mrb[53].mxu1 }
 0x1a8   : > { %v3705_v61 = vrot.slane %v3704_v9, 1  ;;  %v3698_v6 = vrot.slane %v3697_v23, 1  ;;  %v4046_v24 = vrot.slane %v4045_v50, 2  ;;  %vm3028_vm11 = vcmp.gt.f32.partialorder %v2654_v59, 0.5 }
 0x1a9   : > { %v1955_v14 = vmax.f32 %v1827_v4, 0.0  ;;  %v1826_v31 = vadd.f32 %v6793_v10, %v1691_v3  ;;  %v3413_v2 = vsel %vm3029_vm10, -3e+38, %v2005_v26  ;;  %v2004_v22 = vmax.f32 %v1876_v47, 0.0  ;;  %v5618_v3 = vld [vmem:[%s5708_s8 + $0x10] sm:$0xff] }
 0x1aa   : > { %v7139_v62 = vmax.f32 %v3704_v9, %v3705_v61  ;;  %v7141_v56 = vmax.f32 %v4054_v48, %v4055_v15  ;;  %v4047_v37 = vmax.f32 %v4045_v50, %v4046_v24  ;;  %v4064_v27 = vsel %vm3454_vm1, %v3413_v2, -inf  ;;  %v7152_v15 = vpop.f32.mrb[58].mxu0  ;;  %v7156_v9 = vpop.f32.mrb[54].mxu1 }
 0x1ab   : > { %v3363_v28 = vsel %vm2979_vm7, -3e+38, %v1955_v14  ;;  %v1954_v54 = vmax.f32 %v1826_v31, 0.0  ;;  %v4065_v4 = vrot.slane %v4064_v27, 4  ;;  %v3412_v51 = vsel %vm3028_vm11, -3e+38, %v2004_v22 }
 0x1ac   : > { %8437 = vst [vmem:[#allocation18_spill] sm:$0xff] %v7139_v62  ;;  %8438 = vst [vmem:[#allocation94_spill] sm:$0xff] %v7141_v56  ;;  %v7148_v29 = vmax.f32 %v3697_v23, %v3698_v6  ;;  %v4048_v47 = vrot.slane %v4047_v37, 1  ;;  %v3714_v61 = vsel %vm3454_vm1, %v3363_v28, -inf  ;;  %v4057_v48 = vsel %vm3454_vm1, %v3412_v51, -inf  ;;  %v8441_v23 = vld [vmem:[#allocation64_spill] sm:$0xff] }
 0x1ad   : > { %v3715_v24 = vrot.slane %v3714_v61, 4  ;;  %v3362_v39 = vsel %vm2978_vm8, -3e+38, %v1954_v54  ;;  %v4066_v59 = vmax.f32 %v4064_v27, %v4065_v4  ;;  %v4058_v42 = vrot.slane %v4057_v48, 4  ;;  %v7165_v6 = vpop.f32.mrb[59].mxu0  ;;  %v8442_v14 = vld [vmem:[#allocation19_spill] sm:$0xff] }
 0x1ae   : > { %8439 = vst [vmem:[#allocation95_spill] sm:$0xff] %v7148_v29  ;;  %v7158_v31 = vmax.f32 %v4047_v37, %v4048_v47  ;;  %v3707_v22 = vsel %vm3454_vm1, %v3362_v39, -inf  ;;  %v1465_v50 = vadd.f32 %v6774_v30, %v8441_v23  ;;  %v4358_v26 = vsel %vm4351_vm6, %v5618_v3, inf  ;;  %v7169_v37 = vpop.f32.mrb[55].mxu1  ;;  %v8444_v4 = vld [vmem:[#allocation66_spill] sm:$0xff]  ;;  %v5619_v47 = vld [vmem:[%s5708_s8 + $0x8] sm:$0xff] }
 0x1af   : > { %vm2981_vm13 = vcmp.gt.f32.partialorder %v8442_v14, 0.5  ;;  %vm2980_vm14 = vcmp.gt.f32.partialorder %v8443_v41, 0.5  ;;  %v3716_v2 = vmax.f32 %v3714_v61, %v3715_v24  ;;  %v3708_v27 = vrot.slane %v3707_v22, 4  ;;  %4359 = vmin.xlane.f32.xlu0 %v4358_v26 }
 0x1b0   : > { %8440 = vst [vmem:[#allocation96_spill] sm:$0xff] %v7158_v31  ;;  %v4067_v28 = vrot.slane %v4066_v59, 2  ;;  %v4059_v54 = vmax.f32 %v4057_v48, %v4058_v42  ;;  %v1460_v51 = vadd.f32 %v6774_v30, %v8444_v4  ;;  %v4355_v39 = vsel %vm4351_vm6, %v5619_v47, inf  ;;  %v2675_v42 = vpop.permute.xlu1 %2674 }
 0x1b1   : > { %v1205_v23 = vadd.f32 %v6774_v30, %v6706_v25  ;;  %v1200_v3 = vadd.f32 %v6774_v30, %v6714_v20  ;;  %v3717_v56 = vrot.slane %v3716_v2, 2  ;;  %v3709_v61 = vmax.f32 %v3707_v22, %v3708_v27  ;;  %4356 = vmin.xlane.f32.xlu1 %v4355_v39  ;;  %v2668_v22 = vpop.permute.xlu0 %2667 }
 0x1b2   : > { %v7179_v24 = vmax.f32 %v4066_v59, %v4067_v28  ;;  %v4060_v48 = vrot.slane %v4059_v54, 2  ;;  %v7182_v26 = vmul.f32 %v6784_v1, %v1465_v50  ;;  %v1879_v25 = vadd.f32 %v6793_v10, %v7120_v17 }
 0x1b3   : > { %v1694_v4 = vmul.f32 %v6784_v1, %v1205_v23  ;;  %v1693_v47 = vmul.f32 %v6784_v1, %v1200_v3  ;;  %v7188_v31 = vmax.f32 %v3716_v2, %v3717_v56  ;;  %v3710_v20 = vrot.slane %v3709_v61, 2 }
 0x1b4   : > { %8445 = vst [vmem:[#allocation64_spill] sm:$0xff] %v7179_v24  ;;  %v4061_v62 = vmax.f32 %v4059_v54, %v4060_v48  ;;  %v7191_v59 = vmul.f32 %v6784_v1, %v1460_v51  ;;  %v2007_v28 = vmax.f32 %v1879_v25, 0.0  ;;  %vm3031_vm15 = vcmp.gt.f32.partialorder %v2675_v42, 0.5  ;;  %v8447_v25 = vld [vmem:[#allocation68_spill] sm:$0xff]  ;;  %v8458_v24 = vld [vmem:[#allocation37_spill] sm:$0xff] }
 0x1b5   : > { %8446 = vst [vmem:[#allocation19_spill] sm:$0xff] %v7188_v31  ;;  %v1829_v27 = vadd.f32 %v6793_v10, %v1694_v4  ;;  %v1828_v50 = vadd.f32 %v6793_v10, %v1693_v47  ;;  %v3711_v39 = vmax.f32 %v3709_v61, %v3710_v20  ;;  %v1878_v17 = vadd.f32 %v6793_v10, %v7126_v34  ;;  %v7206_v34 = vpop.f32.mrb[56].mxu1  ;;  %v2682_v29 = vpop.permute.xlu0 %2681 }
 0x1b6   : > { %v4062_v3 = vrot.slane %v4061_v62, 1  ;;  %v3415_v54 = vsel %vm3031_vm15, -3e+38, %v2007_v28  ;;  %vm3030_vm0 = vcmp.gt.f32.partialorder %v2668_v22, 0.5  ;;  %v1475_v10 = vadd.f32 %v6774_v30, %v8447_v25  ;;  %8448 = vst [vmem:[#allocation20_spill] sm:$0xff] %v7206_v34  ;;  %v7212_v28 = vpop.f32.mrb[57].mxu1 }
 0x1b7   : > { %v1957_v56 = vmax.f32 %v1829_v27, 0.0  ;;  %v1956_v2 = vmax.f32 %v1828_v50, 0.0  ;;  %v3712_v51 = vrot.slane %v3711_v39, 1  ;;  %v4078_v48 = vsel %vm3454_vm1, %v3415_v54, -inf  ;;  %8450 = vst [vmem:[#allocation68_spill] sm:$0xff] %v7212_v28  ;;  %v5620_v54 = vld [vmem:[%s5708_s8 + $0x18] sm:$0xff] }
 0x1b8   : > { %v2006_v4 = vmax.f32 %v1878_v17, 0.0  ;;  %v4079_v47 = vrot.slane %v4078_v48, 4  ;;  %v7208_v20 = vmax.f32 %v4061_v62, %v4062_v3  ;;  %v4361_v62 = vsel %vm4351_vm6, %v5620_v54, inf  ;;  %v7222_v3 = vld [vmem:[%s8211_s3] ss:$0 sm:$0xff]  ;;  %v5625_v28 = vld [vmem:[%s5708_s8 + $0x28] sm:$0xff] }
 0x1b9   : > { %v3365_v42 = vsel %vm2981_vm13, -3e+38, %v1957_v56  ;;  %v3364_v61 = vsel %vm2980_vm14, -3e+38, %v1956_v2  ;;  %v7215_v2 = vmax.f32 %v3711_v39, %v3712_v51  ;;  %v7233_v25 = vld [vmem:[%s8212_s4] ss:$0 sm:$0xff]  ;;  %4362 = vmin.xlane.f32.xlu0 %v4361_v62 }
 0x1ba   : > { %8449 = vst [vmem:[#allocation66_spill] sm:$0xff] %v7208_v20  ;;  %v3728_v22 = vsel %vm3454_vm1, %v3365_v42, -inf  ;;  %v3721_v27 = vsel %vm3454_vm1, %v3364_v61, -inf  ;;  %v3414_v50 = vsel %vm3030_vm0, -3e+38, %v2006_v4  ;;  %v4080_v41 = vmax.f32 %v4078_v48, %v4079_v47  ;;  %v2689_v42 = vpop.permute.xlu1 %2688  ;;  %v7226_v61 = vpop.f32.mrb[60].mxu0 }
 0x1bb   : > { %v3729_v14 = vrot.slane %v3728_v22, 4  ;;  %v3722_v17 = vrot.slane %v3721_v27, 4  ;;  %v4071_v56 = vsel %vm3454_vm1, %v3414_v50, -inf  ;;  %8451 = vst [vmem:[#allocation97_spill] sm:$0xff] %v7215_v2  ;;  %v1470_v4 = vadd.f32 %v7222_v3, %v6700_v40  ;;  %8452 = vst [vmem:[#allocation98_spill] sm:$0xff] %v7226_v61  ;;  %v8453_v48 = vld [vmem:[#allocation21_spill] sm:$0xff] }
 0x1bc   : > { %v4072_v30 = vrot.slane %v4071_v56, 4  ;;  %vm2983_vm2 = vcmp.gt.f32.partialorder %v8453_v48, 0.5  ;;  %v8454_v47 = vld [vmem:[#allocation22_spill] sm:$0xff]  ;;  %v4081_v51 = vrot.slane %v4080_v41, 2  ;;  %v7236_v50 = vmul.f32 %v7233_v25, %v1475_v10  ;;  %v7240_v23 = vpop.f32.mrb[61].mxu0 }
 0x1bd   : > { %vm2982_vm3 = vcmp.gt.f32.partialorder %v8454_v47, 0.5  ;;  %v3723_v39 = vmax.f32 %v3721_v27, %v3722_v17  ;;  %v5623_v54 = vld [vmem:[%s5708_s8 + $0x20] sm:$0xff]  ;;  %8455 = vst [vmem:[#allocation21_spill] sm:$0xff] %v7240_v23  ;;  %v7242_v1 = vmax.f32 %v3728_v22, %v3729_v14  ;;  %v1210_v2 = vadd.f32 %v7222_v3, %v8458_v24  ;;  %v8459_v23 = vld [vmem:[#allocation73_spill] sm:$0xff] }
 0x1be   : > { %v4364_v40 = vsel %vm4351_vm6, %v5623_v54, inf  ;;  %v4073_v20 = vmax.f32 %v4071_v56, %v4072_v30  ;;  %v8457_v27 = vld [vmem:[#allocation2_spill] sm:$0xff]  ;;  %v4082_v31 = vmax.f32 %v4080_v41, %v4081_v51  ;;  %v7249_v10 = vmul.f32 %v7233_v25, %v1470_v4  ;;  %v2703_v47 = vpop.permute.xlu1 %2702 }
 0x1bf   : > { %8456 = vst [vmem:[#allocation22_spill] sm:$0xff] %v7242_v1  ;;  %4365 = vmin.xlane.f32.xlu1 %v4364_v40  ;;  %v1215_v17 = vadd.f32 %v7222_v3, %v8457_v27  ;;  %v7254_v62 = vld [vmem:[%s8213_s5] ss:$0 sm:$0xff]  ;;  %vm3033_vm4 = vcmp.gt.f32.partialorder %v2689_v42, 0.5  ;;  %v1695_v24 = vmul.f32 %v7233_v25, %v1210_v2  ;;  %v3724_v30 = vrot.slane %v3723_v39, 2 }
 0x1c0   : > { %v1881_v22 = vadd.f32 %v7254_v62, %v7182_v26  ;;  %v4074_v14 = vrot.slane %v4073_v20, 2  ;;  %v1880_v41 = vadd.f32 %v7254_v62, %v7191_v59  ;;  %v4083_v4 = vrot.slane %v4082_v31, 1 }
 0x1c1   : > { %v1696_v56 = vmul.f32 %v7233_v25, %v1215_v17  ;;  %vm3032_vm5 = vcmp.gt.f32.partialorder %v2682_v29, 0.5  ;;  %v1830_v27 = vadd.f32 %v7254_v62, %v1695_v24  ;;  %v1485_v17 = vadd.f32 %v7222_v3, %v8459_v23 }
 0x1c2   : > { %v2009_v51 = vmax.f32 %v1881_v22, 0.0  ;;  %v4075_v54 = vmax.f32 %v4073_v20, %v4074_v14  ;;  %v2008_v26 = vmax.f32 %v1880_v41, 0.0  ;;  %v4084_v42 = vmax.f32 %v4082_v31, %v4083_v4  ;;  %v8461_v4 = vld [vmem:[#allocation23_spill] sm:$0xff] }
 0x1c3   : > { %v1831_v40 = vadd.f32 %v7254_v62, %v1696_v56  ;;  %v4367_v2 = vsel %vm4351_vm6, %v5625_v28, inf  ;;  %v1958_v34 = vmax.f32 %v1830_v27, 0.0  ;;  %v7269_v20 = vmax.f32 %v3723_v39, %v3724_v30 }
 0x1c4   : > { %v3417_v1 = vsel %vm3033_vm4, -3e+38, %v2009_v51  ;;  %v4076_v61 = vrot.slane %v4075_v54, 1  ;;  %4368 = vmin.xlane.f32.xlu0 %v4367_v2  ;;  %v3416_v56 = vsel %vm3032_vm5, -3e+38, %v2008_v26  ;;  %v7273_v31 = vmul.f32 %v7233_v25, %v1485_v17  ;;  %v5626_v17 = vld [vmem:[%s5708_s8 + $0x30] sm:$0xff] }
 0x1c5   : > { %v1959_v59 = vmax.f32 %v1831_v40, 0.0  ;;  %v4092_v22 = vsel %vm3454_vm1, %v3417_v1, -inf  ;;  %8460 = vst [vmem:[#allocation2_spill] sm:$0xff] %v7269_v20  ;;  %v3366_v28 = vsel %vm2982_vm3, -3e+38, %v1958_v34  ;;  %v4085_v41 = vsel %vm3454_vm1, %v3416_v56, -inf }
 0x1c6   : > { %v4093_v14 = vrot.slane %v4092_v22, 4  ;;  %v4077_v24 = vmax.f32 %v4075_v54, %v4076_v61  ;;  %v3735_v39 = vsel %vm3454_vm1, %v3366_v28, -inf  ;;  %v4086_v29 = vrot.slane %v4085_v41, 4  ;;  %v7286_v34 = vpop.f32.mrb[62].mxu0  ;;  %v8463_v40 = vld [vmem:[#allocation24_spill] sm:$0xff] }
 0x1c7   : > { %v3367_v23 = vsel %vm2983_vm2, -3e+38, %v1959_v59  ;;  %vm2985_vm7 = vcmp.gt.f32.partialorder %v8461_v4, 0.5  ;;  %v3736_v54 = vrot.slane %v3735_v39, 4  ;;  %v1480_v48 = vadd.f32 %v7222_v3, %v6743_v52  ;;  %8462 = vst [vmem:[#allocation37_spill] sm:$0xff] %v7286_v34 }
 0x1c8   : > { %v3742_v1 = vsel %vm3454_vm1, %v3367_v23, -inf  ;;  %v4094_v30 = vmax.f32 %v4092_v22, %v4093_v14  ;;  %v4660_v51 = vsel %vm4576_vm9, %v4084_v42, %v4077_v24  ;;  %vm2984_vm8 = vcmp.gt.f32.partialorder %v8463_v40, 0.5  ;;  %v7293_v22 = vpop.f32.mrb[63].mxu0 }
 0x1c9   : > { %v3743_v61 = vrot.slane %v3742_v1, 4  ;;  %v4087_v26 = vmax.f32 %v4085_v41, %v4086_v29  ;;  %v4370_v2 = vsel %vm4351_vm6, %v5626_v17, inf  ;;  %v1225_v59 = vadd.f32 %v7222_v3, %v6756_v16  ;;  %8464 = vst [vmem:[#allocation73_spill] sm:$0xff] %v7293_v22 }
 0x1ca   : > { %v4095_v27 = vrot.slane %v4094_v30, 2  ;;  %v3737_v14 = vmax.f32 %v3735_v39, %v3736_v54  ;;  %4371 = vmin.xlane.f32.xlu1 %v4370_v2  ;;  %v1220_v52 = vadd.f32 %v7222_v3, %v6760_v58  ;;  %v1883_v56 = vadd.f32 %v7254_v62, %v7236_v50 }
 0x1cb   : > { %v3744_v42 = vmax.f32 %v3742_v1, %v3743_v61  ;;  %v4088_v23 = vrot.slane %v4087_v26, 2  ;;  %v1698_v28 = vmul.f32 %v7233_v25, %v1225_v59  ;;  %vm3035_vm10 = vcmp.gt.f32.partialorder %v2703_v47, 0.5 }
 0x1cc   : > { %v4096_v24 = vmax.f32 %v4094_v30, %v4095_v27  ;;  %v3738_v29 = vrot.slane %v3737_v14, 2  ;;  %v1697_v16 = vmul.f32 %v7233_v25, %v1220_v52  ;;  %v2011_v17 = vmax.f32 %v1883_v56, 0.0  ;;  %v2696_v27 = vpop.permute.xlu0 %2695 }
 0x1cd   : > { %v3745_v41 = vrot.slane %v3744_v42, 2  ;;  %v4089_v1 = vmax.f32 %v4087_v26, %v4088_v23  ;;  %v1833_v39 = vadd.f32 %v7254_v62, %v1698_v28  ;;  %v1882_v58 = vadd.f32 %v7254_v62, %v7249_v10  ;;  %v7307_v28 = vpop.f32.mrb[58].mxu1 }
 0x1ce   : > { %v4097_v20 = vrot.slane %v4096_v24, 1  ;;  %v3739_v54 = vmax.f32 %v3737_v14, %v3738_v29  ;;  %v1832_v50 = vadd.f32 %v7254_v62, %v1697_v16  ;;  %v3419_v30 = vsel %vm3035_vm10, -3e+38, %v2011_v17  ;;  %v7311_v14 = vpop.f32.mrb[59].mxu1 }
 0x1cf   : > { %v3746_v61 = vmax.f32 %v3744_v42, %v3745_v41  ;;  %v4090_v2 = vrot.slane %v4089_v1, 1  ;;  %v1749_v47 = vmul.f32 %v7233_v25, %v1480_v48  ;;  %v1961_v59 = vmax.f32 %v1833_v39, 0.0 }
 0x1d0   : > { %v4106_v52 = vsel %vm3454_vm1, %v3419_v30, -inf  ;;  %v3740_v22 = vrot.slane %v3739_v54, 1  ;;  %v1960_v26 = vmax.f32 %v1832_v50, 0.0  ;;  %v2010_v42 = vmax.f32 %v1882_v58, 0.0 }
 0x1d1   : > { %v3747_v56 = vrot.slane %v3746_v61, 1  ;;  %v4107_v23 = vrot.slane %v4106_v52, 4  ;;  %v4091_v34 = vmax.f32 %v4089_v1, %v4090_v2  ;;  %v3369_v10 = vsel %vm2985_vm7, -3e+38, %v1961_v59 }
 0x1d2   : > { %vm3034_vm11 = vcmp.gt.f32.partialorder %v2696_v27, 0.5  ;;  %v7315_v48 = vmax.f32 %v4096_v24, %v4097_v20  ;;  %v3756_v29 = vsel %vm3454_vm1, %v3369_v10, -inf  ;;  %v3368_v16 = vsel %vm2984_vm8, -3e+38, %v1960_v26  ;;  %v5627_v20 = vld [vmem:[%s5708_s8 + $0x38] sm:$0xff]  ;;  %v2717_v26 = vpop.permute.xlu1 %2716 }
 0x1d3   : > { %v7313_v41 = vmax.f32 %v3746_v61, %v3747_v56  ;;  %v7321_v17 = vsel %vm4578_vm12, %v4091_v34, %v4660_v51  ;;  %v3757_v1 = vrot.slane %v3756_v29, 4  ;;  %v3749_v4 = vsel %vm3454_vm1, %v3368_v16, -inf  ;;  %v8467_v34 = vld [vmem:[#allocation25_spill] sm:$0xff]  ;;  %v5628_v56 = vld [vmem:[%s5708_s8 + $0x40] sm:$0xff] }
 0x1d4   : > { %8465 = vst [vmem:[#allocation23_spill] sm:$0xff] %v7315_v48  ;;  %8466 = vst [vmem:[#allocation24_spill] sm:$0xff] %v7321_v17  ;;  %v4108_v39 = vmax.f32 %v4106_v52, %v4107_v23  ;;  %v3750_v58 = vrot.slane %v3749_v4, 4  ;;  %v3418_v50 = vsel %vm3034_vm11, -3e+38, %v2010_v42  ;;  %v1495_v61 = vadd.f32 %v7222_v3, %v6802_v12  ;;  %v8468_v23 = vld [vmem:[#allocation26_spill] sm:$0xff] }
 0x1d5   : > { %v4373_v24 = vsel %vm4351_vm6, %v5627_v20, inf  ;;  %v7328_v30 = vmax.f32 %v3739_v54, %v3740_v22  ;;  %v3758_v40 = vmax.f32 %v3756_v29, %v3757_v1  ;;  %v4099_v51 = vsel %vm3454_vm1, %v3418_v50, -inf  ;;  %v8469_v1 = vld [vmem:[#allocation78_spill] sm:$0xff] }
 0x1d6   : > { %v4109_v27 = vrot.slane %v4108_v39, 2  ;;  %4374 = vmin.xlane.f32.xlu0 %v4373_v24  ;;  %vm2987_vm13 = vcmp.gt.f32.partialorder %v8467_v34, 0.5  ;;  %v3751_v2 = vmax.f32 %v3749_v4, %v3750_v58  ;;  %v4100_v59 = vrot.slane %v4099_v51, 4 }
 0x1d7   : > { %v1490_v52 = vadd.f32 %v7222_v3, %v6810_v55  ;;  %v4376_v12 = vsel %vm4351_vm6, %v5628_v56, inf  ;;  %vm2986_vm14 = vcmp.gt.f32.partialorder %v8468_v23, 0.5  ;;  %v3759_v22 = vrot.slane %v3758_v40, 2  ;;  %v8473_v23 = vld [vmem:[#allocation28_spill] sm:$0xff] }
 0x1d8   : > { %v4110_v54 = vmax.f32 %v4108_v39, %v4109_v27  ;;  %v7338_v10 = vmul.f32 %v7233_v25, %v1495_v61  ;;  %4377 = vmin.xlane.f32.xlu1 %v4376_v12  ;;  %v1235_v42 = vadd.f32 %v7222_v3, %v6818_v7  ;;  %v3752_v29 = vrot.slane %v3751_v2, 2 }
 0x1d9   : > { %v4101_v16 = vmax.f32 %v4099_v51, %v4100_v59  ;;  %v1230_v55 = vadd.f32 %v7222_v3, %v8469_v1  ;;  %v1885_v4 = vadd.f32 %v7254_v62, %v7273_v31  ;;  %v3760_v58 = vmax.f32 %v3758_v40, %v3759_v22 }
 0x1da   : > { %v4111_v50 = vrot.slane %v4110_v54, 1  ;;  %v1700_v20 = vmul.f32 %v7233_v25, %v1235_v42  ;;  %vm3037_vm15 = vcmp.gt.f32.partialorder %v2717_v26, 0.5  ;;  %v3753_v39 = vmax.f32 %v3751_v2, %v3752_v29  ;;  %v2710_v26 = vpop.permute.xlu0 %2709 }
 0x1db   : > { %v4102_v61 = vrot.slane %v4101_v16, 2  ;;  %v1699_v24 = vmul.f32 %v7233_v25, %v1230_v55  ;;  %v2013_v27 = vmax.f32 %v1885_v4, 0.0  ;;  %v3761_v56 = vrot.slane %v3760_v58, 1  ;;  %v7357_v55 = vpop.f32.mrb[60].mxu1 }
 0x1dc   : > { %v7349_v7 = vmul.f32 %v7233_v25, %v1490_v52  ;;  %v1835_v51 = vadd.f32 %v7254_v62, %v1700_v20  ;;  %v1884_v59 = vadd.f32 %v7254_v62, %v1749_v47  ;;  %v3754_v12 = vrot.slane %v3753_v39, 1  ;;  %v7361_v48 = vpop.f32.mrb[61].mxu1 }
 0x1dd   : > { %v4103_v31 = vmax.f32 %v4101_v16, %v4102_v61  ;;  %v1834_v40 = vadd.f32 %v7254_v62, %v1699_v24  ;;  %v3421_v22 = vsel %vm3037_vm15, -3e+38, %v2013_v27  ;;  %v7354_v2 = vmax.f32 %v4110_v54, %v4111_v50  ;;  %v5629_v50 = vld [vmem:[%s5708_s8 + $0x48] sm:$0xff] }
 0x1de   : > { %v1963_v42 = vmax.f32 %v1835_v51, 0.0  ;;  %v4120_v29 = vsel %vm3454_vm1, %v3421_v22, -inf  ;;  %v2012_v1 = vmax.f32 %v1884_v59, 0.0  ;;  %v7359_v52 = vmax.f32 %v3760_v58, %v3761_v56 }
 0x1df   : > { %8470 = vst [vmem:[#allocation25_spill] sm:$0xff] %v7354_v2  ;;  %v4104_v4 = vrot.slane %v4103_v31, 1  ;;  %v1962_v20 = vmax.f32 %v1834_v40, 0.0  ;;  %v4121_v47 = vrot.slane %v4120_v29, 4  ;;  %vm3036_vm0 = vcmp.gt.f32.partialorder %v2710_v26, 0.5 }
 0x1e0   : > { %v3371_v16 = vsel %vm2987_vm13, -3e+38, %v1963_v42  ;;  %v1505_v54 = vadd.f32 %v7222_v3, %v6850_v8  ;;  %v4379_v61 = vsel %vm4351_vm6, %v5629_v50, inf  ;;  %v7369_v24 = vmax.f32 %v3753_v39, %v3754_v12  ;;  %v8472_v8 = vld [vmem:[#allocation27_spill] sm:$0xff] }
 0x1e1   : > { %v3770_v58 = vsel %vm3454_vm1, %v3371_v16, -inf  ;;  %v3370_v27 = vsel %vm2986_vm14, -3e+38, %v1962_v20  ;;  %v4122_v56 = vmax.f32 %v4120_v29, %v4121_v47  ;;  %4380 = vmin.xlane.f32.xlu0 %v4379_v61  ;;  %v7374_v51 = vmax.f32 %v4103_v31, %v4104_v4  ;;  %v5630_v20 = vld [vmem:[%s5708_s8 + $0x50] sm:$0xff] }
 0x1e2   : > { %v3771_v34 = vrot.slane %v3770_v58, 4  ;;  %v3763_v59 = vsel %vm3454_vm1, %v3370_v27, -inf  ;;  %v3420_v40 = vsel %vm3036_vm0, -3e+38, %v2012_v1  ;;  %vm2989_vm2 = vcmp.gt.f32.partialorder %v8472_v8, 0.5  ;;  %v2731_v1 = vpop.permute.xlu1 %2730 }
 0x1e3   : > { %8471 = vst [vmem:[#allocation26_spill] sm:$0xff] %v7374_v51  ;;  %v3764_v22 = vrot.slane %v3763_v59, 4  ;;  %v4123_v26 = vrot.slane %v4122_v56, 2  ;;  %v4113_v39 = vsel %vm3454_vm1, %v3420_v40, -inf  ;;  %v7380_v12 = vmul.f32 %v7233_v25, %v1505_v54  ;;  %v2724_v40 = vpop.permute.xlu0 %2723 }
 0x1e4   : > { %vm2988_vm3 = vcmp.gt.f32.partialorder %v8473_v23, 0.5  ;;  %v3772_v42 = vmax.f32 %v3770_v58, %v3771_v34  ;;  %v4114_v29 = vrot.slane %v4113_v39, 4  ;;  %v4382_v31 = vsel %vm4351_vm6, %v5630_v20, inf }
 0x1e5   : > { %v1245_v4 = vadd.f32 %v7222_v3, %v6869_v19  ;;  %v3765_v47 = vmax.f32 %v3763_v59, %v3764_v22  ;;  %v7387_v16 = vmax.f32 %v4122_v56, %v4123_v26  ;;  %v1500_v50 = vadd.f32 %v7222_v3, %v6853_v5  ;;  %4383 = vmin.xlane.f32.xlu1 %v4382_v31 }
 0x1e6   : > { %v1240_v54 = vadd.f32 %v7222_v3, %v6871_v44  ;;  %v3773_v61 = vrot.slane %v3772_v42, 2  ;;  %v4115_v58 = vmax.f32 %v4113_v39, %v4114_v29  ;;  %v1887_v34 = vadd.f32 %v7254_v62, %v7338_v10 }
 0x1e7   : > { %8474 = vst [vmem:[#allocation78_spill] sm:$0xff] %v7387_v16  ;;  %v1702_v27 = vmul.f32 %v7233_v25, %v1245_v4  ;;  %v3766_v19 = vrot.slane %v3765_v47, 2  ;;  %vm3039_vm4 = vcmp.gt.f32.partialorder %v2731_v1, 0.5  ;;  %v1886_v29 = vadd.f32 %v7254_v62, %v7349_v7  ;;  %v5633_v16 = vld [vmem:[%s5708_s8 + $0x68] sm:$0xff] }
 0x1e8   : > { %v1701_v56 = vmul.f32 %v7233_v25, %v1240_v54  ;;  %v7398_v22 = vmax.f32 %v3772_v42, %v3773_v61  ;;  %v4116_v5 = vrot.slane %v4115_v58, 2  ;;  %v2015_v44 = vmax.f32 %v1887_v34, 0.0  ;;  %v7410_v34 = vpop.f32.mrb[62].mxu1 }
 0x1e9   : > { %v1837_v26 = vadd.f32 %v7254_v62, %v1702_v27  ;;  %v3767_v20 = vmax.f32 %v3765_v47, %v3766_v19  ;;  %vm3038_vm5 = vcmp.gt.f32.partialorder %v2724_v40, 0.5  ;;  %v2014_v61 = vmax.f32 %v1886_v29, 0.0  ;;  %v8478_v40 = vld [vmem:[#allocation30_spill] sm:$0xff] }
 0x1ea   : > { %v1836_v39 = vadd.f32 %v7254_v62, %v1701_v56  ;;  %v4117_v31 = vmax.f32 %v4115_v58, %v4116_v5  ;;  %v3423_v59 = vsel %vm3039_vm4, -3e+38, %v2015_v44  ;;  %v1515_v7 = vadd.f32 %v7222_v3, %v6891_v38  ;;  %v7417_v5 = vpop.f32.mrb[63].mxu1 }
 0x1eb   : > { %v1965_v4 = vmax.f32 %v1837_v26, 0.0  ;;  %v3768_v54 = vrot.slane %v3767_v20, 1  ;;  %v4134_v42 = vsel %vm3454_vm1, %v3423_v59, -inf  ;;  %v1753_v58 = vmul.f32 %v7233_v25, %v1500_v50 }
 0x1ec   : > { %v1964_v1 = vmax.f32 %v1836_v39, 0.0  ;;  %v4118_v2 = vrot.slane %v4117_v31, 1  ;;  %v4135_v27 = vrot.slane %v4134_v42, 4  ;;  %v3422_v59 = vsel %vm3038_vm5, -3e+38, %v2014_v61 }
 0x1ed   : > { %v3373_v47 = vsel %vm2989_vm2, -3e+38, %v1965_v4  ;;  %v7419_v8 = vmax.f32 %v3767_v20, %v3768_v54  ;;  %v4127_v50 = vsel %vm3454_vm1, %v3422_v59, -inf  ;;  %v5631_v4 = vld [vmem:[%s5708_s8 + $0x58] sm:$0xff]  ;;  %vm2990_vm8 = vcmp.gt.f32.partialorder %v8478_v40, 0.5 }
 0x1ee   : > { %v3784_v19 = vsel %vm3454_vm1, %v3373_v47, -inf  ;;  %v3372_v56 = vsel %vm2988_vm3, -3e+38, %v1964_v1  ;;  %v4136_v38 = vmax.f32 %v4134_v42, %v4135_v27  ;;  %v7422_v39 = vmax.f32 %v4117_v31, %v4118_v2  ;;  %v8477_v1 = vld [vmem:[#allocation29_spill] sm:$0xff]  ;;  %v2745_v31 = vpop.permute.xlu1 %2744  ;;  %v5632_v47 = vld [vmem:[%s5708_s8 + $0x60] sm:$0xff] }
 0x1ef   : > { %8475 = vst [vmem:[#allocation27_spill] sm:$0xff] %v7419_v8  ;;  %v3785_v26 = vrot.slane %v3784_v19, 4  ;;  %v3777_v44 = vsel %vm3454_vm1, %v3372_v56, -inf  ;;  %v4385_v23 = vsel %vm4351_vm6, %v5631_v4, inf  ;;  %vm2991_vm7 = vcmp.gt.f32.partialorder %v8477_v1, 0.5 }
 0x1f0   : > { %8476 = vst [vmem:[#allocation28_spill] sm:$0xff] %v7422_v39  ;;  %v3778_v29 = vrot.slane %v3777_v44, 4  ;;  %v4137_v61 = vrot.slane %v4136_v38, 2  ;;  %v4128_v20 = vrot.slane %v4127_v50, 4  ;;  %v7430_v54 = vmul.f32 %v7233_v25, %v1515_v7  ;;  %4386 = vmin.xlane.f32.xlu0 %v4385_v23 }
 0x1f1   : > { %v1510_v2 = vadd.f32 %v7222_v3, %v6902_v43  ;;  %v4388_v27 = vsel %vm4351_vm6, %v5632_v47, inf  ;;  %v1255_v56 = vadd.f32 %v7222_v3, %v6913_v11  ;;  %v1250_v59 = vadd.f32 %v7222_v3, %v6919_v46  ;;  %v2738_v43 = vpop.permute.xlu0 %2737 }
 0x1f2   : > { %v3779_v42 = vmax.f32 %v3777_v44, %v3778_v29  ;;  %v7440_v4 = vmax.f32 %v3784_v19, %v3785_v26  ;;  %v4138_v10 = vmax.f32 %v4136_v38, %v4137_v61  ;;  %v4129_v7 = vmax.f32 %v4127_v50, %v4128_v20  ;;  %4389 = vmin.xlane.f32.xlu1 %v4388_v27 }
 0x1f3   : > { %v1889_v23 = vadd.f32 %v7254_v62, %v7380_v12  ;;  %v7445_v44 = vmul.f32 %v7233_v25, %v1510_v2  ;;  %v1704_v29 = vmul.f32 %v7233_v25, %v1255_v56  ;;  %v1703_v47 = vmul.f32 %v7233_v25, %v1250_v59  ;;  %v8479_v59 = vld [vmem:[#allocation10_spill] sm:$0xff] }
 0x1f4   : > { %vm3041_vm10 = vcmp.gt.f32.partialorder %v2745_v31, 0.5  ;;  %v4139_v11 = vrot.slane %v4138_v10, 1  ;;  %v4130_v39 = vrot.slane %v4129_v7, 2  ;;  %v1888_v19 = vadd.f32 %v7254_v62, %v1753_v58 }
 0x1f5   : > { %v2017_v46 = vmax.f32 %v1889_v23, 0.0  ;;  %v3780_v26 = vrot.slane %v3779_v42, 2  ;;  %v1839_v38 = vadd.f32 %v7254_v62, %v1704_v29  ;;  %v1838_v12 = vadd.f32 %v7254_v62, %v1703_v47 }
 0x1f6   : > { %vm3040_vm11 = vcmp.gt.f32.partialorder %v2738_v43, 0.5  ;;  %v4140_v50 = vmax.f32 %v4138_v10, %v4139_v11  ;;  %v4131_v61 = vmax.f32 %v4129_v7, %v4130_v39  ;;  %v2016_v2 = vmax.f32 %v1888_v19, 0.0  ;;  %v8480_v19 = vld [vmem:[#allocation31_spill] sm:$0xff] }
 0x1f7   : > { %v3425_v20 = vsel %vm3041_vm10, -3e+38, %v2017_v46  ;;  %v1967_v27 = vmax.f32 %v1839_v38, 0.0  ;;  %v1966_v56 = vmax.f32 %v1838_v12, 0.0  ;;  %v1525_v23 = vadd.f32 %v7222_v3, %v8479_v59  ;;  %v5634_v12 = vld [vmem:[%s5708_s8 + $0x70] sm:$0xff] }
 0x1f8   : > { %v4148_v31 = vsel %vm3454_vm1, %v3425_v20, -inf  ;;  %v4132_v51 = vrot.slane %v4131_v61, 1  ;;  %v3424_v17 = vsel %vm3040_vm11, -3e+38, %v2016_v2  ;;  %v4391_v29 = vsel %vm4351_vm6, %v5633_v16, inf  ;;  %v8481_v20 = vld [vmem:[#allocation32_spill] sm:$0xff] }
 0x1f9   : > { %v4149_v58 = vrot.slane %v4148_v31, 4  ;;  %v7457_v8 = vmax.f32 %v3779_v42, %v3780_v26  ;;  %v3375_v10 = vsel %vm2991_vm7, -3e+38, %v1967_v27  ;;  %v3374_v39 = vsel %vm2990_vm8, -3e+38, %v1966_v56  ;;  %4392 = vmin.xlane.f32.xlu0 %v4391_v29 }
 0x1fa   : > { %v4141_v7 = vsel %vm3454_vm1, %v3424_v17, -inf  ;;  %v4133_v43 = vmax.f32 %v4131_v61, %v4132_v51  ;;  %v3798_v47 = vsel %vm3454_vm1, %v3375_v10, -inf  ;;  %v3791_v11 = vsel %vm3454_vm1, %v3374_v39, -inf  ;;  %v2759_v61 = vpop.permute.xlu1 %2758 }
 0x1fb   : > { %v4150_v46 = vmax.f32 %v4148_v31, %v4149_v58  ;;  %vm2993_vm13 = vcmp.gt.f32.partialorder %v8480_v19, 0.5  ;;  %v3799_v16 = vrot.slane %v3798_v47, 4  ;;  %v3792_v42 = vrot.slane %v3791_v11, 4 }
 0x1fc   : > { %v4142_v26 = vrot.slane %v4141_v7, 4  ;;  %v7468_v1 = vmul.f32 %v7233_v25, %v1525_v23  ;;  %v4667_v40 = vsel %vm4576_vm9, %v4140_v50, %v4133_v43  ;;  %v4394_v17 = vsel %vm4351_vm6, %v5634_v12, inf }
 0x1fd   : > { %v4151_v38 = vrot.slane %v4150_v46, 2  ;;  %v1265_v51 = vadd.f32 %v7222_v3, %v6956_v57  ;;  %vm2992_vm14 = vcmp.gt.f32.partialorder %v8481_v20, 0.5  ;;  %v3800_v2 = vmax.f32 %v3798_v47, %v3799_v16  ;;  %4395 = vmin.xlane.f32.xlu1 %v4394_v17 }
 0x1fe   : > { %v3793_v27 = vmax.f32 %v3791_v11, %v3792_v42  ;;  %v4143_v56 = vmax.f32 %v4141_v7, %v4142_v26  ;;  %v1520_v31 = vadd.f32 %v7222_v3, %v6937_v60  ;;  %v1260_v23 = vadd.f32 %v7222_v3, %v6960_v35 }
 0x1ff   : > { %v4152_v59 = vmax.f32 %v4150_v46, %v4151_v38  ;;  %v1706_v50 = vmul.f32 %v7233_v25, %v1265_v51  ;;  %v1891_v58 = vadd.f32 %v7254_v62, %v7430_v54  ;;  %v3801_v57 = vrot.slane %v3800_v2, 2 }
 0x200   : > { %v3794_v29 = vrot.slane %v3793_v27, 2  ;;  %v4144_v10 = vrot.slane %v4143_v56, 2  ;;  %vm3043_vm15 = vcmp.gt.f32.partialorder %v2759_v61, 0.5  ;;  %v1705_v43 = vmul.f32 %v7233_v25, %v1260_v23  ;;  %v2752_v61 = vpop.permute.xlu0 %2751 }
 0x201   : > { %v4153_v39 = vrot.slane %v4152_v59, 1  ;;  %v1841_v7 = vadd.f32 %v7254_v62, %v1706_v50  ;;  %v2019_v60 = vmax.f32 %v1891_v58, 0.0  ;;  %v3802_v47 = vmax.f32 %v3800_v2, %v3801_v57 }
 0x202   : > { %v3795_v11 = vmax.f32 %v3793_v27, %v3794_v29  ;;  %v4145_v46 = vmax.f32 %v4143_v56, %v4144_v10  ;;  %v1890_v16 = vadd.f32 %v7254_v62, %v7445_v44  ;;  %v7488_v35 = vmul.f32 %v7233_v25, %v1520_v31 }
 0x203   : > { %v1969_v54 = vmax.f32 %v1841_v7, 0.0  ;;  %v1840_v42 = vadd.f32 %v7254_v62, %v1705_v43  ;;  %v3427_v26 = vsel %vm3043_vm15, -3e+38, %v2019_v60  ;;  %v3803_v38 = vrot.slane %v3802_v47, 1 }
 0x204   : > { %v7491_v12 = vmax.f32 %v4152_v59, %v4153_v39  ;;  %v4146_v17 = vrot.slane %v4145_v46, 1  ;;  %v4162_v51 = vsel %vm3454_vm1, %v3427_v26, -inf  ;;  %v2018_v44 = vmax.f32 %v1890_v16, 0.0  ;;  %v8484_v16 = vld [vmem:[#allocation33_spill] sm:$0xff] }
 0x205   : > { %v3377_v2 = vsel %vm2993_vm13, -3e+38, %v1969_v54  ;;  %v1968_v27 = vmax.f32 %v1840_v42, 0.0  ;;  %v4163_v56 = vrot.slane %v4162_v51, 4  ;;  %v7496_v50 = vmax.f32 %v3802_v47, %v3803_v38  ;;  %v5635_v42 = vld [vmem:[%s5708_s8 + $0x78] sm:$0xff]  ;;  %v8485_v38 = vld [vmem:[#allocation34_spill] sm:$0xff] }
 0x206   : > { %8482 = vst [vmem:[#allocation29_spill] sm:$0xff] %v7491_v12  ;;  %v3796_v31 = vrot.slane %v3795_v11, 1  ;;  %v4147_v23 = vmax.f32 %v4145_v46, %v4146_v17  ;;  %v3812_v58 = vsel %vm3454_vm1, %v3377_v2, -inf  ;;  %vm3042_vm0 = vcmp.gt.f32.partialorder %v2752_v61, 0.5 }
 0x207   : > { %v3813_v57 = vrot.slane %v3812_v58, 4  ;;  %v3376_v59 = vsel %vm2992_vm14, -3e+38, %v1968_v27  ;;  %v4164_v29 = vmax.f32 %v4162_v51, %v4163_v56  ;;  %v3426_v39 = vsel %vm3042_vm0, -3e+38, %v2018_v44 }
 0x208   : > { %v7502_v10 = vsel %vm4578_vm12, %v4147_v23, %v4667_v40  ;;  %v3805_v19 = vsel %vm3454_vm1, %v3376_v59, -inf  ;;  %v1535_v7 = vadd.f32 %v7222_v3, %v6986_v49  ;;  %v4155_v46 = vsel %vm3454_vm1, %v3426_v39, -inf }
 0x209   : > { %8483 = vst [vmem:[#allocation30_spill] sm:$0xff] %v7502_v10  ;;  %v3814_v43 = vmax.f32 %v3812_v58, %v3813_v57  ;;  %v3806_v60 = vrot.slane %v3805_v19, 4  ;;  %v4165_v47 = vrot.slane %v4164_v29, 2  ;;  %vm2995_vm2 = vcmp.gt.f32.partialorder %v8484_v16, 0.5 }
 0x20a   : > { %v7509_v20 = vmax.f32 %v3795_v11, %v3796_v31  ;;  %v4156_v54 = vrot.slane %v4155_v46, 4  ;;  %v4397_v40 = vsel %vm4351_vm6, %v5635_v42, inf  ;;  %v1530_v26 = vadd.f32 %v7222_v3, %v7004_v13  ;;  %v2766_v42 = vpop.permute.xlu0 %2765 }
 0x20b   : > { %vm2994_vm3 = vcmp.gt.f32.partialorder %v8485_v38, 0.5  ;;  %v3815_v17 = vrot.slane %v3814_v43, 2  ;;  %v3807_v49 = vmax.f32 %v3805_v19, %v3806_v60  ;;  %v4166_v51 = vmax.f32 %v4164_v29, %v4165_v47  ;;  %4398 = vmin.xlane.f32.xlu0 %v4397_v40  ;;  %v2773_v29 = vpop.permute.xlu1 %2772 }
 0x20c   : > { %v1275_v61 = vadd.f32 %v7222_v3, %v7011_v0  ;;  %v4157_v2 = vmax.f32 %v4155_v46, %v4156_v54  ;;  %v7519_v11 = vmul.f32 %v7233_v25, %v1535_v7  ;;  %v1545_v27 = vadd.f32 %v7222_v3, %v7013_v45 }
 0x20d   : > { %v1270_v56 = vadd.f32 %v7222_v3, %v7021_v63  ;;  %v3816_v13 = vmax.f32 %v3814_v43, %v3815_v17  ;;  %v3808_v44 = vrot.slane %v3807_v49, 2  ;;  %v4167_v31 = vrot.slane %v4166_v51, 1 }
 0x20e   : > { %v1708_v23 = vmul.f32 %v7233_v25, %v1275_v61  ;;  %v4158_v58 = vrot.slane %v4157_v2, 2  ;;  %v7527_v57 = vmul.f32 %v7233_v25, %v1530_v26  ;;  %v1540_v59 = vadd.f32 %v7222_v3, %v7023_v18 }
 0x20f   : > { %v1707_v0 = vmul.f32 %v7233_v25, %v1270_v56  ;;  %v3817_v19 = vrot.slane %v3816_v13, 1  ;;  %v3809_v45 = vmax.f32 %v3807_v49, %v3808_v44  ;;  %v7534_v63 = vmul.f32 %v7233_v25, %v1545_v27 }
 0x210   : > { %v1843_v39 = vadd.f32 %v7254_v62, %v1708_v23  ;;  %v7536_v7 = vmax.f32 %v4166_v51, %v4167_v31  ;;  %v4159_v43 = vmax.f32 %v4157_v2, %v4158_v58  ;;  %v1893_v47 = vadd.f32 %v7254_v62, %v7468_v1  ;;  %v8487_v58 = vld [vmem:[#allocation35_spill] sm:$0xff] }
 0x211   : > { %v1842_v60 = vadd.f32 %v7254_v62, %v1707_v0  ;;  %v3810_v46 = vrot.slane %v3809_v45, 1  ;;  %v7542_v18 = vmul.f32 %v7233_v25, %v1540_v59  ;;  %vm3045_vm6 = vcmp.gt.f32.partialorder %v2773_v29, 0.5 }
 0x212   : > { %8486 = vst [vmem:[#allocation10_spill] sm:$0xff] %v7536_v7  ;;  %v1971_v54 = vmax.f32 %v1843_v39, 0.0  ;;  %v4160_v40 = vrot.slane %v4159_v43, 1  ;;  %v2021_v17 = vmax.f32 %v1893_v47, 0.0  ;;  %v1892_v49 = vadd.f32 %v7254_v62, %v7488_v35  ;;  %v8490_v39 = vld [vmem:[#allocation88_spill] sm:$0xff] }
 0x213   : > { %v1970_v26 = vmax.f32 %v1842_v60, 0.0  ;;  %v7546_v51 = vmax.f32 %v3816_v13, %v3817_v19  ;;  %v7548_v61 = vmax.f32 %v3809_v45, %v3810_v46  ;;  %v1555_v2 = vadd.f32 %v7222_v3, %v7046_v53  ;;  %v8489_v53 = vld [vmem:[#allocation87_spill] sm:$0xff] }
 0x214   : > { %v3379_v1 = vsel %vm2995_vm2, -3e+38, %v1971_v54  ;;  %v3429_v44 = vsel %vm3045_vm6, -3e+38, %v2021_v17  ;;  %vm3044_vm4 = vcmp.gt.f32.partialorder %v2766_v42, 0.5  ;;  %v2020_v23 = vmax.f32 %v1892_v49, 0.0 }
 0x215   : > { %v3826_v27 = vsel %vm3454_vm1, %v3379_v1, -inf  ;;  %v3378_v56 = vsel %vm2994_vm3, -3e+38, %v1970_v26  ;;  %v4176_v13 = vsel %vm3454_vm1, %v3429_v44, -inf  ;;  %vm2997_vm5 = vcmp.gt.f32.partialorder %v8487_v58, 0.5  ;;  %v8491_v42 = vld [vmem:[#allocation89_spill] sm:$0xff] }
 0x216   : > { %v3827_v31 = vrot.slane %v3826_v27, 4  ;;  %v3819_v35 = vsel %vm3454_vm1, %v3378_v56, -inf  ;;  %v7560_v16 = vmax.f32 %v4159_v43, %v4160_v40  ;;  %v4177_v59 = vrot.slane %v4176_v13, 4  ;;  %v8492_v40 = vld [vmem:[#allocation36_spill] sm:$0xff]  ;;  %v8493_v56 = vld [vmem:[#allocation15_spill] sm:$0xff] }
 0x217   : > { %v3820_v0 = vrot.slane %v3819_v35, 4  ;;  %v1550_v29 = vadd.f32 %v7222_v3, %v8489_v53  ;;  %v3428_v38 = vsel %vm3044_vm4, -3e+38, %v2020_v23  ;;  %v7565_v45 = vmul.f32 %v7233_v25, %v1555_v2 }
 0x218   : > { %8488 = vst [vmem:[#allocation31_spill] sm:$0xff] %v7560_v16  ;;  %v3828_v19 = vmax.f32 %v3826_v27, %v3827_v31  ;;  %v1285_v60 = vadd.f32 %v7222_v3, %v8490_v39  ;;  %v4178_v46 = vmax.f32 %v4176_v13, %v4177_v59  ;;  %v4169_v54 = vsel %vm3454_vm1, %v3428_v38, -inf  ;;  %v8494_v31 = vld [vmem:[#allocation16_spill] sm:$0xff]  ;;  %v2787_v59 = vpop.permute.xlu1 %2786 }
 0x219   : > { %v3821_v47 = vmax.f32 %v3819_v35, %v3820_v0  ;;  %v1565_v43 = vadd.f32 %v7222_v3, %v8491_v42  ;;  %vm2996_vm7 = vcmp.gt.f32.partialorder %v8492_v40, 0.5  ;;  %v4170_v17 = vrot.slane %v4169_v54, 4 }
 0x21a   : > { %v3829_v26 = vrot.slane %v3828_v19, 2  ;;  %v7574_v49 = vmul.f32 %v7233_v25, %v1550_v29  ;;  %v1710_v1 = vmul.f32 %v7233_v25, %v1285_v60  ;;  %v4179_v27 = vrot.slane %v4178_v46, 2 }
 0x21b   : > { %v3822_v2 = vrot.slane %v3821_v47, 2  ;;  %v1280_v44 = vadd.f32 %v7222_v3, %v8493_v56  ;;  %v1560_v35 = vadd.f32 %v7222_v3, %v8494_v31  ;;  %v4171_v23 = vmax.f32 %v4169_v54, %v4170_v17 }
 0x21c   : > { %v7581_v13 = vmax.f32 %v3828_v19, %v3829_v26  ;;  %v1845_v0 = vadd.f32 %v7254_v62, %v1710_v1  ;;  %v1895_v53 = vadd.f32 %v7254_v62, %v7519_v11  ;;  %v7586_v38 = vmax.f32 %v4178_v46, %v4179_v27 }
 0x21d   : > { %v3823_v29 = vmax.f32 %v3821_v47, %v3822_v2  ;;  %v7589_v39 = vmul.f32 %v7233_v25, %v1565_v43  ;;  %v1709_v60 = vmul.f32 %v7233_v25, %v1280_v44  ;;  %v4172_v42 = vrot.slane %v4171_v23, 2  ;;  %v2780_v43 = vpop.permute.xlu0 %2779 }
 0x21e   : > { %8495 = vst [vmem:[#allocation32_spill] sm:$0xff] %v7586_v38  ;;  %v1973_v56 = vmax.f32 %v1845_v0, 0.0  ;;  %v7593_v19 = vmul.f32 %v7233_v25, %v1560_v35  ;;  %v2023_v54 = vmax.f32 %v1895_v53, 0.0  ;;  %vm3047_vm8 = vcmp.gt.f32.partialorder %v2787_v59, 0.5 }
 0x21f   : > { %v3824_v17 = vrot.slane %v3823_v29, 1  ;;  %v1844_v1 = vadd.f32 %v7254_v62, %v1709_v60  ;;  %v4173_v11 = vmax.f32 %v4171_v23, %v4172_v42  ;;  %v1894_v2 = vadd.f32 %v7254_v62, %v7527_v57 }
 0x220   : > { %v3381_v47 = vsel %vm2997_vm5, -3e+38, %v1973_v56  ;;  %v3431_v46 = vsel %vm3047_vm8, -3e+38, %v2023_v54  ;;  %vm3046_vm10 = vcmp.gt.f32.partialorder %v2780_v43, 0.5  ;;  %v1575_v57 = vadd.f32 %v7222_v3, %v7096_v33  ;;  %v8498_v43 = vld [vmem:[#allocation40_spill] sm:$0xff] }
 0x221   : > { %v3840_v44 = vsel %vm3454_vm1, %v3381_v47, -inf  ;;  %v1972_v31 = vmax.f32 %v1844_v1, 0.0  ;;  %v4190_v35 = vsel %vm3454_vm1, %v3431_v46, -inf  ;;  %v4174_v0 = vrot.slane %v4173_v11, 1  ;;  %v8497_v47 = vld [vmem:[#allocation38_spill] sm:$0xff] }
 0x222   : > { %v3841_v53 = vrot.slane %v3840_v44, 4  ;;  %v4191_v60 = vrot.slane %v4190_v35, 4  ;;  %v2022_v59 = vmax.f32 %v1894_v2, 0.0  ;;  %v7604_v23 = vmax.f32 %v3823_v29, %v3824_v17  ;;  %v8499_v2 = vld [vmem:[#allocation59_spill] sm:$0xff] }
 0x223   : > { %v3380_v58 = vsel %vm2996_vm7, -3e+38, %v1972_v31  ;;  %v7610_v42 = vmax.f32 %v4173_v11, %v4174_v0  ;;  %v1570_v1 = vadd.f32 %v7222_v3, %v7098_v36  ;;  %vm2999_vm11 = vcmp.gt.f32.partialorder %v8497_v47, 0.5 }
 0x224   : > { %v3833_v56 = vsel %vm3454_vm1, %v3380_v58, -inf  ;;  %v4192_v54 = vmax.f32 %v4190_v35, %v4191_v60  ;;  %v7616_v46 = vmax.f32 %v3840_v44, %v3841_v53  ;;  %v3430_v17 = vsel %vm3046_vm10, -3e+38, %v2022_v59  ;;  %v8500_v35 = vld [vmem:[#allocation60_spill] sm:$0xff]  ;;  %v8501_v44 = vld [vmem:[#allocation17_spill] sm:$0xff] }
 0x225   : > { %8496 = vst [vmem:[#allocation33_spill] sm:$0xff] %v7610_v42  ;;  %v3834_v29 = vrot.slane %v3833_v56, 4  ;;  %v7619_v40 = vmul.f32 %v7233_v25, %v1575_v57  ;;  %vm2998_vm13 = vcmp.gt.f32.partialorder %v8498_v43, 0.5  ;;  %v4183_v11 = vsel %vm3454_vm1, %v3430_v17, -inf  ;;  %v8502_v59 = vld [vmem:[#allocation92_spill] sm:$0xff]  ;;  %v2801_v57 = vpop.permute.xlu1 %2800 }
 0x226   : > { %v4193_v33 = vrot.slane %v4192_v54, 2  ;;  %v1295_v31 = vadd.f32 %v7222_v3, %v8499_v2  ;;  %v1585_v36 = vadd.f32 %v7222_v3, %v8500_v35  ;;  %v4184_v60 = vrot.slane %v4183_v11, 4 }
 0x227   : > { %v3835_v0 = vmax.f32 %v3833_v56, %v3834_v29  ;;  %v1290_v53 = vadd.f32 %v7222_v3, %v8501_v44  ;;  %v1580_v58 = vadd.f32 %v7222_v3, %v8502_v59  ;;  %v7632_v26 = vmul.f32 %v7233_v25, %v1570_v1  ;;  %v2794_v44 = vpop.permute.xlu0 %2793 }
 0x228   : > { %v4194_v27 = vmax.f32 %v4192_v54, %v4193_v33  ;;  %v1712_v17 = vmul.f32 %v7233_v25, %v1295_v31  ;;  %v1897_v2 = vadd.f32 %v7254_v62, %v7534_v63  ;;  %v4185_v35 = vmax.f32 %v4183_v11, %v4184_v60 }
 0x229   : > { %v3836_v42 = vrot.slane %v3835_v0, 2  ;;  %v7638_v56 = vmul.f32 %v7233_v25, %v1585_v36  ;;  %v1711_v29 = vmul.f32 %v7233_v25, %v1290_v53  ;;  %vm3049_vm14 = vcmp.gt.f32.partialorder %v2801_v57, 0.5 }
 0x22a   : > { %v4195_v7 = vrot.slane %v4194_v27, 1  ;;  %v1847_v59 = vadd.f32 %v7254_v62, %v1712_v17  ;;  %v2025_v54 = vmax.f32 %v1897_v2, 0.0  ;;  %v4186_v1 = vrot.slane %v4185_v35, 2 }
 0x22b   : > { %v1846_v33 = vadd.f32 %v7254_v62, %v1711_v29  ;;  %v7644_v31 = vmul.f32 %v7233_v25, %v1580_v58  ;;  %v1896_v63 = vadd.f32 %v7254_v62, %v7542_v18  ;;  %v7648_v11 = vmax.f32 %v3835_v0, %v3836_v42 }
 0x22c   : > { %v1975_v36 = vmax.f32 %v1847_v59, 0.0  ;;  %v3433_v60 = vsel %vm3049_vm14, -3e+38, %v2025_v54  ;;  %vm3048_vm15 = vcmp.gt.f32.partialorder %v2794_v44, 0.5  ;;  %v4187_v53 = vmax.f32 %v4185_v35, %v4186_v1 }
 0x22d   : > { %v1974_v16 = vmax.f32 %v1846_v33, 0.0  ;;  %v4204_v17 = vsel %vm3454_vm1, %v3433_v60, -inf  ;;  %v2024_v2 = vmax.f32 %v1896_v63, 0.0  ;;  %v4196_v57 = vmax.f32 %v4194_v27, %v4195_v7  ;;  %v8503_v27 = vld [vmem:[#allocation42_spill] sm:$0xff]  ;;  %v8504_v63 = vld [vmem:[#allocation47_spill] sm:$0xff] }
 0x22e   : > { %v3383_v29 = vsel %vm2999_vm11, -3e+38, %v1975_v36  ;;  %v4205_v12 = vrot.slane %v4204_v17, 4  ;;  %v1595_v25 = vadd.f32 %v7222_v3, %v7137_v21  ;;  %v4188_v58 = vrot.slane %v4187_v53, 1  ;;  %v7664_v21 = vld [vmem:[%s8211_s3] ss:$0 sm:$0xff] }
 0x22f   : > { %v3854_v62 = vsel %vm3454_vm1, %v3383_v29, -inf  ;;  %v3382_v18 = vsel %vm2998_vm13, -3e+38, %v1974_v16  ;;  %v3432_v42 = vsel %vm3048_vm15, -3e+38, %v2024_v2  ;;  %vm3001_vm0 = vcmp.gt.f32.partialorder %v8503_v27, 0.5 }
 0x230   : > { %v3855_v0 = vrot.slane %v3854_v62, 4  ;;  %v3847_v35 = vsel %vm3454_vm1, %v3382_v18, -inf  ;;  %v4206_v44 = vmax.f32 %v4204_v17, %v4205_v12  ;;  %v4197_v7 = vsel %vm3454_vm1, %v3432_v42, -inf  ;;  %v7671_v12 = vld [vmem:[%s8212_s4] ss:$0 sm:$0xff] }
 0x231   : > { %v4189_v47 = vmax.f32 %v4187_v53, %v4188_v58  ;;  %v3848_v59 = vrot.slane %v3847_v35, 4  ;;  %v4198_v54 = vrot.slane %v4197_v7, 4  ;;  %v1590_v3 = vadd.f32 %v7664_v21, %v7144_v32 }
 0x232   : > { %v3856_v16 = vmax.f32 %v3854_v62, %v3855_v0  ;;  %v4207_v43 = vrot.slane %v4206_v44, 2  ;;  %v7674_v1 = vmul.f32 %v7671_v12, %v1595_v25  ;;  %v1305_v33 = vadd.f32 %v7664_v21, %v7152_v15 }
 0x233   : > { %vm3000_vm2 = vcmp.gt.f32.partialorder %v8504_v63, 0.5  ;;  %v4674_v36 = vsel %vm4576_vm9, %v4196_v57, %v4189_v47  ;;  %v3849_v60 = vmax.f32 %v3847_v35, %v3848_v59  ;;  %v4199_v53 = vmax.f32 %v4197_v7, %v4198_v54 }
 0x234   : > { %v1605_v32 = vadd.f32 %v7664_v21, %v7156_v9  ;;  %v3857_v17 = vrot.slane %v3856_v16, 2  ;;  %v4208_v2 = vmax.f32 %v4206_v44, %v4207_v43  ;;  %v1714_v29 = vmul.f32 %v7671_v12, %v1305_v33  ;;  %v7693_v9 = vld [vmem:[%s8213_s5] ss:$0 sm:$0xff] }
 0x235   : > { %v1300_v25 = vadd.f32 %v7664_v21, %v7165_v6  ;;  %v3850_v58 = vrot.slane %v3849_v60, 2  ;;  %v4200_v62 = vrot.slane %v4199_v53, 2  ;;  %v7686_v15 = vmul.f32 %v7671_v12, %v1590_v3  ;;  %v2815_v6 = vpop.permute.xlu1 %2814 }
 0x236   : > { %v1600_v57 = vadd.f32 %v7664_v21, %v7169_v37  ;;  %v3858_v18 = vmax.f32 %v3856_v16, %v3857_v17  ;;  %v4209_v42 = vrot.slane %v4208_v2, 1  ;;  %v1849_v0 = vadd.f32 %v7693_v9, %v1714_v29  ;;  %v2808_v29 = vpop.permute.xlu0 %2807 }
 0x237   : > { %v1713_v35 = vmul.f32 %v7671_v12, %v1300_v25  ;;  %v3851_v44 = vmax.f32 %v3849_v60, %v3850_v58  ;;  %v4201_v7 = vmax.f32 %v4199_v53, %v4200_v62  ;;  %v7698_v47 = vmul.f32 %v7671_v12, %v1605_v32 }
 0x238   : > { %v1899_v37 = vadd.f32 %v7693_v9, %v7565_v45  ;;  %v3859_v59 = vrot.slane %v3858_v18, 1  ;;  %v1977_v54 = vmax.f32 %v1849_v0, 0.0  ;;  %v7704_v16 = vmul.f32 %v7671_v12, %v1600_v57 }
 0x239   : > { %v1848_v3 = vadd.f32 %v7693_v9, %v1713_v35  ;;  %v7706_v43 = vmax.f32 %v4208_v2, %v4209_v42  ;;  %v4202_v33 = vrot.slane %v4201_v7, 1  ;;  %vm3051_vm3 = vcmp.gt.f32.partialorder %v2815_v6, 0.5 }
 0x23a   : > { %v2027_v17 = vmax.f32 %v1899_v37, 0.0  ;;  %v3852_v60 = vrot.slane %v3851_v44, 1  ;;  %v3385_v53 = vsel %vm3001_vm0, -3e+38, %v1977_v54  ;;  %v1898_v45 = vadd.f32 %v7693_v9, %v7574_v49  ;;  %v8507_v49 = vld [vmem:[#allocation48_spill] sm:$0xff] }
 0x23b   : > { %8505 = vst [vmem:[#allocation34_spill] sm:$0xff] %v7706_v43  ;;  %v1976_v32 = vmax.f32 %v1848_v3, 0.0  ;;  %v7712_v25 = vmax.f32 %v3858_v18, %v3859_v59  ;;  %v4203_v58 = vmax.f32 %v4201_v7, %v4202_v33  ;;  %v3868_v62 = vsel %vm3454_vm1, %v3385_v53, -inf  ;;  %v8508_v54 = vld [vmem:[#allocation20_spill] sm:$0xff]  ;;  %v8509_v53 = vld [vmem:[#allocation98_spill] sm:$0xff] }
 0x23c   : > { %v3435_v57 = vsel %vm3051_vm3, -3e+38, %v2027_v17  ;;  %v3869_v2 = vrot.slane %v3868_v62, 4  ;;  %v2026_v35 = vmax.f32 %v1898_v45, 0.0  ;;  %vm3050_vm6 = vcmp.gt.f32.partialorder %v2808_v29, 0.5 }
 0x23d   : > { %v3384_v42 = vsel %vm3000_vm2, -3e+38, %v1976_v32  ;;  %v4218_v0 = vsel %vm3454_vm1, %v3435_v57, -inf  ;;  %v7719_v27 = vsel %vm4578_vm12, %v4203_v58, %v4674_v36  ;;  %vm3003_vm4 = vcmp.gt.f32.partialorder %v8507_v49, 0.5  ;;  %v8510_v32 = vld [vmem:[#allocation51_spill] sm:$0xff]  ;;  %v8511_v57 = vld [vmem:[#allocation68_spill] sm:$0xff] }
 0x23e   : > { %8506 = vst [vmem:[#allocation35_spill] sm:$0xff] %v7719_v27  ;;  %v3861_v6 = vsel %vm3454_vm1, %v3384_v42, -inf  ;;  %v4219_v37 = vrot.slane %v4218_v0, 4  ;;  %v3870_v18 = vmax.f32 %v3868_v62, %v3869_v2  ;;  %v3434_v59 = vsel %vm3050_vm6, -3e+38, %v2026_v35  ;;  %v2836_v2 = vpop.permute.xlu1 %2835  ;;  %v8517_v49 = vld [vmem:[#allocation54_spill] sm:$0xff] }
 0x23f   : > { %v3862_v7 = vrot.slane %v3861_v6, 4  ;;  %v1615_v3 = vadd.f32 %v7664_v21, %v8508_v54  ;;  %v7725_v63 = vmax.f32 %v3851_v44, %v3852_v60  ;;  %v4211_v17 = vsel %vm3454_vm1, %v3434_v59, -inf  ;;  %v8512_v60 = vld [vmem:[#allocation21_spill] sm:$0xff] }
 0x240   : > { %v4220_v33 = vmax.f32 %v4218_v0, %v4219_v37  ;;  %v1315_v36 = vadd.f32 %v7664_v21, %v8509_v53  ;;  %vm3002_vm5 = vcmp.gt.f32.partialorder %v8510_v32, 0.5  ;;  %v3871_v45 = vrot.slane %v3870_v18, 2 }
 0x241   : > { %v3863_v29 = vmax.f32 %v3861_v6, %v3862_v7  ;;  %v4212_v58 = vrot.slane %v4211_v17, 4  ;;  %v1610_v62 = vadd.f32 %v7664_v21, %v8511_v57  ;;  %v7734_v35 = vmul.f32 %v7671_v12, %v1615_v3 }
 0x242   : > { %v4221_v42 = vrot.slane %v4220_v33, 2  ;;  %v1716_v44 = vmul.f32 %v7671_v12, %v1315_v36  ;;  %v1310_v0 = vadd.f32 %v7664_v21, %v8512_v60  ;;  %v3872_v37 = vmax.f32 %v3870_v18, %v3871_v45 }
 0x243   : > { %v3864_v59 = vrot.slane %v3863_v29, 2  ;;  %v4213_v54 = vmax.f32 %v4211_v17, %v4212_v58  ;;  %v1902_v6 = vadd.f32 %v7693_v9, %v7632_v26  ;;  %vm3054_vm7 = vcmp.gt.f32.partialorder %v2836_v2, 0.5  ;;  %v2822_v58 = vpop.permute.xlu0 %2821 }
 0x244   : > { %v4222_v7 = vmax.f32 %v4220_v33, %v4221_v42  ;;  %v1851_v53 = vadd.f32 %v7693_v9, %v1716_v44  ;;  %v1715_v57 = vmul.f32 %v7671_v12, %v1310_v0  ;;  %v3873_v43 = vrot.slane %v3872_v37, 1 }
 0x245   : > { %v3865_v3 = vmax.f32 %v3863_v29, %v3864_v59  ;;  %v4214_v27 = vrot.slane %v4213_v54, 2  ;;  %v2030_v10 = vmax.f32 %v1902_v6, 0.0  ;;  %v1900_v18 = vadd.f32 %v7693_v9, %v7593_v19 }
 0x246   : > { %v4223_v36 = vrot.slane %v4222_v7, 1  ;;  %v1979_v38 = vmax.f32 %v1851_v53, 0.0  ;;  %v1850_v60 = vadd.f32 %v7693_v9, %v1715_v57  ;;  %v1775_v26 = vmul.f32 %v7671_v12, %v1610_v62  ;;  %v8518_v53 = vld [vmem:[#allocation37_spill] sm:$0xff] }
 0x247   : > { %v3866_v17 = vrot.slane %v3865_v3, 1  ;;  %v4215_v45 = vmax.f32 %v4213_v54, %v4214_v27  ;;  %v3438_v33 = vsel %vm3054_vm7, -3e+38, %v2030_v10  ;;  %v7747_v42 = vmax.f32 %v3872_v37, %v3873_v43  ;;  %v8516_v27 = vld [vmem:[#allocation53_spill] sm:$0xff] }
 0x248   : > { %v3387_v29 = vsel %vm3003_vm4, -3e+38, %v1979_v38  ;;  %v1978_v2 = vmax.f32 %v1850_v60, 0.0  ;;  %v4239_v44 = vsel %vm3454_vm1, %v3438_v33, -inf  ;;  %v7754_v59 = vmax.f32 %v4222_v7, %v4223_v36  ;;  %v8519_v60 = vld [vmem:[#allocation73_spill] sm:$0xff]  ;;  %v2892_v33 = vpop.permute.xlu1 %2891 }
 0x249   : > { %8513 = vst [vmem:[#allocation87_spill] sm:$0xff] %v7747_v42  ;;  %v7752_v0 = vmax.f32 %v3865_v3, %v3866_v17  ;;  %v3882_v19 = vsel %vm3454_vm1, %v3387_v29, -inf  ;;  %v4240_v6 = vrot.slane %v4239_v44, 4  ;;  %vm3005_vm8 = vcmp.gt.f32.partialorder %v8516_v27, 0.5  ;;  %v2843_v42 = vpop.permute.xlu0 %2842 }
 0x24a   : > { %8515 = vst [vmem:[#allocation89_spill] sm:$0xff] %v7754_v59  ;;  %v3883_v62 = vrot.slane %v3882_v19, 4  ;;  %v3386_v10 = vsel %vm3002_vm5, -3e+38, %v1978_v2  ;;  %v2028_v43 = vmax.f32 %v1900_v18, 0.0  ;;  %vm3052_vm10 = vcmp.gt.f32.partialorder %v2822_v58, 0.5 }
 0x24b   : > { %8514 = vst [vmem:[#allocation88_spill] sm:$0xff] %v7752_v0  ;;  %vm3004_vm11 = vcmp.gt.f32.partialorder %v8517_v49, 0.5  ;;  %v4216_v38 = vrot.slane %v4215_v45, 1  ;;  %v3875_v37 = vsel %vm3454_vm1, %v3386_v10, -inf  ;;  %v4241_v54 = vmax.f32 %v4239_v44, %v4240_v6 }
 0x24c   : > { %v1325_v7 = vadd.f32 %v7664_v21, %v8518_v53  ;;  %v3884_v57 = vmax.f32 %v3882_v19, %v3883_v62  ;;  %v3876_v3 = vrot.slane %v3875_v37, 4  ;;  %v3436_v36 = vsel %vm3052_vm10, -3e+38, %v2028_v43 }
 0x24d   : > { %v1320_v17 = vadd.f32 %v7664_v21, %v8519_v60  ;;  %v4242_v32 = vrot.slane %v4241_v54, 2  ;;  %v4225_v18 = vsel %vm3454_vm1, %v3436_v36, -inf  ;;  %v1910_v29 = vadd.f32 %v7693_v9, %v1775_v26 }
 0x24e   : > { %v1718_v58 = vmul.f32 %v7671_v12, %v1325_v7  ;;  %v3885_v2 = vrot.slane %v3884_v57, 2  ;;  %v3877_v10 = vmax.f32 %v3875_v37, %v3876_v3  ;;  %v4226_v44 = vrot.slane %v4225_v18, 4 }
 0x24f   : > { %v1717_v6 = vmul.f32 %v7671_v12, %v1320_v17  ;;  %v4243_v53 = vmax.f32 %v4241_v54, %v4242_v32  ;;  %v2038_v62 = vmax.f32 %v1910_v29, 0.0  ;;  %vm3062_vm13 = vcmp.gt.f32.partialorder %v2892_v33, 0.5  ;;  %v2850_v29 = vpop.permute.xlu1 %2849 }
 0x250   : > { %v1853_v19 = vadd.f32 %v7693_v9, %v1718_v58  ;;  %v7771_v43 = vmax.f32 %v3884_v57, %v3885_v2  ;;  %v3878_v60 = vrot.slane %v3877_v10, 2  ;;  %v4227_v59 = vmax.f32 %v4225_v18, %v4226_v44 }
 0x251   : > { %v1852_v36 = vadd.f32 %v7693_v9, %v1717_v6  ;;  %v7774_v7 = vmax.f32 %v4215_v45, %v4216_v38  ;;  %v3446_v0 = vsel %vm3062_vm13, -3e+38, %v2038_v62  ;;  %v1903_v37 = vadd.f32 %v7693_v9, %v7619_v40 }
 0x252   : > { %v1981_v26 = vmax.f32 %v1853_v19, 0.0  ;;  %v3879_v3 = vmax.f32 %v3877_v10, %v3878_v60  ;;  %v4244_v54 = vrot.slane %v4243_v53, 1  ;;  %v4228_v17 = vrot.slane %v4227_v59, 2 }
 0x253   : > { %v1980_v32 = vmax.f32 %v1852_v36, 0.0  ;;  %v3887_v33 = vrot.slane %v7771_v43, 1  ;;  %v4295_v18 = vsel %vm3454_vm1, %v3446_v0, -inf  ;;  %v2031_v58 = vmax.f32 %v1903_v37, 0.0  ;;  %v2899_v36 = vpop.permute.xlu0 %2898 }
 0x254   : > { %v3389_v57 = vsel %vm3005_vm8, -3e+38, %v1981_v26  ;;  %v3880_v45 = vrot.slane %v3879_v3, 1  ;;  %v4229_v38 = vmax.f32 %v4227_v59, %v4228_v17  ;;  %v4296_v6 = vrot.slane %v4295_v18, 4 }
 0x255   : > { %v3896_v2 = vsel %vm3454_vm1, %v3389_v57, -inf  ;;  %v3388_v40 = vsel %vm3004_vm11, -3e+38, %v1980_v32  ;;  %vm3055_vm14 = vcmp.gt.f32.partialorder %v2843_v42, 0.5  ;;  %v4245_v19 = vmax.f32 %v4243_v53, %v4244_v54  ;;  %v2857_v57 = vpop.permute.xlu1 %2856 }
 0x256   : > { %v3897_v10 = vrot.slane %v3896_v2, 4  ;;  %v3889_v44 = vsel %vm3454_vm1, %v3388_v40, -inf  ;;  %v4230_v62 = vrot.slane %v4229_v38, 1  ;;  %v3439_v60 = vsel %vm3055_vm14, -3e+38, %v2031_v58 }
 0x257   : > { %v3890_v27 = vrot.slane %v3889_v44, 4  ;;  %v7786_v0 = vmax.f32 %v3879_v3, %v3880_v45  ;;  %v4297_v59 = vmax.f32 %v4295_v18, %v4296_v6  ;;  %v4246_v37 = vsel %vm3454_vm1, %v3439_v60, -inf }
 0x258   : > { %v7788_v26 = vmax.f32 %v3896_v2, %v3897_v10  ;;  %v4247_v49 = vrot.slane %v4246_v37, 4  ;;  %v1625_v32 = vadd.f32 %v7664_v21, %v7307_v28  ;;  %v1620_v42 = vadd.f32 %v7664_v21, %v7311_v14 }
 0x259   : > { %v3891_v17 = vmax.f32 %v3889_v44, %v3890_v27  ;;  %v7795_v53 = vmax.f32 %v4229_v38, %v4230_v62  ;;  %v4298_v54 = vrot.slane %v4297_v59, 2  ;;  %v1904_v3 = vadd.f32 %v7693_v9, %v7644_v31  ;;  %v2906_v31 = vpop.permute.xlu0 %2905 }
 0x25a   : > { %vm3056_vm15 = vcmp.gt.f32.partialorder %v2850_v29, 0.5  ;;  %v4248_v18 = vmax.f32 %v4246_v37, %v4247_v49  ;;  %v1777_v45 = vmul.f32 %v7671_v12, %v1620_v42  ;;  %v1911_v2 = vadd.f32 %v7693_v9, %v7734_v35 }
 0x25b   : > { %v3892_v58 = vrot.slane %v3891_v17, 2  ;;  %v4299_v40 = vmax.f32 %v4297_v59, %v4298_v54  ;;  %v2032_v28 = vmax.f32 %v1904_v3, 0.0  ;;  %vm3063_vm0 = vcmp.gt.f32.partialorder %v2899_v36, 0.5 }
 0x25c   : > { %v1905_v14 = vadd.f32 %v7693_v9, %v7638_v56  ;;  %v4249_v38 = vrot.slane %v4248_v18, 2  ;;  %v1778_v10 = vmul.f32 %v7671_v12, %v1625_v32  ;;  %v2039_v44 = vmax.f32 %v1911_v2, 0.0  ;;  %v2864_v32 = vpop.permute.xlu1 %2863 }
 0x25d   : > { %vm3057_vm2 = vcmp.gt.f32.partialorder %v2857_v57, 0.5  ;;  %v4300_v6 = vrot.slane %v4299_v40, 1  ;;  %v3440_v62 = vsel %vm3056_vm15, -3e+38, %v2032_v28  ;;  %v1912_v60 = vadd.f32 %v7693_v9, %v1777_v45 }
 0x25e   : > { %v2033_v27 = vmax.f32 %v1905_v14, 0.0  ;;  %v7807_v37 = vmax.f32 %v3891_v17, %v3892_v58  ;;  %v4250_v35 = vmax.f32 %v4248_v18, %v4249_v38  ;;  %v4253_v36 = vsel %vm3454_vm1, %v3440_v62, -inf }
 0x25f   : > { %v3447_v59 = vsel %vm3063_vm0, -3e+38, %v2039_v44  ;;  %v4254_v49 = vrot.slane %v4253_v36, 4  ;;  %vm3064_vm3 = vcmp.gt.f32.partialorder %v2906_v31, 0.5  ;;  %v2040_v57 = vmax.f32 %v1912_v60, 0.0  ;;  %v2913_v44 = vpop.permute.xlu0 %2912 }
 0x260   : > { %v4302_v56 = vsel %vm3454_vm1, %v3447_v59, -inf  ;;  %v3441_v42 = vsel %vm3057_vm2, -3e+38, %v2033_v27  ;;  %v4251_v54 = vrot.slane %v4250_v35, 1  ;;  %v4301_v2 = vmax.f32 %v4299_v40, %v4300_v6 }
 0x261   : > { %v4303_v3 = vrot.slane %v4302_v56, 4  ;;  %v4260_v29 = vsel %vm3454_vm1, %v3441_v42, -inf  ;;  %v4255_v28 = vmax.f32 %v4253_v36, %v4254_v49  ;;  %v1635_v17 = vadd.f32 %v7664_v21, %v7357_v55 }
 0x262   : > { %v4261_v45 = vrot.slane %v4260_v29, 4  ;;  %v4252_v58 = vmax.f32 %v4250_v35, %v4251_v54  ;;  %v3448_v14 = vsel %vm3064_vm3, -3e+38, %v2040_v57  ;;  %v1906_v38 = vadd.f32 %v7693_v9, %v7686_v15  ;;  %v2871_v15 = vpop.permute.xlu1 %2870 }
 0x263   : > { %v4304_v18 = vmax.f32 %v4302_v56, %v4303_v3  ;;  %v4256_v31 = vrot.slane %v4255_v28, 2  ;;  %v4309_v27 = vsel %vm3454_vm1, %v3448_v14, -inf  ;;  %v1630_v60 = vadd.f32 %v7664_v21, %v7361_v48 }
 0x264   : > { %v4262_v62 = vmax.f32 %v4260_v29, %v4261_v45  ;;  %v4681_v40 = vsel %vm4576_vm9, %v4252_v58, %v4245_v19  ;;  %v4310_v36 = vrot.slane %v4309_v27, 4  ;;  %v7821_v55 = vmul.f32 %v7671_v12, %v1635_v17  ;;  %v2920_v58 = vpop.permute.xlu0 %2919 }
 0x265   : > { %v4305_v6 = vrot.slane %v4304_v18, 2  ;;  %v4257_v35 = vmax.f32 %v4255_v28, %v4256_v31  ;;  %v2034_v49 = vmax.f32 %v1906_v38, 0.0  ;;  %vm3058_vm6 = vcmp.gt.f32.partialorder %v2864_v32, 0.5 }
 0x266   : > { %v4263_v59 = vrot.slane %v4262_v62, 2  ;;  %v4311_v42 = vmax.f32 %v4309_v27, %v4310_v36  ;;  %v1913_v54 = vadd.f32 %v7693_v9, %v1778_v10  ;;  %vm3065_vm4 = vcmp.gt.f32.partialorder %v2913_v44, 0.5 }
 0x267   : > { %v4306_v56 = vmax.f32 %v4304_v18, %v4305_v6  ;;  %v4258_v3 = vrot.slane %v4257_v35, 1  ;;  %v3442_v48 = vsel %vm3058_vm6, -3e+38, %v2034_v49  ;;  %v1907_v19 = vadd.f32 %v7693_v9, %v7674_v1 }
 0x268   : > { %v4264_v29 = vmax.f32 %v4262_v62, %v4263_v59  ;;  %v4312_v45 = vrot.slane %v4311_v42, 2  ;;  %v4267_v17 = vsel %vm3454_vm1, %v3442_v48, -inf  ;;  %v2041_v28 = vmax.f32 %v1913_v54, 0.0  ;;  %v2878_v59 = vpop.permute.xlu1 %2877 }
 0x269   : > { %v4307_v57 = vrot.slane %v4306_v56, 1  ;;  %v4259_v14 = vmax.f32 %v4257_v35, %v4258_v3  ;;  %v1779_v32 = vmul.f32 %v7671_v12, %v1630_v60  ;;  %v4268_v18 = vrot.slane %v4267_v17, 4 }
 0x26a   : > { %v2035_v38 = vmax.f32 %v1907_v19, 0.0  ;;  %v4313_v10 = vmax.f32 %v4311_v42, %v4312_v45  ;;  %v3449_v27 = vsel %vm3065_vm4, -3e+38, %v2041_v28  ;;  %vm3059_vm5 = vcmp.gt.f32.partialorder %v2871_v15, 0.5  ;;  %v2927_v19 = vpop.permute.xlu0 %2926 }
 0x26b   : > { %v4308_v31 = vmax.f32 %v4306_v56, %v4307_v57  ;;  %v7830_v62 = vsel %vm4578_vm12, %v4259_v14, %v4681_v40  ;;  %v4265_v1 = vrot.slane %v4264_v29, 1  ;;  %v4269_v6 = vmax.f32 %v4267_v17, %v4268_v18 }
 0x26c   : > { %v4316_v36 = vsel %vm3454_vm1, %v3449_v27, -inf  ;;  %v4314_v35 = vrot.slane %v4313_v10, 1  ;;  %v3443_v60 = vsel %vm3059_vm5, -3e+38, %v2035_v38  ;;  %v1914_v44 = vadd.f32 %v7693_v9, %v1779_v32 }
 0x26d   : > { %v4688_v49 = vsel %vm4576_vm9, %v4308_v31, %v4301_v2  ;;  %v4317_v54 = vrot.slane %v4316_v36, 4  ;;  %v4270_v3 = vrot.slane %v4269_v6, 2  ;;  %v4274_v56 = vsel %vm3454_vm1, %v3443_v60, -inf }
 0x26e   : > { %vm3066_vm7 = vcmp.gt.f32.partialorder %v2920_v58, 0.5  ;;  %v4315_v15 = vmax.f32 %v4313_v10, %v4314_v35  ;;  %v4275_v40 = vrot.slane %v4274_v56, 4  ;;  %v1645_v48 = vadd.f32 %v7664_v21, %v7410_v34  ;;  %v2829_v10 = vpop.permute.xlu1 %2828 }
 0x26f   : > { %v4318_v42 = vmax.f32 %v4316_v36, %v4317_v54  ;;  %v4271_v57 = vmax.f32 %v4269_v6, %v4270_v3  ;;  %v2042_v45 = vmax.f32 %v1914_v44, 0.0  ;;  %v1640_v2 = vadd.f32 %v7664_v21, %v7417_v5  ;;  %v2934_v54 = vpop.permute.xlu0 %2933 }
 0x270   : > { %v1908_v17 = vadd.f32 %v7693_v9, %v7704_v16  ;;  %v7842_v28 = vmax.f32 %v4264_v29, %v4265_v1  ;;  %v7845_v14 = vsel %vm4578_vm12, %v4315_v15, %v4688_v49  ;;  %v4276_v32 = vmax.f32 %v4274_v56, %v4275_v40 }
 0x271   : > { %v4319_v58 = vrot.slane %v4318_v42, 2  ;;  %v4272_v18 = vrot.slane %v4271_v57, 1  ;;  %v3450_v38 = vsel %vm3066_vm7, -3e+38, %v2042_v45  ;;  %v1781_v34 = vmul.f32 %v7671_v12, %v1640_v2 }
 0x272   : > { %v2036_v31 = vmax.f32 %v1908_v17, 0.0  ;;  %v4277_v6 = vrot.slane %v4276_v32, 2  ;;  %v4323_v5 = vsel %vm3454_vm1, %v3450_v38, -inf  ;;  %vm3060_vm8 = vcmp.gt.f32.partialorder %v2878_v59, 0.5  ;;  %v2941_v45 = vpop.permute.xlu1 %2940 }
 0x273   : > { %v4320_v27 = vmax.f32 %v4318_v42, %v4319_v58  ;;  %v4324_v21 = vrot.slane %v4323_v5, 4  ;;  %v1782_v16 = vmul.f32 %v7671_v12, %v1645_v48  ;;  %v1915_v1 = vadd.f32 %v7693_v9, %v7821_v55 }
 0x274   : > { %v3444_v29 = vsel %vm3060_vm8, -3e+38, %v2036_v31  ;;  %v4278_v49 = vmax.f32 %v4276_v32, %v4277_v6  ;;  %vm3067_vm10 = vcmp.gt.f32.partialorder %v2927_v19, 0.5  ;;  %v1901_v44 = vadd.f32 %v7693_v9, %v7589_v39 }
 0x275   : > { %v4321_v36 = vrot.slane %v4320_v27, 1  ;;  %v4281_v35 = vsel %vm3454_vm1, %v3444_v29, -inf  ;;  %v4325_v60 = vmax.f32 %v4323_v5, %v4324_v21  ;;  %v2043_v56 = vmax.f32 %v1915_v1, 0.0 }
 0x276   : > { %v4282_v3 = vrot.slane %v4281_v35, 4  ;;  %v7855_v59 = vmax.f32 %v4271_v57, %v4272_v18  ;;  %vm3053_vm11 = vcmp.gt.f32.partialorder %v2829_v10, 0.5  ;;  %v1916_v12 = vadd.f32 %v7693_v9, %v1781_v34  ;;  %v2885_v34 = vpop.permute.xlu0 %2884 }
 0x277   : > { %v7857_v15 = vmax.f32 %v4320_v27, %v4321_v36  ;;  %v4326_v55 = vrot.slane %v4325_v60, 2  ;;  %v3451_v40 = vsel %vm3067_vm10, -3e+38, %v2043_v56  ;;  %v2029_v48 = vmax.f32 %v1901_v44, 0.0 }
 0x278   : > { %v4283_v42 = vmax.f32 %v4281_v35, %v4282_v3  ;;  %v4279_v19 = vrot.slane %v4278_v49, 1  ;;  %v4330_v2 = vsel %vm3454_vm1, %v3451_v40, -inf  ;;  %v2044_v17 = vmax.f32 %v1916_v12, 0.0 }
 0x279   : > { %vm3068_vm13 = vcmp.gt.f32.partialorder %v2934_v54, 0.5  ;;  %v4327_v58 = vmax.f32 %v4325_v60, %v4326_v55  ;;  %v4331_v39 = vrot.slane %v4330_v2, 4  ;;  %v3437_v57 = vsel %vm3053_vm11, -3e+38, %v2029_v48 }
 0x27a   : > { %v4284_v32 = vrot.slane %v4283_v42, 2  ;;  %v4232_v18 = vsel %vm3454_vm1, %v3437_v57, -inf  ;;  %v3452_v38 = vsel %vm3068_vm13, -3e+38, %v2044_v17  ;;  %v1917_v31 = vadd.f32 %v7693_v9, %v1782_v16 }
 0x27b   : > { %vm3069_vm14 = vcmp.gt.f32.partialorder %v2941_v45, 0.5  ;;  %v4328_v10 = vrot.slane %v4327_v58, 1  ;;  %v4332_v6 = vmax.f32 %v4330_v2, %v4331_v39  ;;  %v4233_v5 = vrot.slane %v4232_v18, 4 }
 0x27c   : > { %v4285_v27 = vmax.f32 %v4283_v42, %v4284_v32  ;;  %v7863_v21 = vmax.f32 %v4278_v49, %v4279_v19  ;;  %v4337_v29 = vsel %vm3454_vm1, %v3452_v38, -inf  ;;  %v2045_v1 = vmax.f32 %v1917_v31, 0.0  ;;  %v4354_v32 = vpop.xlane.xlu0 %4353 }
 0x27d   : > { %v1909_v36 = vadd.f32 %v7693_v9, %v7698_v47  ;;  %v4333_v54 = vrot.slane %v4332_v6, 2  ;;  %v4234_v60 = vmax.f32 %v4232_v18, %v4233_v5  ;;  %vm3061_vm15 = vcmp.gt.f32.partialorder %v2885_v34, 0.5  ;;  %v8520_v34 = vld [vmem:[#allocation52_spill] sm:$0xff] }
 0x27e   : > { %v4286_v35 = vrot.slane %v4285_v27, 1  ;;  %v7868_v3 = vmax.f32 %v4327_v58, %v4328_v10  ;;  %v4338_v16 = vrot.slane %v4337_v29, 4  ;;  %v3453_v56 = vsel %vm3069_vm14, -3e+38, %v2045_v1 }
 0x27f   : > { %v2037_v44 = vmax.f32 %v1909_v36, 0.0  ;;  %v4334_v12 = vmax.f32 %v4332_v6, %v4333_v54  ;;  %v4235_v55 = vrot.slane %v4234_v60, 2  ;;  %v4344_v49 = vsel %vm3454_vm1, %v3453_v56, -inf  ;;  %v8524_v36 = vld [vmem:[#allocation44_spill] sm:$0xff] }
 0x280   : > { %vm4580_vm0 = vcmask 1043459   ;;  %v7872_v42 = vmax.f32 %v4285_v27, %v4286_v35  ;;  %v4339_v40 = vmax.f32 %v4337_v29, %v4338_v16  ;;  %v4345_v48 = vrot.slane %v4344_v49, 4  ;;  %v8521_v27 = vld [vmem:[#allocation41_spill] sm:$0xff]  ;;  %v8523_v29 = vld [vmem:[#allocation50_spill] sm:$0xff]  ;;  %v8525_v35 = vld [vmem:[#allocation43_spill] sm:$0xff] }
 0x281   : > { %v3445_v9 = vsel %vm3061_vm15, -3e+38, %v2037_v44  ;;  %v4335_v47 = vrot.slane %v4334_v12, 1  ;;  %v7874_v19 = vmax.f32 %v4234_v60, %v4235_v55  ;;  %vm4582_vm2 = vcmask 1044484   ;;  %v8526_v55 = vld [vmem:[#allocation46_spill] sm:$0xff] }
 0x282   : > { %v4288_v2 = vsel %vm3454_vm1, %v3445_v9, -inf  ;;  %v4340_v17 = vrot.slane %v4339_v40, 2  ;;  %v4346_v45 = vmax.f32 %v4344_v49, %v4345_v48  ;;  %vm4584_vm3 = vcmask 1045509   ;;  %v8528_v9 = vld [vmem:[#allocation5_spill] sm:$0xff] }
 0x283   : > { %v4289_v58 = vrot.slane %v4288_v2, 4  ;;  %v7877_v39 = vmax.f32 %v4334_v12, %v4335_v47  ;;  %vm4586_vm6 = vcmask 1046534   ;;  %vm4588_vm4 = vcmask 1047559  }
 0x284   : > { %v4341_v18 = vmax.f32 %v4339_v40, %v4340_v17  ;;  %v4347_v38 = vrot.slane %v4346_v45, 2  ;;  %v3502_v10 = vrot.slane %v8520_v34, 1  ;;  %v8522_v6 = vrot.slane %v8521_v27, 1  ;;  %v8527_v40 = vld [vmem:[#allocation6_spill] sm:$0xff] }
 0x285   : > { %v4290_v31 = vmax.f32 %v4288_v2, %v4289_v58  ;;  %v3507_v1 = vrot.slane %v8523_v29, 2  ;;  %vm4400_vm5 = vcmp.gt.f32.partialorder %v4354_v32, 0.5  ;;  %v4577_v54 = vsel %vm4576_vm9, %v8525_v35, %v8524_v36  ;;  %v8529_v58 = vld [vmem:[#allocation45_spill] sm:$0xff] }
 0x286   : > { %v3496_v5 = vmax.f32 %v8521_v27, %v8522_v6  ;;  %v4342_v60 = vrot.slane %v4341_v18, 1  ;;  %v7888_v16 = vmax.f32 %v4346_v45, %v4347_v38  ;;  %v3503_v44 = vmax.f32 %v8520_v34, %v3502_v10  ;;  %v4360_v38 = vpop.xlane.xlu0 %4359  ;;  %v8530_v27 = vld [vmem:[#allocation39_spill] sm:$0xff] }
 0x287   : > { %v4291_v56 = vrot.slane %v4290_v31, 2  ;;  %v3508_v12 = vmax.f32 %v8523_v29, %v3507_v1  ;;  %v4579_v49 = vsel %vm4578_vm12, %v8526_v55, %v4577_v54  ;;  %v3614_v48 = vrot.slane %v8527_v40, 1  ;;  %v8532_v1 = vld [vmem:[#allocation49_spill] sm:$0xff] }
 0x288   : > { %v3619_v47 = vrot.slane %v8528_v9, 2  ;;  %v7896_v2 = vmax.f32 %v4341_v18, %v4342_v60  ;;  %v4581_v45 = vsel %vm4580_vm0, %v8529_v58, %v4579_v49  ;;  %v8531_v34 = vrot.slane %v8530_v27, 1  ;;  %v8533_v60 = vld [vmem:[#allocation72_spill] sm:$0xff] }
 0x289   : > { %v7898_v17 = vmax.f32 %v4290_v31, %v4291_v56  ;;  %v3509_v29 = vrot.slane %v3508_v12, 1  ;;  %v4583_v36 = vsel %vm4582_vm2, %v8532_v1, %v4581_v45  ;;  %v3615_v54 = vmax.f32 %v8527_v40, %v3614_v48  ;;  %v8534_v56 = vld [vmem:[#allocation70_spill] sm:$0xff]  ;;  %v4357_v45 = vpop.xlane.xlu1 %4356  ;;  %v8537_v48 = vld [vmem:[#allocation65_spill] sm:$0xff]  ;;  %v8553_v31 = vld [vmem:[#allocation83_spill] sm:$0xff] }
 0x28a   : > { %v3608_v10 = vmax.f32 %v8530_v27, %v8531_v34  ;;  %v3620_v18 = vmax.f32 %v8528_v9, %v3619_v47  ;;  %v4585_v35 = vsel %vm4584_vm3, %v3496_v5, %v4583_v36  ;;  %v4597_v55 = vsel %vm4576_vm9, %v8534_v56, %v8533_v60  ;;  %v8535_v34 = vld [vmem:[#allocation75_spill] sm:$0xff]  ;;  %v8536_v5 = vld [vmem:[#allocation74_spill] sm:$0xff]  ;;  %v8539_v1 = vld [vmem:[#allocation77_spill] sm:$0xff] }
 0x28b   : > { %v3510_v49 = vmax.f32 %v3508_v12, %v3509_v29  ;;  %v4587_v58 = vsel %vm4586_vm6, %v3503_v44, %v4585_v35  ;;  %v4598_v6 = vsel %vm4578_vm12, %v8535_v34, %v4597_v55  ;;  %vm4402_vm7 = vcmp.gt.f32.partialorder %v4360_v38, 0.5  ;;  %v8538_v9 = vld [vmem:[#allocation63_spill] sm:$0xff]  ;;  %v8540_v35 = vld [vmem:[#allocation56_spill] sm:$0xff]  ;;  %v8551_v38 = vld [vmem:[#allocation9_spill] sm:$0xff] }
 0x28c   : > { %v3621_v27 = vrot.slane %v3620_v18, 1  ;;  %v4599_v40 = vsel %vm4580_vm0, %v8536_v5, %v4598_v6  ;;  %v3558_v12 = vrot.slane %v8537_v48, 1  ;;  %v3563_v44 = vrot.slane %v8538_v9, 2  ;;  %v4363_v5 = vpop.xlane.xlu0 %4362 }
 0x28d   : > { %v4589_v47 = vsel %vm4588_vm4, %v3510_v49, %v4587_v58  ;;  %v4600_v36 = vsel %vm4582_vm2, %v8539_v1, %v4599_v40  ;;  %v8541_v60 = vrot.slane %v8540_v35, 1  ;;  %vm4401_vm8 = vcmp.gt.f32.partialorder %v4357_v45, 0.5  ;;  %v8542_v58 = vld [vmem:[#allocation57_spill] sm:$0xff]  ;;  %v8544_v1 = vld [vmem:[#allocation86_spill] sm:$0xff] }
 0x28e   : > { %v3622_v29 = vmax.f32 %v3620_v18, %v3621_v27  ;;  %v4711_v55 = vsel %vm4400_vm5, 0.0, %v4589_v47  ;;  %v4601_v34 = vsel %vm4584_vm3, %v3608_v10, %v4600_v36  ;;  %v3564_v6 = vmax.f32 %v8538_v9, %v3563_v44  ;;  %v8543_v27 = vld [vmem:[#allocation55_spill] sm:$0xff]  ;;  %v8545_v36 = vld [vmem:[#allocation61_spill] sm:$0xff] }
 0x28f   : > { %v3552_v56 = vmax.f32 %v8540_v35, %v8541_v60  ;;  %4727 = vst.msk [vmem:[%s7923_s18] sm:$0xff] %vm3454_vm1, %v4711_v55  ;;  %v4602_v18 = vsel %vm4586_vm6, %v3615_v54, %v4601_v34  ;;  %v3559_v49 = vmax.f32 %v8537_v48, %v3558_v12  ;;  %v4590_v40 = vsel %vm4576_vm9, %v8543_v27, %v8542_v58  ;;  %v8546_v44 = vld [vmem:[#allocation85_spill] sm:$0xff]  ;;  %v8547_v55 = vld [vmem:[#allocation58_spill] sm:$0xff]  ;;  %v8548_v48 = vld [vmem:[#allocation84_spill] sm:$0xff]  ;;  %v4366_v27 = vpop.xlane.xlu1 %4365 }
 0x290   : > { %v3670_v32 = vrot.slane %v8544_v1, 1  ;;  %v4603_v47 = vsel %vm4588_vm4, %v3622_v29, %v4602_v18  ;;  %v3565_v10 = vrot.slane %v3564_v6, 1  ;;  %v4591_v9 = vsel %vm4578_vm12, %v8545_v36, %v4590_v40  ;;  %v8550_v29 = vld [vmem:[#allocation62_spill] sm:$0xff]  ;;  %v4369_v57 = vpop.xlane.xlu0 %4368 }
 0x291   : > { %v3675_v35 = vrot.slane %v8546_v44, 2  ;;  %v4713_v60 = vsel %vm4402_vm7, 0.0, %v4603_v47  ;;  %v4592_v54 = vsel %vm4580_vm0, %v8547_v55, %v4591_v9  ;;  %v8549_v12 = vrot.slane %v8548_v48, 1  ;;  %v8552_v47 = vld [vmem:[#allocation7_spill] sm:$0xff] }
 0x292   : > { %v3671_v58 = vmax.f32 %v8544_v1, %v3670_v32  ;;  %4729 = vst.msk [vmem:[%s7923_s18 + $0x10] sm:$0xff] %vm3454_vm1, %v4713_v60  ;;  %v4593_v18 = vsel %vm4582_vm2, %v8550_v29, %v4592_v54  ;;  %vm4403_vm10 = vcmp.gt.f32.partialorder %v4363_v5, 0.5  ;;  %v4604_v36 = vsel %vm4576_vm9, %v8552_v47, %v8551_v38  ;;  %v8554_v32 = vld [vmem:[#allocation2_spill] sm:$0xff]  ;;  %v8555_v54 = vld [vmem:[#allocation81_spill] sm:$0xff] }
 0x293   : > { %v3664_v34 = vmax.f32 %v8548_v48, %v8549_v12  ;;  %v3676_v40 = vmax.f32 %v8546_v44, %v3675_v35  ;;  %v3566_v9 = vmax.f32 %v3564_v6, %v3565_v10  ;;  %v4594_v55 = vsel %vm4584_vm3, %v3552_v56, %v4593_v18  ;;  %v8556_v35 = vld [vmem:[#allocation22_spill] sm:$0xff]  ;;  %v8557_v6 = vld [vmem:[#allocation13_spill] sm:$0xff]  ;;  %v8558_v10 = vld [vmem:[#allocation19_spill] sm:$0xff] }
 0x294   : > { %v4605_v1 = vsel %vm4578_vm12, %v8553_v31, %v4604_v36  ;;  %v3726_v48 = vrot.slane %v8554_v32, 1  ;;  %v4595_v60 = vsel %vm4586_vm6, %v3559_v49, %v4594_v55  ;;  %v3731_v29 = vrot.slane %v8556_v35, 2 }
 0x295   : > { %v3677_v12 = vrot.slane %v3676_v40, 1  ;;  %v4606_v44 = vsel %vm4580_vm0, %v8555_v54, %v4605_v1  ;;  %v4596_v38 = vsel %vm4588_vm4, %v3566_v9, %v4595_v60  ;;  %v8559_v18 = vrot.slane %v8558_v10, 1  ;;  %v8560_v60 = vld [vmem:[#allocation93_spill] sm:$0xff]  ;;  %v8561_v54 = vld [vmem:[#allocation67_spill] sm:$0xff] }
 0x296   : > { %v4607_v56 = vsel %vm4582_vm2, %v8557_v6, %v4606_v44  ;;  %v3727_v47 = vmax.f32 %v8554_v32, %v3726_v48  ;;  %v4712_v49 = vsel %vm4401_vm8, 0.0, %v4596_v38  ;;  %v3732_v1 = vmax.f32 %v8556_v35, %v3731_v29  ;;  %v7990_v32 = vpop.xlane.xlu1 %4371 }
 0x297   : > { %v3720_v31 = vmax.f32 %v8558_v10, %v8559_v18  ;;  %v3678_v36 = vmax.f32 %v3676_v40, %v3677_v12  ;;  %v4608_v55 = vsel %vm4584_vm3, %v3664_v34, %v4607_v56  ;;  %4728 = vst.msk [vmem:[%s7923_s18 + $0x8] sm:$0xff] %vm3454_vm1, %v4712_v49  ;;  %vm4404_vm11 = vcmp.gt.f32.partialorder %v4366_v27, 0.5  ;;  %v8562_v34 = vld [vmem:[#allocation95_spill] sm:$0xff]  ;;  %v8565_v18 = vld [vmem:[#allocation97_spill] sm:$0xff] }
 0x298   : > { %v4609_v9 = vsel %vm4586_vm6, %v3671_v58, %v4608_v55  ;;  %v4611_v44 = vsel %vm4576_vm9, %v8561_v54, %v8560_v60  ;;  %v3782_v6 = vrot.slane %v7457_v8, 1  ;;  %v3733_v40 = vrot.slane %v3732_v1, 1  ;;  %v8563_v58 = vld [vmem:[#allocation18_spill] sm:$0xff]  ;;  %v8011_v55 = vpop.xlane.xlu0 %4374 }
 0x299   : > { %v4610_v45 = vsel %vm4588_vm4, %v3678_v36, %v4609_v9  ;;  %v4612_v48 = vsel %vm4578_vm12, %v8562_v34, %v4611_v44  ;;  %v3787_v12 = vrot.slane %v7440_v4, 2  ;;  %v8564_v38 = vrot.slane %v7398_v22, 1 }
 0x29a   : > { %v4714_v35 = vsel %vm4403_vm10, 0.0, %v4610_v45  ;;  %v4613_v29 = vsel %vm4580_vm0, %v8563_v58, %v4612_v48  ;;  %v3783_v10 = vmax.f32 %v7457_v8, %v3782_v6  ;;  %vm4405_vm13 = vcmp.gt.f32.partialorder %v4369_v57, 0.5 }
 0x29b   : > { %v3776_v56 = vmax.f32 %v7398_v22, %v8564_v38  ;;  %4730 = vst.msk [vmem:[%s7923_s18 + $0x18] sm:$0xff] %vm3454_vm1, %v4714_v35  ;;  %v4614_v49 = vsel %vm4582_vm2, %v8565_v18, %v4613_v29  ;;  %v3788_v36 = vmax.f32 %v7440_v4, %v3787_v12  ;;  %v4618_v5 = vsel %vm4576_vm9, %v7313_v41, %v7328_v30  ;;  %v8566_v30 = vld [vmem:[#allocation27_spill] sm:$0xff] }
 0x29c   : > { %v3734_v9 = vmax.f32 %v3732_v1, %v3733_v40  ;;  %v4615_v60 = vsel %vm4584_vm3, %v3720_v31, %v4614_v49  ;;  %v4619_v22 = vsel %vm4578_vm12, %v7369_v24, %v4618_v5  ;;  %v3838_v8 = vrot.slane %v7648_v11, 1  ;;  %v4378_v40 = vpop.xlane.xlu1 %4377  ;;  %v4381_v29 = vpop.xlane.xlu0 %4380  ;;  %v8568_v49 = vld [vmem:[#allocation88_spill] sm:$0xff] }
 0x29d   : > { %v4616_v54 = vsel %vm4586_vm6, %v3727_v47, %v4615_v60  ;;  %v3789_v44 = vrot.slane %v3788_v36, 1  ;;  %v4620_v4 = vsel %vm4580_vm0, %v7359_v52, %v4619_v22  ;;  %v3843_v6 = vrot.slane %v7616_v46, 2  ;;  %v8572_v22 = vld [vmem:[#allocation71_spill] sm:$0xff] }
 0x29e   : > { %v4617_v41 = vsel %vm4588_vm4, %v3734_v9, %v4616_v54  ;;  %v4621_v1 = vsel %vm4582_vm2, %v8566_v30, %v4620_v4  ;;  %v8567_v31 = vrot.slane %v7581_v13, 1  ;;  %v3839_v24 = vmax.f32 %v7648_v11, %v3838_v8  ;;  %v8571_v9 = vld [vmem:[#allocation87_spill] sm:$0xff] }
 0x29f   : > { %v4715_v47 = vsel %vm4404_vm11, 0.0, %v4617_v41  ;;  %v3790_v34 = vmax.f32 %v3788_v36, %v3789_v44  ;;  %v4622_v48 = vsel %vm4584_vm3, %v3776_v56, %v4621_v1  ;;  %v3844_v52 = vmax.f32 %v7616_v46, %v3843_v6  ;;  %v8574_v44 = vld [vmem:[#allocation3_spill] sm:$0xff]  ;;  %v8575_v1 = vld [vmem:[#allocation76_spill] sm:$0xff] }
 0x2a0   : > { %v3832_v45 = vmax.f32 %v7581_v13, %v8567_v31  ;;  %4731 = vst.msk [vmem:[%s7923_s18 + $0x20] sm:$0xff] %vm3454_vm1, %v4715_v47  ;;  %v4623_v12 = vsel %vm4586_vm6, %v3783_v10, %v4622_v48  ;;  %vm4406_vm14 = vcmp.gt.f32.partialorder %v7990_v32, 0.5  ;;  %v4625_v13 = vsel %vm4576_vm9, %v7496_v50, %v7509_v20 }
 0x2a1   : > { %v3894_v11 = vrot.slane %v7807_v37, 1  ;;  %v4624_v27 = vsel %vm4588_vm4, %v3790_v34, %v4623_v12  ;;  %v3845_v35 = vrot.slane %v3844_v52, 1  ;;  %v4626_v58 = vsel %vm4578_vm12, %v7548_v61, %v4625_v13  ;;  %v8577_v34 = vld [vmem:[#allocation12_spill] sm:$0xff] }
 0x2a2   : > { %v3899_v46 = vrot.slane %v7788_v26, 2  ;;  %v4716_v38 = vsel %vm4405_vm13, 0.0, %v4624_v27  ;;  %v4627_v56 = vsel %vm4580_vm0, %v7546_v51, %v4626_v58  ;;  %v3888_v50 = vmax.f32 %v7771_v43, %v3887_v33  ;;  %v8569_v33 = vld [vmem:[#allocation4_spill] sm:$0xff] }
 0x2a3   : > { %v3895_v20 = vmax.f32 %v7807_v37, %v3894_v11  ;;  %4732 = vst.msk [vmem:[%s7923_s18 + $0x28] sm:$0xff] %vm3454_vm1, %v4716_v38  ;;  %v4628_v10 = vsel %vm4582_vm2, %v7604_v23, %v4627_v56  ;;  %vm4407_vm15 = vcmp.gt.f32.partialorder %v8011_v55, 0.5  ;;  %v4632_v57 = vsel %vm4576_vm9, %v7712_v25, %v7725_v63  ;;  %v4384_v23 = vpop.xlane.xlu1 %4383  ;;  %v8573_v25 = vld [vmem:[#allocation69_spill] sm:$0xff]  ;;  %v8580_v12 = vld [vmem:[#allocation8_spill] sm:$0xff]  ;;  %v8582_v56 = vld [vmem:[#allocation82_spill] sm:$0xff] }
 0x2a4   : > { %v3900_v61 = vmax.f32 %v7788_v26, %v3899_v46  ;;  %v3846_v51 = vmax.f32 %v3844_v52, %v3845_v35  ;;  %v4629_v18 = vsel %vm4584_vm3, %v3832_v45, %v4628_v10  ;;  %v4633_v43 = vsel %vm4578_vm12, %v8568_v49, %v4632_v57  ;;  %v4387_v45 = vpop.xlane.xlu0 %4386  ;;  %v8579_v52 = vld [vmem:[#allocation80_spill] sm:$0xff]  ;;  %v8581_v35 = vld [vmem:[#allocation11_spill] sm:$0xff] }
 0x2a5   : > { %v8570_v37 = vrot.slane %v8569_v33, 1  ;;  %v4630_v26 = vsel %vm4586_vm6, %v3839_v24, %v4629_v18  ;;  %v4634_v60 = vsel %vm4580_vm0, %v8571_v9, %v4633_v43  ;;  %v4641_v63 = vsel %vm4580_vm0, %v8573_v25, %v8572_v22  ;;  %v8576_v24 = vld [vmem:[#allocation79_spill] sm:$0xff]  ;;  %v8588_v43 = vld [vmem:[#allocation78_spill] sm:$0xff]  ;;  %v8591_v9 = vld [vmem:[#allocation24_spill] sm:$0xff] }
 0x2a6   : > { %v3901_v5 = vrot.slane %v3900_v61, 1  ;;  %v4631_v8 = vsel %vm4588_vm4, %v3846_v51, %v4630_v26  ;;  %v4635_v54 = vsel %vm4582_vm2, %v7786_v0, %v4634_v60  ;;  %vm4408_vm9 = vcmp.gt.f32.partialorder %v4378_v40, 0.5  ;;  %v8585_v51 = vld [vmem:[#allocation14_spill] sm:$0xff]  ;;  %v8586_v55 = vld [vmem:[#allocation91_spill] sm:$0xff]  ;;  %v8590_v26 = vld [vmem:[#allocation96_spill] sm:$0xff] }
 0x2a7   : > { %v3958_v36 = vmax.f32 %v8569_v33, %v8570_v37  ;;  %v4642_v4 = vsel %vm4582_vm2, %v8574_v44, %v4641_v63  ;;  %v4717_v6 = vsel %vm4406_vm14, 0.0, %v4631_v8  ;;  %v4636_v30 = vsel %vm4584_vm3, %v3888_v50, %v4635_v54  ;;  %v4390_v57 = vpop.xlane.xlu1 %4389  ;;  %v8587_v40 = vld [vmem:[#allocation90_spill] sm:$0xff]  ;;  %v8592_v60 = vld [vmem:[#allocation23_spill] sm:$0xff] }
 0x2a8   : > { %v3902_v41 = vmax.f32 %v3900_v61, %v3901_v5  ;;  %v4643_v31 = vsel %vm4584_vm3, %v8575_v1, %v4642_v4  ;;  %4733 = vst.msk [vmem:[%s7923_s18 + $0x30] sm:$0xff] %vm3454_vm1, %v4717_v6  ;;  %v4637_v0 = vsel %vm4586_vm6, %v3895_v20, %v4636_v30  ;;  %v8578_v48 = vrot.slane %v8577_v34, 1  ;;  %v8583_v20 = vld [vmem:[#allocation64_spill] sm:$0xff]  ;;  %v8593_v63 = vld [vmem:[#allocation94_spill] sm:$0xff]  ;;  %v4393_v30 = vpop.xlane.xlu0 %4392 }
 0x2a9   : > { %v4644_v47 = vsel %vm4586_vm6, %v8576_v24, %v4643_v31  ;;  %v4648_v13 = vsel %vm4580_vm0, %v8580_v12, %v8579_v52  ;;  %vm4409_vm12 = vcmp.gt.f32.partialorder %v4381_v29, 0.5  ;;  %v8584_v10 = vrot.slane %v8583_v20, 1  ;;  %v8594_v54 = vld [vmem:[#allocation26_spill] sm:$0xff]  ;;  %v8595_v4 = vld [vmem:[#allocation32_spill] sm:$0xff]  ;;  %v8602_v12 = vld [vmem:[#allocation31_spill] sm:$0xff] }
 0x2aa   : > { %v4014_v32 = vmax.f32 %v8577_v34, %v8578_v48  ;;  %v4638_v11 = vsel %vm4588_vm4, %v3902_v41, %v4637_v0  ;;  %v4645_v27 = vsel %vm4588_vm4, %v3958_v36, %v4644_v47  ;;  %v4649_v58 = vsel %vm4582_vm2, %v8581_v35, %v4648_v13  ;;  %v8597_v1 = vld [vmem:[#allocation66_spill] sm:$0xff]  ;;  %v8598_v0 = vld [vmem:[#allocation25_spill] sm:$0xff] }
 0x2ab   : > { %v4718_v46 = vsel %vm4407_vm15, 0.0, %v4638_v11  ;;  %v4719_v38 = vsel %vm4408_vm9, 0.0, %v4645_v27  ;;  %v4650_v50 = vsel %vm4584_vm3, %v8582_v56, %v4649_v58  ;;  %v4070_v61 = vmax.f32 %v8583_v20, %v8584_v10  ;;  %v8599_v24 = vld [vmem:[#allocation30_spill] sm:$0xff]  ;;  %v8600_v47 = vld [vmem:[#allocation29_spill] sm:$0xff]  ;;  %v8605_v56 = vld [vmem:[#allocation35_spill] sm:$0xff]  ;;  %v4396_v10 = vpop.xlane.xlu1 %4395 }
 0x2ac   : > { %4734 = vst.msk [vmem:[%s7923_s18 + $0x38] sm:$0xff] %vm3454_vm1, %v4718_v46  ;;  %4735 = vst.msk [vmem:[%s7923_s18 + $0x40] sm:$0xff] %vm3454_vm1, %v4719_v38  ;;  %v4651_v18 = vsel %vm4586_vm6, %v8585_v51, %v4650_v50  ;;  %vm4410_vm5 = vcmp.gt.f32.partialorder %v4384_v23, 0.5  ;;  %v4655_v49 = vsel %vm4580_vm0, %v8587_v40, %v8586_v55  ;;  %v8589_v33 = vrot.slane %v8588_v43, 1  ;;  %v8604_v46 = vld [vmem:[#allocation10_spill] sm:$0xff]  ;;  %v8607_v51 = vld [vmem:[#allocation33_spill] sm:$0xff] }
 0x2ad   : > { %v4652_v36 = vsel %vm4588_vm4, %v4014_v32, %v4651_v18  ;;  %v4656_v5 = vsel %vm4582_vm2, %v8590_v26, %v4655_v49  ;;  %vm4411_vm7 = vcmp.gt.f32.partialorder %v4387_v45, 0.5  ;;  %v4662_v22 = vsel %vm4580_vm0, %v8592_v60, %v8591_v9  ;;  %v8601_v32 = vld [vmem:[#allocation28_spill] sm:$0xff]  ;;  %v8606_v50 = vld [vmem:[#allocation34_spill] sm:$0xff]  ;;  %v8608_v55 = vld [vmem:[#allocation89_spill] sm:$0xff] }
 0x2ae   : > { %v4126_v37 = vmax.f32 %v8588_v43, %v8589_v33  ;;  %v4720_v25 = vsel %vm4409_vm12, 0.0, %v4652_v36  ;;  %v4657_v8 = vsel %vm4584_vm3, %v8593_v63, %v4656_v5  ;;  %v4663_v44 = vsel %vm4582_vm2, %v8594_v54, %v4662_v22  ;;  %v4399_v36 = vpop.xlane.xlu0 %4398 }
 0x2af   : > { %v8596_v6 = vrot.slane %v8595_v4, 1  ;;  %4736 = vst.msk [vmem:[%s7923_s18 + $0x48] sm:$0xff] %vm3454_vm1, %v4720_v25  ;;  %v4658_v31 = vsel %vm4586_vm6, %v8597_v1, %v4657_v8  ;;  %v4664_v29 = vsel %vm4584_vm3, %v8598_v0, %v4663_v44  ;;  %vm4412_vm8 = vcmp.gt.f32.partialorder %v4390_v57, 0.5 }
 0x2b0   : > { %v4669_v34 = vsel %vm4580_vm0, %v8600_v47, %v8599_v24  ;;  %v4659_v48 = vsel %vm4588_vm4, %v4070_v61, %v4658_v31  ;;  %v4665_v52 = vsel %vm4586_vm6, %v8601_v32, %v4664_v29  ;;  %v8603_v11 = vrot.slane %v7874_v19, 1 }
 0x2b1   : > { %v4182_v41 = vmax.f32 %v8595_v4, %v8596_v6  ;;  %v4670_v13 = vsel %vm4582_vm2, %v8602_v12, %v4669_v34  ;;  %v4721_v35 = vsel %vm4410_vm5, 0.0, %v4659_v48  ;;  %v4666_v58 = vsel %vm4588_vm4, %v4126_v37, %v4665_v52 }
 0x2b2   : > { %v4238_v27 = vmax.f32 %v7874_v19, %v8603_v11  ;;  %v4671_v38 = vsel %vm4584_vm3, %v8604_v46, %v4670_v13  ;;  %v4676_v20 = vsel %vm4580_vm0, %v8606_v50, %v8605_v56  ;;  %4737 = vst.msk [vmem:[%s7923_s18 + $0x50] sm:$0xff] %vm3454_vm1, %v4721_v35  ;;  %v4722_v61 = vsel %vm4411_vm7, 0.0, %v4666_v58 }
 0x2b3   : > { %v4672_v19 = vsel %vm4586_vm6, %v8607_v51, %v4671_v38  ;;  %vm4413_vm10 = vcmp.gt.f32.partialorder %v4393_v30, 0.5  ;;  %v4677_v23 = vsel %vm4582_vm2, %v7774_v7, %v4676_v20  ;;  %4738 = vst.msk [vmem:[%s7923_s18 + $0x58] sm:$0xff] %vm3454_vm1, %v4722_v61  ;;  %v8609_v49 = vrot.slane %v7898_v17, 1 }
 0x2b4   : > { %v4673_v18 = vsel %vm4588_vm4, %v4182_v41, %v4672_v19  ;;  %v4678_v40 = vsel %vm4584_vm3, %v8608_v55, %v4677_v23  ;;  %v4683_v43 = vsel %vm4580_vm0, %v7842_v28, %v7830_v62  ;;  %vm4414_vm11 = vcmp.gt.f32.partialorder %v4396_v10, 0.5 }
 0x2b5   : > { %v4294_v45 = vmax.f32 %v7898_v17, %v8609_v49  ;;  %v4723_v33 = vsel %vm4412_vm8, 0.0, %v4673_v18  ;;  %v4679_v7 = vsel %vm4586_vm6, %v7795_v53, %v4678_v40  ;;  %v4684_v37 = vsel %vm4582_vm2, %v7855_v59, %v4683_v43 }
 0x2b6   : > { %4739 = vst.msk [vmem:[%s7923_s18 + $0x60] sm:$0xff] %vm3454_vm1, %v4723_v33  ;;  %v4680_v26 = vsel %vm4588_vm4, %v4238_v27, %v4679_v7  ;;  %v4685_v17 = vsel %vm4584_vm3, %v7863_v21, %v4684_v37  ;;  %v8610_v62 = vrot.slane %v7888_v16, 1  ;;  %v4690_v53 = vsel %vm4580_vm0, %v7857_v15, %v7845_v14 }
 0x2b7   : > { %v4724_v59 = vsel %vm4413_vm10, 0.0, %v4680_v26  ;;  %v4686_v57 = vsel %vm4586_vm6, %v7872_v42, %v4685_v17  ;;  %v4691_v5 = vsel %vm4582_vm2, %v7868_v3, %v4690_v53  ;;  %vm4415_vm13 = vcmp.gt.f32.partialorder %v4399_v36, 0.5 }
 0x2b8   : > { %v4350_v28 = vmax.f32 %v7888_v16, %v8610_v62  ;;  %4740 = vst.msk [vmem:[%s7923_s18 + $0x68] sm:$0xff] %vm3454_vm1, %v4724_v59  ;;  %v4687_v21 = vsel %vm4588_vm4, %v4294_v45, %v4686_v57  ;;  %v4692_v16 = vsel %vm4584_vm3, %v7877_v39, %v4691_v5 }
 0x2b9   : > { %v4725_v9 = vsel %vm4414_vm11, 0.0, %v4687_v21  ;;  %v4693_v14 = vsel %vm4586_vm6, %v7896_v2, %v4692_v16 }
 0x2ba   : > { %4741 = vst.msk [vmem:[%s7923_s18 + $0x70] sm:$0xff] %vm3454_vm1, %v4725_v9  ;;  %v4694_v15 = vsel %vm4588_vm4, %v4350_v28, %v4693_v14 }
 0x2bb   : > { %v4726_v42 = vsel %vm4415_vm13, 0.0, %v4694_v15 }
 0x2bc   : > { %4742 = vst.msk [vmem:[%s7923_s18 + $0x78] sm:$0xff] %vm3454_vm1, %v4726_v42 }
 0x2bd PF: > { %s16_s21 = sadd.s32 1, %s5645_s21  }
 0x2be   : > { %p13_p5 = scmp.ge.s32.totalorder %s16_s21, 4  }
 0x2c0   :  { %15 = sbr.rel (!%p13_p5) target bundleno = 1 (0x1), region = 77 }

</bundles_post_ra>
